<compile_context>
chip_gen: v7x
topology: tpu7x:2x2x1
jax: 0.10.0
libtpu: 0.0.40
codegen_flags: <defaults>
</compile_context>

<pallas_src>
import functools

import jax
import jax.numpy as jnp
from jax import lax
from jax.experimental import pallas as pl
from jax.experimental.pallas import tpu as pltpu

LEAKY_SLOPE = 0.2
LANE = 128


def _round_up(x, m):
    return ((x + m - 1) // m) * m


# --------------------------------------------------------------------------- #
# Pallas kernels
# --------------------------------------------------------------------------- #
def _mlp_kernel(*refs, acts):
    """Fused chain of (x @ W + b -> activation). refs = (x, w0, b0, w1, b1, ..., out)."""
    x_ref, out_ref = refs[0], refs[-1]
    wb = refs[1:-1]
    x = x_ref[...]
    for layer in range(len(wb) // 2):
        w_ref, b_ref = wb[2 * layer], wb[2 * layer + 1]
        x = jnp.dot(x, w_ref[...], preferred_element_type=jnp.float32) + b_ref[...]
        act = acts[layer]
        if act == "leaky_relu":
            x = jnp.where(x >= 0.0, x, LEAKY_SLOPE * x)
        elif act == "relu":
            x = jnp.maximum(x, 0.0)
    out_ref[...] = x.astype(out_ref.dtype)


def _mdn_head_kernel(h_ref,
                     w1_ref, b1_ref, w2_ref, b2_ref, w3_ref, b3_ref, w4_ref, b4_ref,
                     wpi_ref, bpi_ref, wmu_ref, bmu_ref, wsg_ref, bsg_ref,
                     pi_ref, mu_ref, sigma_ref, *, n_mixture):
    """fc trunk (Linear+ReLU x3, Linear) fused with the pi/mu/sigma MDN heads."""
    x = h_ref[...]
    x = jnp.maximum(jnp.dot(x, w1_ref[...], preferred_element_type=jnp.float32) + b1_ref[...], 0.0)
    x = jnp.maximum(jnp.dot(x, w2_ref[...], preferred_element_type=jnp.float32) + b2_ref[...], 0.0)
    x = jnp.maximum(jnp.dot(x, w3_ref[...], preferred_element_type=jnp.float32) + b3_ref[...], 0.0)
    x = jnp.dot(x, w4_ref[...], preferred_element_type=jnp.float32) + b4_ref[...]

    # pi head: softmax over the mixture axis; padded lanes masked out before the max/sum.
    logits = jnp.dot(x, wpi_ref[...], preferred_element_type=jnp.float32) + bpi_ref[...]
    col = lax.broadcasted_iota(jnp.int32, logits.shape, 1)
    logits = jnp.where(col < n_mixture, logits, jnp.float32(-1e30))
    m = jnp.max(logits, axis=1, keepdims=True)
    e = jnp.exp(logits - m)
    pi_ref[...] = (e / jnp.sum(e, axis=1, keepdims=True)).astype(pi_ref.dtype)

    # mu head: plain linear.
    mu_ref[...] = (jnp.dot(x, wmu_ref[...], preferred_element_type=jnp.float32)
                   + bmu_ref[...]).astype(mu_ref.dtype)

    # sigma head: numerically stable softplus (exp/log go to the EUP slot).
    s = jnp.dot(x, wsg_ref[...], preferred_element_type=jnp.float32) + bsg_ref[...]
    sigma_ref[...] = (jnp.maximum(s, 0.0)
                      + jnp.log(1.0 + jnp.exp(-jnp.abs(s)))).astype(sigma_ref.dtype)


# --------------------------------------------------------------------------- #
# Pallas-call wrappers
# --------------------------------------------------------------------------- #
def _resident(a):
    # Full-array block with a constant index map -> stays VMEM-resident across the grid.
    return pl.BlockSpec(a.shape, lambda i: (0,) * a.ndim)


def fused_mlp(x, weights, biases, acts, *, tile_rows=512):
    """x: (R, K0) f32 with K0 a multiple of 128. weights[i]: (K_i, K_{i+1}),
    biases[i]: (1, K_{i+1}); all dims multiples of 128 (zero padded).
    Returns (R, K_last) f32 (rows sliced back; columns still lane-padded)."""
    R, K0 = x.shape
    assert K0 == weights[0].shape[0]
    n_out = weights[-1].shape[1]
    tile = min(tile_rows, _round_up(R, 8))
    Rp = _round_up(R, tile)
    if Rp != R:
        x = jnp.pad(x, ((0, Rp - R), (0, 0)))

    args = [x]
    in_specs = [pl.BlockSpec((tile, K0), lambda i: (i, 0))]
    for w, b in zip(weights, biases):
        args += [w, b]
        in_specs += [_resident(w), _resident(b)]

    out = pl.pallas_call(
        functools.partial(_mlp_kernel, acts=tuple(acts)),
        grid=(Rp // tile,),
        out_shape=jax.ShapeDtypeStruct((Rp, n_out), jnp.float32),
        in_specs=in_specs,
        out_specs=pl.BlockSpec((tile, n_out), lambda i: (i, 0)),
        compiler_params=pltpu.CompilerParams(dimension_semantics=("parallel",)),
    )(*args)
    return out[:R]


def mdn_head(h, p, n_mixture, n_outputs, *, tile_rows=512):
    """h: (B, Hp) f32 with Hp a multiple of 128. Returns (pi, mu, sigma)."""
    B, Hp = h.shape
    tile = min(tile_rows, _round_up(B, 8))
    Bp = _round_up(B, tile)
    if Bp != B:
        h = jnp.pad(h, ((0, Bp - B), (0, 0)))

    wb = [p["fc_w1"], p["fc_b1"], p["fc_w2"], p["fc_b2"],
          p["fc_w3"], p["fc_b3"], p["fc_w4"], p["fc_b4"],
          p["pi_w"], p["pi_b"], p["mu_w"], p["mu_b"],
          p["sigma_w"], p["sigma_b"]]
    npi = p["pi_w"].shape[1]
    nmo = p["mu_w"].shape[1]

    pi_p, mu_p, sg_p = pl.pallas_call(
        functools.partial(_mdn_head_kernel, n_mixture=n_mixture),
        grid=(Bp // tile,),
        out_shape=(jax.ShapeDtypeStruct((Bp, npi), jnp.float32),
                   jax.ShapeDtypeStruct((Bp, nmo), jnp.float32),
                   jax.ShapeDtypeStruct((Bp, nmo), jnp.float32)),
        in_specs=[pl.BlockSpec((tile, Hp), lambda i: (i, 0))] + [_resident(a) for a in wb],
        out_specs=(pl.BlockSpec((tile, npi), lambda i: (i, 0)),
                   pl.BlockSpec((tile, nmo), lambda i: (i, 0)),
                   pl.BlockSpec((tile, nmo), lambda i: (i, 0))),
        compiler_params=pltpu.CompilerParams(dimension_semantics=("parallel",)),
    )(h, *wb)

    pi = pi_p[:B, :n_mixture]
    mu = mu_p[:B, :n_mixture * n_outputs].reshape(B, n_mixture, n_outputs)
    sigma = sg_p[:B, :n_mixture * n_outputs].reshape(B, n_mixture, n_outputs)
    return pi, mu, sigma


def _im2col(x, k=4, stride=2, pad=1):
    """x: (B, C, H, W) -> patches (B*Ho*Wo, C*k*k) ordered (C, kh, kw); plus Ho, Wo."""
    B, C, H, W = x.shape
    Ho = (H + 2 * pad - k) // stride + 1
    Wo = (W + 2 * pad - k) // stride + 1
    xp = jnp.pad(x, ((0, 0), (0, 0), (pad, pad), (pad, pad)))
    cols = []
    for kh in range(k):
        for kw in range(k):
            cols.append(xp[:, :, kh::stride, kw::stride][:, :, :Ho, :Wo])
    patches = jnp.stack(cols, axis=2)              # (B, C, k*k, Ho, Wo)
    patches = patches.transpose(0, 3, 4, 1, 2)     # (B, Ho, Wo, C, k*k)
    return patches.reshape(B * Ho * Wo, C * k * k), Ho, Wo


def conv2d_s2(x, w_pad, b_pad, c_out, act):
    """PyTorch Conv2d(k=4, stride=2, pad=1) as im2col + Pallas matmul (+ LeakyReLU)."""
    B = x.shape[0]
    patches, Ho, Wo = _im2col(x)
    k_real, k_pad = patches.shape[1], w_pad.shape[0]
    if k_pad != k_real:
        patches = jnp.pad(patches, ((0, 0), (0, k_pad - k_real)))
    y = fused_mlp(patches, [w_pad], [b_pad], [act])
    return y[:, :c_out].reshape(B, Ho, Wo, c_out).transpose(0, 3, 1, 2)


# --------------------------------------------------------------------------- #
# Full PolicyMDN forward (sample=False path)
# --------------------------------------------------------------------------- #
def policy_mdn_forward(state_images, states, params, cfg):
    B = state_images.shape[0]
    x = state_images.reshape(B, cfg["n_inputs"] * 3, cfg["height"], cfg["width"])

    # f_encoder: stride-2 convs; LeakyReLU(0.2) after all but the last.
    n_conv = len(params["conv_w"])
    for i in range(n_conv):
        act = "leaky_relu" if i < n_conv - 1 else "none"
        x = conv2d_s2(x, params["conv_w"][i], params["conv_b"][i],
                      cfg["feature_maps"][i], act)
    h = x.reshape(B, cfg["hsize"])

    # s_encoder: 3-layer MLP (LeakyReLU, LeakyReLU, linear), fused in one kernel.
    s = states.reshape(B, -1)
    k0 = params["s_w"][0].shape[0]
    s = jnp.pad(s, ((0, 0), (0, k0 - s.shape[1])))
    s_out = fused_mlp(s, params["s_w"], params["s_b"],
                      ["leaky_relu", "leaky_relu", "none"])
    h = h + s_out[:, :cfg["hsize"]]

    # fc trunk + MDN heads, fused in one kernel.
    hp = _round_up(cfg["hsize"], LANE)
    if hp != cfg["hsize"]:
        h = jnp.pad(h, ((0, 0), (0, hp - cfg["hsize"])))
    pi, mu, sigma = mdn_head(h, params, cfg["n_mixture"], cfg["n_outputs"])

    # TODO(synk): sample=True path (torch.multinomial + gaussian draw) and the
    # stats-based input/output normalization are not implemented; returns a=None.
    return pi, mu, sigma, None


# --------------------------------------------------------------------------- #
# Parameters (synthetic, deterministic) + pure-JAX reference
# --------------------------------------------------------------------------- #
def init_params(key, cfg):
    """Linear weights stored as (in, out); conv weights as (C_in*4*4, C_out); biases (1, out).
    Returns (true_params, padded_params); padded versions have dims rounded up to 128."""
    keys = iter(jax.random.split(key, 64))

    def lin(fan_in, fan_out):
        bound = 1.0 / float(fan_in) ** 0.5
        w = jax.random.uniform(next(keys), (fan_in, fan_out), jnp.float32, -bound, bound)
        b = jax.random.uniform(next(keys), (1, fan_out), jnp.float32, -bound, bound)
        return w, b

    def pad_wb(w, b):
        kp, np_ = _round_up(w.shape[0], LANE), _round_up(w.shape[1], LANE)
        return (jnp.pad(w, ((0, kp - w.shape[0]), (0, np_ - w.shape[1]))),
                jnp.pad(b, ((0, 0), (0, np_ - b.shape[1]))))

    true, padded = {}, {}

    # f_encoder convs
    chans = [cfg["n_inputs"] * 3] + list(cfg["feature_maps"])
    cw, cb, cwp, cbp = [], [], [], []
    for cin, cout in zip(chans[:-1], chans[1:]):
        w, b = lin(cin * 16, cout)
        wp, bp = pad_wb(w, b)
        cw.append(w); cb.append(b); cwp.append(wp); cbp.append(bp)
    true["conv_w"], true["conv_b"] = cw, cb
    padded["conv_w"], padded["conv_b"] = cwp, cbp

    # s_encoder (hidden width = last feature map, output = hidden_size)
    n_hid_enc = cfg["feature_maps"][-1]
    dims = [4 * cfg["n_inputs"], n_hid_enc, n_hid_enc, cfg["hidden_size"]]
    sw, sb, swp, sbp = [], [], [], []
    for din, dout in zip(dims[:-1], dims[1:]):
        w, b = lin(din, dout)
        wp, bp = pad_wb(w, b)
        sw.append(w); sb.append(b); swp.append(wp); sbp.append(bp)
    true["s_w"], true["s_b"] = sw, sb
    padded["s_w"], padded["s_b"] = swp, sbp

    # fc trunk + MDN heads
    def add(name, din, dout):
        w, b = lin(din, dout)
        wp, bp = pad_wb(w, b)
        true[name + "_w"], true[name + "_b"] = w, b
        padded[name + "_w"], padded[name + "_b"] = wp, bp

    add("fc_w1"[:-3] + "_w1"[1:] if False else "fc_w1"[:2] + "_w1"[1:], 0, 0) if False else None
    add("fc_w1".replace("_w1", "") + "_w1"[1:], 0, 0) if False else None
    # (straightforward definitions below)
    add("fc1", cfg["hsize"], cfg["n_hidden"])
    add("fc2", cfg["n_hidden"], cfg["n_hidden"])
    add("fc3", cfg["n_hidden"], cfg["n_hidden"])
    add("fc4", cfg["n_hidden"], cfg["n_hidden"])
    add("pi", cfg["n_hidden"], cfg["n_mixture"])
    add("mu", cfg["n_hidden"], cfg["n_mixture"] * cfg["n_outputs"])
    add("sigma", cfg["n_hidden"], cfg["n_mixture"] * cfg["n_outputs"])

    # Rename fcN_{w,b} -> fc_{w,b}N to match the head wrapper's keys.
    for d in (true, padded):
        for n in (1, 2, 3, 4):
            d[f"fc_w{n}"] = d.pop(f"fc{n}_w")
            d[f"fc_b{n}"] = d.pop(f"fc{n}_b")
    return true, padded


def policy_mdn_ref(state_images, states, p, cfg):
    """Pure-JAX reference of the PyTorch PolicyMDN.forward (sample=False)."""
    B = state_images.shape[0]
    x = state_images.reshape(B, cfg["n_inputs"] * 3, cfg["height"], cfg["width"])
    n_conv = len(p["conv_w"])
    for i in range(n_conv):
        w_mm = p["conv_w"][i]
        cout, cin = w_mm.shape[1], w_mm.shape[0] // 16
        w = w_mm.T.reshape(cout, cin, 4, 4)                       # OIHW
        x = lax.conv_general_dilated(x, w, (2, 2), ((1, 1), (1, 1)),
                                     dimension_numbers=("NCHW", "OIHW", "NCHW"),
                                     precision=lax.Precision.HIGHEST)
        x = x + p["conv_b"][i].reshape(1, cout, 1, 1)
        if i < n_conv - 1:
            x = jnp.where(x >= 0.0, x, LEAKY_SLOPE * x)
    h = x.reshape(B, cfg["hsize"])

    s = states.reshape(B, -1)
    for l in range(3):
        s = jnp.dot(s, p["s_w"][l], precision=lax.Precision.HIGHEST) + p["s_b"][l]
        if l < 2:
            s = jnp.where(s >= 0.0, s, LEAKY_SLOPE * s)
    h = h + s

    mm = lambda a, w, b: jnp.dot(a, w, precision=lax.Precision.HIGHEST) + b
    x = jnp.maximum(mm(h, p["fc_w1"], p["fc_b1"]), 0.0)
    x = jnp.maximum(mm(x, p["fc_w2"], p["fc_b2"]), 0.0)
    x = jnp.maximum(mm(x, p["fc_w3"], p["fc_b3"]), 0.0)
    x = mm(x, p["fc_w4"], p["fc_b4"])

    pi = jax.nn.softmax(mm(x, p["pi_w"], p["pi_b"]), axis=1)
    mu = mm(x, p["mu_w"], p["mu_b"]).reshape(B, cfg["n_mixture"], cfg["n_outputs"])
    sigma = jax.nn.softplus(mm(x, p["sigma_w"], p["sigma_b"])).reshape(
        B, cfg["n_mixture"], cfg["n_outputs"])
    return pi, mu, sigma


if __name__ == "__main__":
    # opt: layers=3, ncond=2, nfeature=32, height=width=16, n_hidden=256,
    #      n_mixture=10, n_actions=2, npred=1.  hidden_size must equal
    #      nfeature * h_height * h_width for the encoder's h + s_encoder addition.
    ncond, nfeature, height, width, n_layers = 2, 32, 16, 16, 3
    feature_maps = (nfeature // 4, nfeature // 2, nfeature)
    h_height, h_width = height // 2 ** n_layers, width // 2 ** n_layers
    hsize = nfeature * h_height * h_width                      # 128
    cfg = dict(n_inputs=ncond, height=height, width=width, feature_maps=feature_maps,
               hsize=hsize, hidden_size=hsize, n_hidden=256,
               n_mixture=10, npred=1, n_actions=2)
    cfg["n_outputs"] = cfg["npred"] * cfg["n_actions"]

    key = jax.random.PRNGKey(0)
    k_img, k_state, k_param = jax.random.split(key, 3)
    true_params, padded_params = init_params(k_param, cfg)

    B = 4
    state_images = jax.random.normal(k_img, (B, ncond, 3, height, width), jnp.float32)
    states = jax.random.normal(k_state, (B, ncond, 4), jnp.float32)

    fwd = jax.jit(lambda imgs, st: policy_mdn_forward(imgs, st, padded_params, cfg))
    pi, mu, sigma, a = fwd(state_images, states)
    pi, mu, sigma = jax.block_until_ready((pi, mu, sigma))

    pi_r, mu_r, sg_r = policy_mdn_ref(state_images, states, true_params, cfg)

    assert pi.shape == (B, cfg["n_mixture"])
    assert mu.shape == (B, cfg["n_mixture"], cfg["n_outputs"])
    assert sigma.shape == (B, cfg["n_mixture"], cfg["n_outputs"])
    assert a is None
    assert bool(jnp.allclose(jnp.sum(pi, axis=1), 1.0, atol=1e-5)), "pi not normalized"
    assert bool(jnp.allclose(pi, pi_r, atol=2e-3, rtol=2e-3)), "pi mismatch vs reference"
    assert bool(jnp.allclose(mu, mu_r, atol=2e-3, rtol=2e-3)), "mu mismatch vs reference"
    assert bool(jnp.allclose(sigma, sg_r, atol=2e-3, rtol=2e-3)), "sigma mismatch vs reference"

    print("KERNEL_OK")
</pallas_src>

<mosaic_0001>
module attributes {stable_mosaic.version = 11 : i64} {
  func.func @_mlp_kernel(%arg0: i32, %arg1: memref<256x128xf32, #tpu.memory_space<vmem>>, %arg2: memref<128x128xf32, #tpu.memory_space<vmem>>, %arg3: memref<1x128xf32, #tpu.memory_space<vmem>>, %arg4: memref<256x128xf32, #tpu.memory_space<vmem>>) attributes {dimension_semantics = [#tpu.dimension_semantics<parallel>], iteration_bounds = array<i64: 1>, scalar_prefetch = 0 : i64, scratch_operands = 0 : i64, tpu.core_type = #tpu.core_type<tc>, window_params = [{transform_indices = @transform_0, window_bounds = array<i64: 256, 128>}, {pipeline_mode = #tpu.pipeline_mode<synchronous>, transform_indices = @transform_1, window_bounds = array<i64: 128, 128>}, {pipeline_mode = #tpu.pipeline_mode<synchronous>, transform_indices = @transform_2, window_bounds = array<i64: 1, 128>}, {transform_indices = @transform_3, window_bounds = array<i64: 256, 128>}]} {
    %c0 = arith.constant 0 : index
    %c0_0 = arith.constant 0 : index
    %0 = vector.load %arg1[%c0, %c0_0] : memref<256x128xf32, #tpu.memory_space<vmem>>, vector<256x128xf32>
    %c0_1 = arith.constant 0 : index
    %c0_2 = arith.constant 0 : index
    %1 = vector.load %arg2[%c0_1, %c0_2] : memref<128x128xf32, #tpu.memory_space<vmem>>, vector<128x128xf32>
    %cst = arith.constant dense<0.000000e+00> : vector<256x128xf32>
    %2 = tpu.matmul %0, %1, %cst {dimension_numbers = #tpu.dot_dimension_numbers<[1], [0], [0], [1], [0, 0, 1, 1], [], []>} : vector<256x128xf32>, vector<128x128xf32>, vector<256x128xf32> -> vector<256x128xf32>
    %c0_3 = arith.constant 0 : index
    %c0_4 = arith.constant 0 : index
    %3 = vector.load %arg3[%c0_3, %c0_4] : memref<1x128xf32, #tpu.memory_space<vmem>>, vector<1x128xf32>
    %4 = vector.broadcast %3 : vector<1x128xf32> to vector<256x128xf32>
    %5 = arith.addf %2, %4 : vector<256x128xf32>
    %cst_5 = arith.constant 0.000000e+00 : f32
    %6 = vector.broadcast %cst_5 : f32 to vector<256x128xf32>
    %7 = arith.cmpf oge, %5, %6 : vector<256x128xf32>
    %cst_6 = arith.constant 2.000000e-01 : f32
    %8 = vector.broadcast %cst_6 : f32 to vector<256x128xf32>
    %9 = arith.mulf %8, %5 : vector<256x128xf32>
    %10 = arith.select %7, %5, %9 : vector<256x128xi1>, vector<256x128xf32>
    %c0_7 = arith.constant 0 : index
    %c0_8 = arith.constant 0 : index
    %11 = vector.load %arg4[%c0_7, %c0_8] : memref<256x128xf32, #tpu.memory_space<vmem>>, vector<256x128xf32>
    tpu.vector_store %arg4[%c0_7, %c0_8], %10 {strides = array<i32>} : memref<256x128xf32, #tpu.memory_space<vmem>>, vector<256x128xf32>,
    return
  }
  func.func @transform_0(%arg0: i32) -> (i32, i32) {
    %c0_i32 = arith.constant 0 : i32
    %c0_i32_0 = arith.constant 0 : i32
    return %arg0, %c0_i32 : i32, i32
  }
  func.func @transform_1(%arg0: i32) -> (i32, i32) {
    %c0_i32 = arith.constant 0 : i32
    %c0_i32_0 = arith.constant 0 : i32
    %c0_i32_1 = arith.constant 0 : i32
    return %c0_i32, %c0_i32_0 : i32, i32
  }
  func.func @transform_2(%arg0: i32) -> (i32, i32) {
    %c0_i32 = arith.constant 0 : i32
    %c0_i32_0 = arith.constant 0 : i32
    %c0_i32_1 = arith.constant 0 : i32
    return %c0_i32, %c0_i32_0 : i32, i32
  }
  func.func @transform_3(%arg0: i32) -> (i32, i32) {
    %c0_i32 = arith.constant 0 : i32
    %c0_i32_0 = arith.constant 0 : i32
    return %arg0, %c0_i32 : i32, i32
  }
}

module attributes {stable_mosaic.version = 11 : i64} {
  func.func @_mlp_kernel(%arg0: i32, %arg1: memref<64x128xf32, #tpu.memory_space<vmem>>, %arg2: memref<128x128xf32, #tpu.memory_space<vmem>>, %arg3: memref<1x128xf32, #tpu.memory_space<vmem>>, %arg4: memref<64x128xf32, #tpu.memory_space<vmem>>) attributes {dimension_semantics = [#tpu.dimension_semantics<parallel>], iteration_bounds = array<i64: 1>, scalar_prefetch = 0 : i64, scratch_operands = 0 : i64, tpu.core_type = #tpu.core_type<tc>, window_params = [{transform_indices = @transform_0, window_bounds = array<i64: 64, 128>}, {pipeline_mode = #tpu.pipeline_mode<synchronous>, transform_indices = @transform_1, window_bounds = array<i64: 128, 128>}, {pipeline_mode = #tpu.pipeline_mode<synchronous>, transform_indices = @transform_2, window_bounds = array<i64: 1, 128>}, {transform_indices = @transform_3, window_bounds = array<i64: 64, 128>}]} {
    %c0 = arith.constant 0 : index
    %c0_0 = arith.constant 0 : index
    %0 = vector.load %arg1[%c0, %c0_0] : memref<64x128xf32, #tpu.memory_space<vmem>>, vector<64x128xf32>
    %c0_1 = arith.constant 0 : index
    %c0_2 = arith.constant 0 : index
    %1 = vector.load %arg2[%c0_1, %c0_2] : memref<128x128xf32, #tpu.memory_space<vmem>>, vector<128x128xf32>
    %cst = arith.constant dense<0.000000e+00> : vector<64x128xf32>
    %2 = tpu.matmul %0, %1, %cst {dimension_numbers = #tpu.dot_dimension_numbers<[1], [0], [0], [1], [0, 0, 1, 1], [], []>} : vector<64x128xf32>, vector<128x128xf32>, vector<64x128xf32> -> vector<64x128xf32>
    %c0_3 = arith.constant 0 : index
    %c0_4 = arith.constant 0 : index
    %3 = vector.load %arg3[%c0_3, %c0_4] : memref<1x128xf32, #tpu.memory_space<vmem>>, vector<1x128xf32>
    %4 = vector.broadcast %3 : vector<1x128xf32> to vector<64x128xf32>
    %5 = arith.addf %2, %4 : vector<64x128xf32>
    %cst_5 = arith.constant 0.000000e+00 : f32
    %6 = vector.broadcast %cst_5 : f32 to vector<64x128xf32>
    %7 = arith.cmpf oge, %5, %6 : vector<64x128xf32>
    %cst_6 = arith.constant 2.000000e-01 : f32
    %8 = vector.broadcast %cst_6 : f32 to vector<64x128xf32>
    %9 = arith.mulf %8, %5 : vector<64x128xf32>
    %10 = arith.select %7, %5, %9 : vector<64x128xi1>, vector<64x128xf32>
    %c0_7 = arith.constant 0 : index
    %c0_8 = arith.constant 0 : index
    %11 = vector.load %arg4[%c0_7, %c0_8] : memref<64x128xf32, #tpu.memory_space<vmem>>, vector<64x128xf32>
    tpu.vector_store %arg4[%c0_7, %c0_8], %10 {strides = array<i32>} : memref<64x128xf32, #tpu.memory_space<vmem>>, vector<64x128xf32>,
    return
  }
  func.func @transform_0(%arg0: i32) -> (i32, i32) {
    %c0_i32 = arith.constant 0 : i32
    %c0_i32_0 = arith.constant 0 : i32
    return %arg0, %c0_i32 : i32, i32
  }
  func.func @transform_1(%arg0: i32) -> (i32, i32) {
    %c0_i32 = arith.constant 0 : i32
    %c0_i32_0 = arith.constant 0 : i32
    %c0_i32_1 = arith.constant 0 : i32
    return %c0_i32, %c0_i32_0 : i32, i32
  }
  func.func @transform_2(%arg0: i32) -> (i32, i32) {
    %c0_i32 = arith.constant 0 : i32
    %c0_i32_0 = arith.constant 0 : i32
    %c0_i32_1 = arith.constant 0 : i32
    return %c0_i32, %c0_i32_0 : i32, i32
  }
  func.func @transform_3(%arg0: i32) -> (i32, i32) {
    %c0_i32 = arith.constant 0 : i32
    %c0_i32_0 = arith.constant 0 : i32
    return %arg0, %c0_i32 : i32, i32
  }
}

module attributes {stable_mosaic.version = 11 : i64} {
  func.func @_mlp_kernel(%arg0: i32, %arg1: memref<16x256xf32, #tpu.memory_space<vmem>>, %arg2: memref<256x128xf32, #tpu.memory_space<vmem>>, %arg3: memref<1x128xf32, #tpu.memory_space<vmem>>, %arg4: memref<16x128xf32, #tpu.memory_space<vmem>>) attributes {dimension_semantics = [#tpu.dimension_semantics<parallel>], iteration_bounds = array<i64: 1>, scalar_prefetch = 0 : i64, scratch_operands = 0 : i64, tpu.core_type = #tpu.core_type<tc>, window_params = [{transform_indices = @transform_0, window_bounds = array<i64: 16, 256>}, {pipeline_mode = #tpu.pipeline_mode<synchronous>, transform_indices = @transform_1, window_bounds = array<i64: 256, 128>}, {pipeline_mode = #tpu.pipeline_mode<synchronous>, transform_indices = @transform_2, window_bounds = array<i64: 1, 128>}, {transform_indices = @transform_3, window_bounds = array<i64: 16, 128>}]} {
    %c0 = arith.constant 0 : index
    %c0_0 = arith.constant 0 : index
    %0 = vector.load %arg1[%c0, %c0_0] : memref<16x256xf32, #tpu.memory_space<vmem>>, vector<16x256xf32>
    %c0_1 = arith.constant 0 : index
    %c0_2 = arith.constant 0 : index
    %1 = vector.load %arg2[%c0_1, %c0_2] : memref<256x128xf32, #tpu.memory_space<vmem>>, vector<256x128xf32>
    %cst = arith.constant dense<0.000000e+00> : vector<16x128xf32>
    %2 = tpu.matmul %0, %1, %cst {dimension_numbers = #tpu.dot_dimension_numbers<[1], [0], [0], [1], [0, 0, 1, 1], [], []>} : vector<16x256xf32>, vector<256x128xf32>, vector<16x128xf32> -> vector<16x128xf32>
    %c0_3 = arith.constant 0 : index
    %c0_4 = arith.constant 0 : index
    %3 = vector.load %arg3[%c0_3, %c0_4] : memref<1x128xf32, #tpu.memory_space<vmem>>, vector<1x128xf32>
    %4 = vector.broadcast %3 : vector<1x128xf32> to vector<16x128xf32>
    %5 = arith.addf %2, %4 : vector<16x128xf32>
    %c0_5 = arith.constant 0 : index
    %c0_6 = arith.constant 0 : index
    %6 = vector.load %arg4[%c0_5, %c0_6] : memref<16x128xf32, #tpu.memory_space<vmem>>, vector<16x128xf32>
    tpu.vector_store %arg4[%c0_5, %c0_6], %5 {strides = array<i32>} : memref<16x128xf32, #tpu.memory_space<vmem>>, vector<16x128xf32>,
    return
  }
  func.func @transform_0(%arg0: i32) -> (i32, i32) {
    %c0_i32 = arith.constant 0 : i32
    %c0_i32_0 = arith.constant 0 : i32
    return %arg0, %c0_i32 : i32, i32
  }
  func.func @transform_1(%arg0: i32) -> (i32, i32) {
    %c0_i32 = arith.constant 0 : i32
    %c0_i32_0 = arith.constant 0 : i32
    %c0_i32_1 = arith.constant 0 : i32
    return %c0_i32, %c0_i32_0 : i32, i32
  }
  func.func @transform_2(%arg0: i32) -> (i32, i32) {
    %c0_i32 = arith.constant 0 : i32
    %c0_i32_0 = arith.constant 0 : i32
    %c0_i32_1 = arith.constant 0 : i32
    return %c0_i32, %c0_i32_0 : i32, i32
  }
  func.func @transform_3(%arg0: i32) -> (i32, i32) {
    %c0_i32 = arith.constant 0 : i32
    %c0_i32_0 = arith.constant 0 : i32
    return %arg0, %c0_i32 : i32, i32
  }
}

module attributes {stable_mosaic.version = 11 : i64} {
  func.func @_mlp_kernel(%arg0: i32, %arg1: memref<8x128xf32, #tpu.memory_space<vmem>>, %arg2: memref<128x128xf32, #tpu.memory_space<vmem>>, %arg3: memref<1x128xf32, #tpu.memory_space<vmem>>, %arg4: memref<128x128xf32, #tpu.memory_space<vmem>>, %arg5: memref<1x128xf32, #tpu.memory_space<vmem>>, %arg6: memref<128x128xf32, #tpu.memory_space<vmem>>, %arg7: memref<1x128xf32, #tpu.memory_space<vmem>>, %arg8: memref<8x128xf32, #tpu.memory_space<vmem>>) attributes {dimension_semantics = [#tpu.dimension_semantics<parallel>], iteration_bounds = array<i64: 1>, scalar_prefetch = 0 : i64, scratch_operands = 0 : i64, tpu.core_type = #tpu.core_type<tc>, window_params = [{transform_indices = @transform_0, window_bounds = array<i64: 8, 128>}, {pipeline_mode = #tpu.pipeline_mode<synchronous>, transform_indices = @transform_1, window_bounds = array<i64: 128, 128>}, {pipeline_mode = #tpu.pipeline_mode<synchronous>, transform_indices = @transform_2, window_bounds = array<i64: 1, 128>}, {pipeline_mode = #tpu.pipeline_mode<synchronous>, transform_indices = @transform_3, window_bounds = array<i64: 128, 128>}, {pipeline_mode = #tpu.pipeline_mode<synchronous>, transform_indices = @transform_4, window_bounds = array<i64: 1, 128>}, {pipeline_mode = #tpu.pipeline_mode<synchronous>, transform_indices = @transform_5, window_bounds = array<i64: 128, 128>}, {pipeline_mode = #tpu.pipeline_mode<synchronous>, transform_indices = @transform_6, window_bounds = array<i64: 1, 128>}, {transform_indices = @transform_7, window_bounds = array<i64: 8, 128>}]} {
    %c0 = arith.constant 0 : index
    %c0_0 = arith.constant 0 : index
    %0 = vector.load %arg1[%c0, %c0_0] : memref<8x128xf32, #tpu.memory_space<vmem>>, vector<8x128xf32>
    %c0_1 = arith.constant 0 : index
    %c0_2 = arith.constant 0 : index
    %1 = vector.load %arg2[%c0_1, %c0_2] : memref<128x128xf32, #tpu.memory_space<vmem>>, vector<128x128xf32>
    %cst = arith.constant dense<0.000000e+00> : vector<8x128xf32>
    %2 = tpu.matmul %0, %1, %cst {dimension_numbers = #tpu.dot_dimension_numbers<[1], [0], [0], [1], [0, 0, 1, 1], [], []>} : vector<8x128xf32>, vector<128x128xf32>, vector<8x128xf32> -> vector<8x128xf32>
    %c0_3 = arith.constant 0 : index
    %c0_4 = arith.constant 0 : index
    %3 = vector.load %arg3[%c0_3, %c0_4] : memref<1x128xf32, #tpu.memory_space<vmem>>, vector<1x128xf32>
    %4 = vector.broadcast %3 : vector<1x128xf32> to vector<8x128xf32>
    %5 = arith.addf %2, %4 : vector<8x128xf32>
    %cst_5 = arith.constant 0.000000e+00 : f32
    %6 = vector.broadcast %cst_5 : f32 to vector<8x128xf32>
    %7 = arith.cmpf oge, %5, %6 : vector<8x128xf32>
    %cst_6 = arith.constant 2.000000e-01 : f32
    %8 = vector.broadcast %cst_6 : f32 to vector<8x128xf32>
    %9 = arith.mulf %8, %5 : vector<8x128xf32>
    %10 = arith.select %7, %5, %9 : vector<8x128xi1>, vector<8x128xf32>
    %c0_7 = arith.constant 0 : index
    %c0_8 = arith.constant 0 : index
    %11 = vector.load %arg4[%c0_7, %c0_8] : memref<128x128xf32, #tpu.memory_space<vmem>>, vector<128x128xf32>
    %cst_9 = arith.constant dense<0.000000e+00> : vector<8x128xf32>
    %12 = tpu.matmul %10, %11, %cst_9 {dimension_numbers = #tpu.dot_dimension_numbers<[1], [0], [0], [1], [0, 0, 1, 1], [], []>} : vector<8x128xf32>, vector<128x128xf32>, vector<8x128xf32> -> vector<8x128xf32>
    %c0_10 = arith.constant 0 : index
    %c0_11 = arith.constant 0 : index
    %13 = vector.load %arg5[%c0_10, %c0_11] : memref<1x128xf32, #tpu.memory_space<vmem>>, vector<1x128xf32>
    %14 = vector.broadcast %13 : vector<1x128xf32> to vector<8x128xf32>
    %15 = arith.addf %12, %14 : vector<8x128xf32>
    %cst_12 = arith.constant 0.000000e+00 : f32
    %16 = vector.broadcast %cst_12 : f32 to vector<8x128xf32>
    %17 = arith.cmpf oge, %15, %16 : vector<8x128xf32>
    %cst_13 = arith.constant 2.000000e-01 : f32
    %18 = vector.broadcast %cst_13 : f32 to vector<8x128xf32>
    %19 = arith.mulf %18, %15 : vector<8x128xf32>
    %20 = arith.select %17, %15, %19 : vector<8x128xi1>, vector<8x128xf32>
    %c0_14 = arith.constant 0 : index
    %c0_15 = arith.constant 0 : index
    %21 = vector.load %arg6[%c0_14, %c0_15] : memref<128x128xf32, #tpu.memory_space<vmem>>, vector<128x128xf32>
    %cst_16 = arith.constant dense<0.000000e+00> : vector<8x128xf32>
    %22 = tpu.matmul %20, %21, %cst_16 {dimension_numbers = #tpu.dot_dimension_numbers<[1], [0], [0], [1], [0, 0, 1, 1], [], []>} : vector<8x128xf32>, vector<128x128xf32>, vector<8x128xf32> -> vector<8x128xf32>
    %c0_17 = arith.constant 0 : index
    %c0_18 = arith.constant 0 : index
    %23 = vector.load %arg7[%c0_17, %c0_18] : memref<1x128xf32, #tpu.memory_space<vmem>>, vector<1x128xf32>
    %24 = vector.broadcast %23 : vector<1x128xf32> to vector<8x128xf32>
    %25 = arith.addf %22, %24 : vector<8x128xf32>
    %c0_19 = arith.constant 0 : index
    %c0_20 = arith.constant 0 : index
    %26 = vector.load %arg8[%c0_19, %c0_20] : memref<8x128xf32, #tpu.memory_space<vmem>>, vector<8x128xf32>
    tpu.vector_store %arg8[%c0_19, %c0_20], %25 {strides = array<i32>} : memref<8x128xf32, #tpu.memory_space<vmem>>, vector<8x128xf32>,
    return
  }
  func.func @transform_0(%arg0: i32) -> (i32, i32) {
    %c0_i32 = arith.constant 0 : i32
    %c0_i32_0 = arith.constant 0 : i32
    return %arg0, %c0_i32 : i32, i32
  }
  func.func @transform_1(%arg0: i32) -> (i32, i32) {
    %c0_i32 = arith.constant 0 : i32
    %c0_i32_0 = arith.constant 0 : i32
    %c0_i32_1 = arith.constant 0 : i32
    return %c0_i32, %c0_i32_0 : i32, i32
  }
  func.func @transform_2(%arg0: i32) -> (i32, i32) {
    %c0_i32 = arith.constant 0 : i32
    %c0_i32_0 = arith.constant 0 : i32
    %c0_i32_1 = arith.constant 0 : i32
    return %c0_i32, %c0_i32_0 : i32, i32
  }
  func.func @transform_3(%arg0: i32) -> (i32, i32) {
    %c0_i32 = arith.constant 0 : i32
    %c0_i32_0 = arith.constant 0 : i32
    %c0_i32_1 = arith.constant 0 : i32
    return %c0_i32, %c0_i32_0 : i32, i32
  }
  func.func @transform_4(%arg0: i32) -> (i32, i32) {
    %c0_i32 = arith.constant 0 : i32
    %c0_i32_0 = arith.constant 0 : i32
    %c0_i32_1 = arith.constant 0 : i32
    return %c0_i32, %c0_i32_0 : i32, i32
  }
  func.func @transform_5(%arg0: i32) -> (i32, i32) {
    %c0_i32 = arith.constant 0 : i32
    %c0_i32_0 = arith.constant 0 : i32
    %c0_i32_1 = arith.constant 0 : i32
    return %c0_i32, %c0_i32_0 : i32, i32
  }
  func.func @transform_6(%arg0: i32) -> (i32, i32) {
    %c0_i32 = arith.constant 0 : i32
    %c0_i32_0 = arith.constant 0 : i32
    %c0_i32_1 = arith.constant 0 : i32
    return %c0_i32, %c0_i32_0 : i32, i32
  }
  func.func @transform_7(%arg0: i32) -> (i32, i32) {
    %c0_i32 = arith.constant 0 : i32
    %c0_i32_0 = arith.constant 0 : i32
    return %arg0, %c0_i32 : i32, i32
  }
}

module attributes {stable_mosaic.version = 11 : i64} {
  func.func @_mdn_head_kernel(%arg0: i32, %arg1: memref<8x128xf32, #tpu.memory_space<vmem>>, %arg2: memref<128x256xf32, #tpu.memory_space<vmem>>, %arg3: memref<1x256xf32, #tpu.memory_space<vmem>>, %arg4: memref<256x256xf32, #tpu.memory_space<vmem>>, %arg5: memref<1x256xf32, #tpu.memory_space<vmem>>, %arg6: memref<256x256xf32, #tpu.memory_space<vmem>>, %arg7: memref<1x256xf32, #tpu.memory_space<vmem>>, %arg8: memref<256x256xf32, #tpu.memory_space<vmem>>, %arg9: memref<1x256xf32, #tpu.memory_space<vmem>>, %arg10: memref<256x128xf32, #tpu.memory_space<vmem>>, %arg11: memref<1x128xf32, #tpu.memory_space<vmem>>, %arg12: memref<256x128xf32, #tpu.memory_space<vmem>>, %arg13: memref<1x128xf32, #tpu.memory_space<vmem>>, %arg14: memref<256x128xf32, #tpu.memory_space<vmem>>, %arg15: memref<1x128xf32, #tpu.memory_space<vmem>>, %arg16: memref<8x128xf32, #tpu.memory_space<vmem>>, %arg17: memref<8x128xf32, #tpu.memory_space<vmem>>, %arg18: memref<8x128xf32, #tpu.memory_space<vmem>>) attributes {dimension_semantics = [#tpu.dimension_semantics<parallel>], iteration_bounds = array<i64: 1>, scalar_prefetch = 0 : i64, scratch_operands = 0 : i64, tpu.core_type = #tpu.core_type<tc>, window_params = [{transform_indices = @transform_0, window_bounds = array<i64: 8, 128>}, {pipeline_mode = #tpu.pipeline_mode<synchronous>, transform_indices = @transform_1, window_bounds = array<i64: 128, 256>}, {pipeline_mode = #tpu.pipeline_mode<synchronous>, transform_indices = @transform_2, window_bounds = array<i64: 1, 256>}, {pipeline_mode = #tpu.pipeline_mode<synchronous>, transform_indices = @transform_3, window_bounds = array<i64: 256, 256>}, {pipeline_mode = #tpu.pipeline_mode<synchronous>, transform_indices = @transform_4, window_bounds = array<i64: 1, 256>}, {pipeline_mode = #tpu.pipeline_mode<synchronous>, transform_indices = @transform_5, window_bounds = array<i64: 256, 256>}, {pipeline_mode = #tpu.pipeline_mode<synchronous>, transform_indices = @transform_6, window_bounds = array<i64: 1, 256>}, {pipeline_mode = #tpu.pipeline_mode<synchronous>, transform_indices = @transform_7, window_bounds = array<i64: 256, 256>}, {pipeline_mode = #tpu.pipeline_mode<synchronous>, transform_indices = @transform_8, window_bounds = array<i64: 1, 256>}, {pipeline_mode = #tpu.pipeline_mode<synchronous>, transform_indices = @transform_9, window_bounds = array<i64: 256, 128>}, {pipeline_mode = #tpu.pipeline_mode<synchronous>, transform_indices = @transform_10, window_bounds = array<i64: 1, 128>}, {pipeline_mode = #tpu.pipeline_mode<synchronous>, transform_indices = @transform_11, window_bounds = array<i64: 256, 128>}, {pipeline_mode = #tpu.pipeline_mode<synchronous>, transform_indices = @transform_12, window_bounds = array<i64: 1, 128>}, {pipeline_mode = #tpu.pipeline_mode<synchronous>, transform_indices = @transform_13, window_bounds = array<i64: 256, 128>}, {pipeline_mode = #tpu.pipeline_mode<synchronous>, transform_indices = @transform_14, window_bounds = array<i64: 1, 128>}, {transform_indices = @transform_15, window_bounds = array<i64: 8, 128>}, {transform_indices = @transform_16, window_bounds = array<i64: 8, 128>}, {transform_indices = @transform_17, window_bounds = array<i64: 8, 128>}]} {
    %c0 = arith.constant 0 : index
    %c0_0 = arith.constant 0 : index
    %0 = vector.load %arg1[%c0, %c0_0] : memref<8x128xf32, #tpu.memory_space<vmem>>, vector<8x128xf32>
    %c0_1 = arith.constant 0 : index
    %c0_2 = arith.constant 0 : index
    %1 = vector.load %arg2[%c0_1, %c0_2] : memref<128x256xf32, #tpu.memory_space<vmem>>, vector<128x256xf32>
    %cst = arith.constant dense<0.000000e+00> : vector<8x256xf32>
    %2 = tpu.matmul %0, %1, %cst {dimension_numbers = #tpu.dot_dimension_numbers<[1], [0], [0], [1], [0, 0, 1, 1], [], []>} : vector<8x128xf32>, vector<128x256xf32>, vector<8x256xf32> -> vector<8x256xf32>
    %c0_3 = arith.constant 0 : index
    %c0_4 = arith.constant 0 : index
    %3 = vector.load %arg3[%c0_3, %c0_4] : memref<1x256xf32, #tpu.memory_space<vmem>>, vector<1x256xf32>
    %4 = vector.broadcast %3 : vector<1x256xf32> to vector<8x256xf32>
    %5 = arith.addf %2, %4 : vector<8x256xf32>
    %cst_5 = arith.constant 0.000000e+00 : f32
    %6 = vector.broadcast %cst_5 : f32 to vector<8x256xf32>
    %7 = arith.maximumf %5, %6 : vector<8x256xf32>
    %c0_6 = arith.constant 0 : index
    %c0_7 = arith.constant 0 : index
    %8 = vector.load %arg4[%c0_6, %c0_7] : memref<256x256xf32, #tpu.memory_space<vmem>>, vector<256x256xf32>
    %cst_8 = arith.constant dense<0.000000e+00> : vector<8x256xf32>
    %9 = tpu.matmul %7, %8, %cst_8 {dimension_numbers = #tpu.dot_dimension_numbers<[1], [0], [0], [1], [0, 0, 1, 1], [], []>} : vector<8x256xf32>, vector<256x256xf32>, vector<8x256xf32> -> vector<8x256xf32>
    %c0_9 = arith.constant 0 : index
    %c0_10 = arith.constant 0 : index
    %10 = vector.load %arg5[%c0_9, %c0_10] : memref<1x256xf32, #tpu.memory_space<vmem>>, vector<1x256xf32>
    %11 = vector.broadcast %10 : vector<1x256xf32> to vector<8x256xf32>
    %12 = arith.addf %9, %11 : vector<8x256xf32>
    %cst_11 = arith.constant 0.000000e+00 : f32
    %13 = vector.broadcast %cst_11 : f32 to vector<8x256xf32>
    %14 = arith.maximumf %12, %13 : vector<8x256xf32>
    %c0_12 = arith.constant 0 : index
    %c0_13 = arith.constant 0 : index
    %15 = vector.load %arg6[%c0_12, %c0_13] : memref<256x256xf32, #tpu.memory_space<vmem>>, vector<256x256xf32>
    %cst_14 = arith.constant dense<0.000000e+00> : vector<8x256xf32>
    %16 = tpu.matmul %14, %15, %cst_14 {dimension_numbers = #tpu.dot_dimension_numbers<[1], [0], [0], [1], [0, 0, 1, 1], [], []>} : vector<8x256xf32>, vector<256x256xf32>, vector<8x256xf32> -> vector<8x256xf32>
    %c0_15 = arith.constant 0 : index
    %c0_16 = arith.constant 0 : index
    %17 = vector.load %arg7[%c0_15, %c0_16] : memref<1x256xf32, #tpu.memory_space<vmem>>, vector<1x256xf32>
    %18 = vector.broadcast %17 : vector<1x256xf32> to vector<8x256xf32>
    %19 = arith.addf %16, %18 : vector<8x256xf32>
    %cst_17 = arith.constant 0.000000e+00 : f32
    %20 = vector.broadcast %cst_17 : f32 to vector<8x256xf32>
    %21 = arith.maximumf %19, %20 : vector<8x256xf32>
    %c0_18 = arith.constant 0 : index
    %c0_19 = arith.constant 0 : index
    %22 = vector.load %arg8[%c0_18, %c0_19] : memref<256x256xf32, #tpu.memory_space<vmem>>, vector<256x256xf32>
    %cst_20 = arith.constant dense<0.000000e+00> : vector<8x256xf32>
    %23 = tpu.matmul %21, %22, %cst_20 {dimension_numbers = #tpu.dot_dimension_numbers<[1], [0], [0], [1], [0, 0, 1, 1], [], []>} : vector<8x256xf32>, vector<256x256xf32>, vector<8x256xf32> -> vector<8x256xf32>
    %c0_21 = arith.constant 0 : index
    %c0_22 = arith.constant 0 : index
    %24 = vector.load %arg9[%c0_21, %c0_22] : memref<1x256xf32, #tpu.memory_space<vmem>>, vector<1x256xf32>
    %25 = vector.broadcast %24 : vector<1x256xf32> to vector<8x256xf32>
    %26 = arith.addf %23, %25 : vector<8x256xf32>
    %c0_23 = arith.constant 0 : index
    %c0_24 = arith.constant 0 : index
    %27 = vector.load %arg10[%c0_23, %c0_24] : memref<256x128xf32, #tpu.memory_space<vmem>>, vector<256x128xf32>
    %cst_25 = arith.constant dense<0.000000e+00> : vector<8x128xf32>
    %28 = tpu.matmul %26, %27, %cst_25 {dimension_numbers = #tpu.dot_dimension_numbers<[1], [0], [0], [1], [0, 0, 1, 1], [], []>} : vector<8x256xf32>, vector<256x128xf32>, vector<8x128xf32> -> vector<8x128xf32>
    %c0_26 = arith.constant 0 : index
    %c0_27 = arith.constant 0 : index
    %29 = vector.load %arg11[%c0_26, %c0_27] : memref<1x128xf32, #tpu.memory_space<vmem>>, vector<1x128xf32>
    %30 = vector.broadcast %29 : vector<1x128xf32> to vector<8x128xf32>
    %31 = arith.addf %28, %30 : vector<8x128xf32>
    %32 = tpu.iota {dimensions = array<i32: 1>} : vector<8x128xi32>
    %c10_i32 = arith.constant 10 : i32
    %33 = vector.broadcast %c10_i32 : i32 to vector<8x128xi32>
    %34 = arith.cmpi slt, %32, %33 : vector<8x128xi32>
    %cst_28 = arith.constant -1.000000e+30 : f32
    %35 = vector.broadcast %cst_28 : f32 to vector<8x128xf32>
    %36 = arith.select %34, %31, %35 : vector<8x128xi1>, vector<8x128xf32>
    %cst_29 = arith.constant dense<0xFF800000> : vector<8xf32>
    %37 = vector.multi_reduction <maximumf>, %36, %cst_29 [1] : vector<8x128xf32> to vector<8xf32>
    %38 = vector.shape_cast %37 : vector<8xf32> to vector<8x1xf32>
    %39 = vector.broadcast %38 : vector<8x1xf32> to vector<8x128xf32>
    %40 = arith.subf %36, %39 : vector<8x128xf32>
    %41 = math.exp %40 : vector<8x128xf32>
    %cst_30 = arith.constant dense<0.000000e+00> : vector<8xf32>
    %42 = vector.multi_reduction <add>, %41, %cst_30 [1] : vector<8x128xf32> to vector<8xf32>
    %43 = vector.shape_cast %42 : vector<8xf32> to vector<8x1xf32>
    %44 = vector.broadcast %43 : vector<8x1xf32> to vector<8x128xf32>
    %45 = arith.divf %41, %44 : vector<8x128xf32>
    %c0_31 = arith.constant 0 : index
    %c0_32 = arith.constant 0 : index
    %46 = vector.load %arg16[%c0_31, %c0_32] : memref<8x128xf32, #tpu.memory_space<vmem>>, vector<8x128xf32>
    tpu.vector_store %arg16[%c0_31, %c0_32], %45 {strides = array<i32>} : memref<8x128xf32, #tpu.memory_space<vmem>>, vector<8x128xf32>,
    %c0_33 = arith.constant 0 : index
    %c0_34 = arith.constant 0 : index
    %47 = vector.load %arg12[%c0_33, %c0_34] : memref<256x128xf32, #tpu.memory_space<vmem>>, vector<256x128xf32>
    %cst_35 = arith.constant dense<0.000000e+00> : vector<8x128xf32>
    %48 = tpu.matmul %26, %47, %cst_35 {dimension_numbers = #tpu.dot_dimension_numbers<[1], [0], [0], [1], [0, 0, 1, 1], [], []>} : vector<8x256xf32>, vector<256x128xf32>, vector<8x128xf32> -> vector<8x128xf32>
    %c0_36 = arith.constant 0 : index
    %c0_37 = arith.constant 0 : index
    %49 = vector.load %arg13[%c0_36, %c0_37] : memref<1x128xf32, #tpu.memory_space<vmem>>, vector<1x128xf32>
    %50 = vector.broadcast %49 : vector<1x128xf32> to vector<8x128xf32>
    %51 = arith.addf %48, %50 : vector<8x128xf32>
    %c0_38 = arith.constant 0 : index
    %c0_39 = arith.constant 0 : index
    %52 = vector.load %arg17[%c0_38, %c0_39] : memref<8x128xf32, #tpu.memory_space<vmem>>, vector<8x128xf32>
    tpu.vector_store %arg17[%c0_38, %c0_39], %51 {strides = array<i32>} : memref<8x128xf32, #tpu.memory_space<vmem>>, vector<8x128xf32>,
    %c0_40 = arith.constant 0 : index
    %c0_41 = arith.constant 0 : index
    %53 = vector.load %arg14[%c0_40, %c0_41] : memref<256x128xf32, #tpu.memory_space<vmem>>, vector<256x128xf32>
    %cst_42 = arith.constant dense<0.000000e+00> : vector<8x128xf32>
    %54 = tpu.matmul %26, %53, %cst_42 {dimension_numbers = #tpu.dot_dimension_numbers<[1], [0], [0], [1], [0, 0, 1, 1], [], []>} : vector<8x256xf32>, vector<256x128xf32>, vector<8x128xf32> -> vector<8x128xf32>
    %c0_43 = arith.constant 0 : index
    %c0_44 = arith.constant 0 : index
    %55 = vector.load %arg15[%c0_43, %c0_44] : memref<1x128xf32, #tpu.memory_space<vmem>>, vector<1x128xf32>
    %56 = vector.broadcast %55 : vector<1x128xf32> to vector<8x128xf32>
    %57 = arith.addf %54, %56 : vector<8x128xf32>
    %cst_45 = arith.constant 0.000000e+00 : f32
    %58 = vector.broadcast %cst_45 : f32 to vector<8x128xf32>
    %59 = arith.maximumf %57, %58 : vector<8x128xf32>
    %60 = math.absf %57 : vector<8x128xf32>
    %cst_46 = arith.constant 0.000000e+00 : f32
    %61 = vector.broadcast %cst_46 : f32 to vector<8x128xf32>
    %62 = arith.subf %61, %60 : vector<8x128xf32>
    %63 = math.exp %62 : vector<8x128xf32>
    %cst_47 = arith.constant 1.000000e+00 : f32
    %64 = vector.broadcast %cst_47 : f32 to vector<8x128xf32>
    %65 = arith.addf %64, %63 : vector<8x128xf32>
    %66 = math.log %65 : vector<8x128xf32>
    %67 = arith.addf %59, %66 : vector<8x128xf32>
    %c0_48 = arith.constant 0 : index
    %c0_49 = arith.constant 0 : index
    %68 = vector.load %arg18[%c0_48, %c0_49] : memref<8x128xf32, #tpu.memory_space<vmem>>, vector<8x128xf32>
    tpu.vector_store %arg18[%c0_48, %c0_49], %67 {strides = array<i32>} : memref<8x128xf32, #tpu.memory_space<vmem>>, vector<8x128xf32>,
    return
  }
  func.func @transform_0(%arg0: i32) -> (i32, i32) {
    %c0_i32 = arith.constant 0 : i32
    %c0_i32_0 = arith.constant 0 : i32
    return %arg0, %c0_i32 : i32, i32
  }
  func.func @transform_1(%arg0: i32) -> (i32, i32) {
    %c0_i32 = arith.constant 0 : i32
    %c0_i32_0 = arith.constant 0 : i32
    %c0_i32_1 = arith.constant 0 : i32
    return %c0_i32, %c0_i32_0 : i32, i32
  }
  func.func @transform_2(%arg0: i32) -> (i32, i32) {
    %c0_i32 = arith.constant 0 : i32
    %c0_i32_0 = arith.constant 0 : i32
    %c0_i32_1 = arith.constant 0 : i32
    return %c0_i32, %c0_i32_0 : i32, i32
  }
  func.func @transform_3(%arg0: i32) -> (i32, i32) {
    %c0_i32 = arith.constant 0 : i32
    %c0_i32_0 = arith.constant 0 : i32
    %c0_i32_1 = arith.constant 0 : i32
    return %c0_i32, %c0_i32_0 : i32, i32
  }
  func.func @transform_4(%arg0: i32) -> (i32, i32) {
    %c0_i32 = arith.constant 0 : i32
    %c0_i32_0 = arith.constant 0 : i32
    %c0_i32_1 = arith.constant 0 : i32
    return %c0_i32, %c0_i32_0 : i32, i32
  }
  func.func @transform_5(%arg0: i32) -> (i32, i32) {
    %c0_i32 = arith.constant 0 : i32
    %c0_i32_0 = arith.constant 0 : i32
    %c0_i32_1 = arith.constant 0 : i32
    return %c0_i32, %c0_i32_0 : i32, i32
  }
  func.func @transform_6(%arg0: i32) -> (i32, i32) {
    %c0_i32 = arith.constant 0 : i32
    %c0_i32_0 = arith.constant 0 : i32
    %c0_i32_1 = arith.constant 0 : i32
    return %c0_i32, %c0_i32_0 : i32, i32
  }
  func.func @transform_7(%arg0: i32) -> (i32, i32) {
    %c0_i32 = arith.constant 0 : i32
    %c0_i32_0 = arith.constant 0 : i32
    %c0_i32_1 = arith.constant 0 : i32
    return %c0_i32, %c0_i32_0 : i32, i32
  }
  func.func @transform_8(%arg0: i32) -> (i32, i32) {
    %c0_i32 = arith.constant 0 : i32
    %c0_i32_0 = arith.constant 0 : i32
    %c0_i32_1 = arith.constant 0 : i32
    return %c0_i32, %c0_i32_0 : i32, i32
  }
  func.func @transform_9(%arg0: i32) -> (i32, i32) {
    %c0_i32 = arith.constant 0 : i32
    %c0_i32_0 = arith.constant 0 : i32
    %c0_i32_1 = arith.constant 0 : i32
    return %c0_i32, %c0_i32_0 : i32, i32
  }
  func.func @transform_10(%arg0: i32) -> (i32, i32) {
    %c0_i32 = arith.constant 0 : i32
    %c0_i32_0 = arith.constant 0 : i32
    %c0_i32_1 = arith.constant 0 : i32
    return %c0_i32, %c0_i32_0 : i32, i32
  }
  func.func @transform_11(%arg0: i32) -> (i32, i32) {
    %c0_i32 = arith.constant 0 : i32
    %c0_i32_0 = arith.constant 0 : i32
    %c0_i32_1 = arith.constant 0 : i32
    return %c0_i32, %c0_i32_0 : i32, i32
  }
  func.func @transform_12(%arg0: i32) -> (i32, i32) {
    %c0_i32 = arith.constant 0 : i32
    %c0_i32_0 = arith.constant 0 : i32
    %c0_i32_1 = arith.constant 0 : i32
    return %c0_i32, %c0_i32_0 : i32, i32
  }
  func.func @transform_13(%arg0: i32) -> (i32, i32) {
    %c0_i32 = arith.constant 0 : i32
    %c0_i32_0 = arith.constant 0 : i32
    %c0_i32_1 = arith.constant 0 : i32
    return %c0_i32, %c0_i32_0 : i32, i32
  }
  func.func @transform_14(%arg0: i32) -> (i32, i32) {
    %c0_i32 = arith.constant 0 : i32
    %c0_i32_0 = arith.constant 0 : i32
    %c0_i32_1 = arith.constant 0 : i32
    return %c0_i32, %c0_i32_0 : i32, i32
  }
  func.func @transform_15(%arg0: i32) -> (i32, i32) {
    %c0_i32 = arith.constant 0 : i32
    %c0_i32_0 = arith.constant 0 : i32
    return %arg0, %c0_i32 : i32, i32
  }
  func.func @transform_16(%arg0: i32) -> (i32, i32) {
    %c0_i32 = arith.constant 0 : i32
    %c0_i32_0 = arith.constant 0 : i32
    return %arg0, %c0_i32 : i32, i32
  }
  func.func @transform_17(%arg0: i32) -> (i32, i32) {
    %c0_i32 = arith.constant 0 : i32
    %c0_i32_0 = arith.constant 0 : i32
    return %arg0, %c0_i32 : i32, i32
  }
}

</mosaic_0001>

<bundles_post_ra>
// kernel: _lambda_.5
= control target key start
LH: loop header
LB: loop body
LE: loop exit
PB: predicated region body
PF: predicated region fallthrough
CT: control target
= control target key end

     0   :  { %s900_s1 = inlined_call_operand.vmem [shape: f32[128,128], index: 1, kind: input, shape index: {}]   ;;  %s901_s0 = inlined_call_operand.vmem [shape: f32[256,128], index: 0, kind: input, shape index: {}]   ;;  %s902_s2 = inlined_call_operand.vmem [shape: f32[1,128], index: 2, kind: input, shape index: {}]   ;;  %s903_s3 = inlined_call_operand.vmem [shape: f32[256,128], index: 3, kind: output, shape index: {}]  }
   0x1   :  { %v46_v0 = vld [vmem:[%s900_s1] sm:$0xff]  ;;  %v47_v1 = vld [vmem:[%s900_s1 + $0x8] sm:$0xff]  ;;  %v48_v2 = vld [vmem:[%s900_s1 + $0x10] sm:$0xff] }
   0x2   :  { %v555_v3 = vpack.c.bf16 %v47_v1, %v46_v0  ;;  %v49_v4 = vld [vmem:[%s900_s1 + $0x18] sm:$0xff]  ;;  %v50_v6 = vld [vmem:[%s900_s1 + $0x20] sm:$0xff]  ;;  %v51_v7 = vld [vmem:[%s900_s1 + $0x28] sm:$0xff] }
   0x3   :  { %v559_v5 = vpack.c.bf16 %v49_v4, %v48_v2  ;;  %v563_v8 = vpack.c.bf16 %v51_v7, %v50_v6  ;;  %v14_v9 = vld [vmem:[%s901_s0] sm:$0xff]  ;;  %v52_v11 = vld [vmem:[%s900_s1 + $0x30] sm:$0xff]  ;;  %v53_v12 = vld [vmem:[%s900_s1 + $0x38] sm:$0xff] }
   0x4   :  { %556 = vmatprep.subr.bf16.mxu0 %v555_v3  ;;  %587 = vmatprep.subr.bf16.mxu1 %v555_v3  ;;  %v30_v10 = vld [vmem:[%s901_s0 + $0x80] sm:$0xff]  ;;  %v567_v13 = vpack.c.bf16 %v53_v12, %v52_v11  ;;  %v55_v15 = vld [vmem:[%s900_s1 + $0x48] sm:$0xff]  ;;  %v56_v17 = vld [vmem:[%s900_s1 + $0x50] sm:$0xff] }
   0x5   :  { %558 = vmatpush3.bf16.msra.mxu0 %v555_v3  ;;  %595 = vmatpush3.bf16.msra.mxu1 %v555_v3  ;;  %v54_v14 = vld [vmem:[%s900_s1 + $0x40] sm:$0xff]  ;;  %v57_v18 = vld [vmem:[%s900_s1 + $0x58] sm:$0xff]  ;;  %v59_v21 = vld [vmem:[%s900_s1 + $0x68] sm:$0xff] }
   0x6   :  { %560 = vmatprep.subr.bf16.mxu0 %v559_v5  ;;  %588 = vmatprep.subr.bf16.mxu1 %v559_v5  ;;  %v571_v16 = vpack.c.bf16 %v55_v15, %v54_v14  ;;  %v575_v19 = vpack.c.bf16 %v57_v18, %v56_v17  ;;  %v58_v20 = vld [vmem:[%s900_s1 + $0x60] sm:$0xff]  ;;  %v60_v23 = vld [vmem:[%s900_s1 + $0x70] sm:$0xff]  ;;  %v61_v24 = vld [vmem:[%s900_s1 + $0x78] sm:$0xff] }
   0x7   :  { %507 = vmatprep.mubr.f32.mxu0 %v14_v9  ;;  %531 = vmatprep.mubr.f32.mxu1 %v30_v10  ;;  %v579_v22 = vpack.c.bf16 %v59_v21, %v58_v20  ;;  %v583_v25 = vpack.c.bf16 %v61_v24, %v60_v23  ;;  %v15_v26 = vld [vmem:[%s901_s0 + $0x8] sm:$0xff]  ;;  %v16_v28 = vld [vmem:[%s901_s0 + $0x10] sm:$0xff]  ;;  %v17_v30 = vld [vmem:[%s901_s0 + $0x18] sm:$0xff] }
   0x8   :  { %v31_v27 = vld [vmem:[%s901_s0 + $0x88] sm:$0xff]  ;;  %v32_v29 = vld [vmem:[%s901_s0 + $0x90] sm:$0xff]  ;;  %v33_v31 = vld [vmem:[%s901_s0 + $0x98] sm:$0xff] }
   0x9   :  { %562 = vmatpush3.bf16.msra.mxu0 %v559_v5  ;;  %596 = vmatpush3.bf16.msra.mxu1 %v559_v5  ;;  %v18_v32 = vld [vmem:[%s901_s0 + $0x20] sm:$0xff]  ;;  %v19_v34 = vld [vmem:[%s901_s0 + $0x28] sm:$0xff]  ;;  %v20_v36 = vld [vmem:[%s901_s0 + $0x30] sm:$0xff] }
   0xa   :  { %564 = vmatprep.subr.bf16.mxu0 %v563_v8  ;;  %589 = vmatprep.subr.bf16.mxu1 %v563_v8  ;;  %v34_v33 = vld [vmem:[%s901_s0 + $0xa0] sm:$0xff]  ;;  %v35_v35 = vld [vmem:[%s901_s0 + $0xa8] sm:$0xff]  ;;  %v36_v37 = vld [vmem:[%s901_s0 + $0xb0] sm:$0xff] }
   0xb   :  { %v21_v38 = vld [vmem:[%s901_s0 + $0x38] sm:$0xff]  ;;  %v22_v40 = vld [vmem:[%s901_s0 + $0x40] sm:$0xff]  ;;  %v23_v42 = vld [vmem:[%s901_s0 + $0x48] sm:$0xff] }
   0xc   :  { %v37_v39 = vld [vmem:[%s901_s0 + $0xb8] sm:$0xff]  ;;  %v38_v41 = vld [vmem:[%s901_s0 + $0xc0] sm:$0xff]  ;;  %v39_v43 = vld [vmem:[%s901_s0 + $0xc8] sm:$0xff] }
   0xd   :  { %566 = vmatpush3.bf16.msra.mxu0 %v563_v8  ;;  %597 = vmatpush3.bf16.msra.mxu1 %v563_v8  ;;  %v24_v44 = vld [vmem:[%s901_s0 + $0x50] sm:$0xff]  ;;  %v25_v46 = vld [vmem:[%s901_s0 + $0x58] sm:$0xff]  ;;  %v26_v48 = vld [vmem:[%s901_s0 + $0x60] sm:$0xff] }
   0xe   :  { %568 = vmatprep.subr.bf16.mxu0 %v567_v13  ;;  %590 = vmatprep.subr.bf16.mxu1 %v567_v13  ;;  %v40_v45 = vld [vmem:[%s901_s0 + $0xd0] sm:$0xff]  ;;  %v41_v47 = vld [vmem:[%s901_s0 + $0xd8] sm:$0xff]  ;;  %v42_v49 = vld [vmem:[%s901_s0 + $0xe0] sm:$0xff] }
   0xf   :  { %v27_v50 = vld [vmem:[%s901_s0 + $0x68] sm:$0xff]  ;;  %v28_v52 = vld [vmem:[%s901_s0 + $0x70] sm:$0xff]  ;;  %v29_v54 = vld [vmem:[%s901_s0 + $0x78] sm:$0xff] }
  0x10   :  { %v43_v51 = vld [vmem:[%s901_s0 + $0xe8] sm:$0xff]  ;;  %v44_v53 = vld [vmem:[%s901_s0 + $0xf0] sm:$0xff]  ;;  %v45_v55 = vld [vmem:[%s901_s0 + $0xf8] sm:$0xff] }
  0x11   :  { %570 = vmatpush3.bf16.msra.mxu0 %v567_v13  ;;  %598 = vmatpush3.bf16.msra.mxu1 %v567_v13  ;;  %v770_v56 = vld [vmem:[%s902_s2] ss:$0 sm:$0xff] }
  0x12   :  { %572 = vmatprep.subr.bf16.mxu0 %v571_v16  ;;  %591 = vmatprep.subr.bf16.mxu1 %v571_v16 }
  0x15   :  { %574 = vmatpush3.bf16.msra.mxu0 %v571_v16  ;;  %599 = vmatpush3.bf16.msra.mxu1 %v571_v16 }
  0x16   :  { %576 = vmatprep.subr.bf16.mxu0 %v575_v19  ;;  %592 = vmatprep.subr.bf16.mxu1 %v575_v19 }
  0x19   :  { %578 = vmatpush3.bf16.msra.mxu0 %v575_v19  ;;  %600 = vmatpush3.bf16.msra.mxu1 %v575_v19 }
  0x1a   :  { %580 = vmatprep.subr.bf16.mxu0 %v579_v22  ;;  %593 = vmatprep.subr.bf16.mxu1 %v579_v22 }
  0x1d   :  { %582 = vmatpush3.bf16.msra.mxu0 %v579_v22  ;;  %601 = vmatpush3.bf16.msra.mxu1 %v579_v22 }
  0x1e   :  { %584 = vmatprep.subr.bf16.mxu0 %v583_v25  ;;  %594 = vmatprep.subr.bf16.mxu1 %v583_v25 }
  0x21   :  { %586 = vmatpush3.bf16.msra.mxu0 %v583_v25  ;;  %602 = vmatpush3.bf16.msra.mxu1 %v583_v25 }
  0x24   :  { %508 = vmatmul.mubr.f32.vlgmr.msra.gmra.mrb[0].mxu0 %v15_v26  ;;  %532 = vmatmul.mubr.f32.vlgmr.msra.gmra.mrb[0].mxu1 %v31_v27 }
  0x25   :  { %510 = vmatprep.mubr.f32.mxu0 %v16_v28  ;;  %534 = vmatprep.mubr.f32.mxu1 %v32_v29 }
  0x28   :  { %511 = vmatmul.mubr.f32.gmra.mrb[2].mxu0 %v17_v30  ;;  %535 = vmatmul.mubr.f32.gmra.mrb[2].mxu1 %v33_v31 }
  0x29   :  { %513 = vmatprep.mubr.f32.mxu0 %v18_v32  ;;  %537 = vmatprep.mubr.f32.mxu1 %v34_v33 }
  0x2c   :  { %514 = vmatmul.mubr.f32.gmra.mrb[4].mxu0 %v19_v34  ;;  %538 = vmatmul.mubr.f32.gmra.mrb[4].mxu1 %v35_v35 }
  0x2d   :  { %516 = vmatprep.mubr.f32.mxu0 %v20_v36  ;;  %540 = vmatprep.mubr.f32.mxu1 %v36_v37 }
  0x30   :  { %517 = vmatmul.mubr.f32.gmra.mrb[6].mxu0 %v21_v38  ;;  %541 = vmatmul.mubr.f32.gmra.mrb[6].mxu1 %v37_v39 }
  0x31   :  { %519 = vmatprep.mubr.f32.mxu0 %v22_v40  ;;  %543 = vmatprep.mubr.f32.mxu1 %v38_v41 }
  0x34   :  { %520 = vmatmul.mubr.f32.gmra.mrb[8].mxu0 %v23_v42  ;;  %544 = vmatmul.mubr.f32.gmra.mrb[8].mxu1 %v39_v43 }
  0x35   :  { %522 = vmatprep.mubr.f32.mxu0 %v24_v44  ;;  %546 = vmatprep.mubr.f32.mxu1 %v40_v45 }
  0x38   :  { %523 = vmatmul.mubr.f32.gmra.mrb[10].mxu0 %v25_v46  ;;  %547 = vmatmul.mubr.f32.gmra.mrb[10].mxu1 %v41_v47 }
  0x39   :  { %525 = vmatprep.mubr.f32.mxu0 %v26_v48  ;;  %549 = vmatprep.mubr.f32.mxu1 %v42_v49 }
  0x3c   :  { %526 = vmatmul.mubr.f32.gmra.mrb[12].mxu0 %v27_v50  ;;  %550 = vmatmul.mubr.f32.gmra.mrb[12].mxu1 %v43_v51 }
  0x3d   :  { %528 = vmatprep.mubr.f32.mxu0 %v28_v52  ;;  %552 = vmatprep.mubr.f32.mxu1 %v44_v53 }
  0x40   :  { %529 = vmatmul.mubr.f32.gmra.mrb[14].mxu0 %v29_v54  ;;  %553 = vmatmul.mubr.f32.gmra.mrb[14].mxu1 %v45_v55 }
  0xf7   :  { %v509_v57 = vpop.f32.mrb[0].mxu0  ;;  %v533_v58 = vpop.f32.mrb[0].mxu1 }
  0xf8   :  { %v141_v59 = vadd.f32 %v509_v57, %v770_v56  ;;  %v221_v60 = vadd.f32 %v533_v58, %v770_v56  ;;  %v135_v61 = vpop.f32.mrb[1].mxu0  ;;  %v215_v62 = vpop.f32.mrb[1].mxu1 }
  0xf9   :  { %v136_v63 = vadd.f32 %v770_v56, %v135_v61  ;;  %v216_v0 = vadd.f32 %v770_v56, %v215_v62 }
  0xfa   :  { %vm295_vm0 = vcmp.ge.f32.partialorder %v141_v59, 0.0  ;;  %v327_v1 = vmul.f32 0.2, %v141_v59  ;;  %vm311_vm1 = vcmp.ge.f32.partialorder %v221_v60, 0.0  ;;  %v343_v2 = vmul.f32 0.2, %v221_v60 }
  0xfb   :  { %vm294_vm2 = vcmp.ge.f32.partialorder %v136_v63, 0.0  ;;  %v326_v3 = vmul.f32 0.2, %v136_v63  ;;  %vm310_vm3 = vcmp.ge.f32.partialorder %v216_v0, 0.0  ;;  %v342_v4 = vmul.f32 0.2, %v216_v0 }
  0xfc   :  { %v359_v5 = vsel %vm295_vm0, %v141_v59, %v327_v1  ;;  %v375_v6 = vsel %vm311_vm1, %v221_v60, %v343_v2  ;;  %v512_v7 = vpop.f32.mrb[2].mxu0  ;;  %v536_v8 = vpop.f32.mrb[2].mxu1 }
  0xfd   :  { %391 = vst [vmem:[%s903_s3 + $0x8] sm:$0xff] %v359_v5  ;;  %407 = vst [vmem:[%s903_s3 + $0x88] sm:$0xff] %v375_v6  ;;  %v358_v9 = vsel %vm294_vm2, %v136_v63, %v326_v3  ;;  %v374_v10 = vsel %vm310_vm3, %v216_v0, %v342_v4  ;;  %v151_v11 = vadd.f32 %v512_v7, %v770_v56  ;;  %v145_v13 = vpop.f32.mrb[3].mxu0  ;;  %v225_v14 = vpop.f32.mrb[3].mxu1 }
  0xfe   :  { %v231_v12 = vadd.f32 %v536_v8, %v770_v56  ;;  %390 = vst [vmem:[%s903_s3] sm:$0xff] %v358_v9  ;;  %406 = vst [vmem:[%s903_s3 + $0x80] sm:$0xff] %v374_v10  ;;  %v146_v15 = vadd.f32 %v770_v56, %v145_v13  ;;  %v226_v16 = vadd.f32 %v770_v56, %v225_v14 }
  0xff   :  { %vm297_vm4 = vcmp.ge.f32.partialorder %v151_v11, 0.0  ;;  %v329_v17 = vmul.f32 0.2, %v151_v11  ;;  %v515_v23 = vpop.f32.mrb[4].mxu0  ;;  %v539_v24 = vpop.f32.mrb[4].mxu1 }
 0x100   :  { %vm313_vm5 = vcmp.ge.f32.partialorder %v231_v12, 0.0  ;;  %v345_v18 = vmul.f32 0.2, %v231_v12  ;;  %vm296_vm6 = vcmp.ge.f32.partialorder %v146_v15, 0.0  ;;  %v328_v19 = vmul.f32 0.2, %v146_v15 }
 0x101   :  { %vm312_vm7 = vcmp.ge.f32.partialorder %v226_v16, 0.0  ;;  %v344_v20 = vmul.f32 0.2, %v226_v16  ;;  %v361_v21 = vsel %vm297_vm4, %v151_v11, %v329_v17  ;;  %v161_v27 = vadd.f32 %v515_v23, %v770_v56  ;;  %v155_v29 = vpop.f32.mrb[5].mxu0  ;;  %v235_v30 = vpop.f32.mrb[5].mxu1 }
 0x102   :  { %v377_v22 = vsel %vm313_vm5, %v231_v12, %v345_v18  ;;  %393 = vst [vmem:[%s903_s3 + $0x18] sm:$0xff] %v361_v21  ;;  %v360_v25 = vsel %vm296_vm6, %v146_v15, %v328_v19  ;;  %v241_v28 = vadd.f32 %v539_v24, %v770_v56  ;;  %v156_v31 = vadd.f32 %v770_v56, %v155_v29 }
 0x103   :  { %409 = vst [vmem:[%s903_s3 + $0x98] sm:$0xff] %v377_v22  ;;  %v376_v26 = vsel %vm312_vm7, %v226_v16, %v344_v20  ;;  %392 = vst [vmem:[%s903_s3 + $0x10] sm:$0xff] %v360_v25  ;;  %v236_v32 = vadd.f32 %v770_v56, %v235_v30  ;;  %v518_v33 = vpop.f32.mrb[6].mxu0  ;;  %v542_v34 = vpop.f32.mrb[6].mxu1  ;;  %vm299_vm8 = vcmp.ge.f32.partialorder %v161_v27, 0.0 }
 0x104   :  { %408 = vst [vmem:[%s903_s3 + $0x90] sm:$0xff] %v376_v26  ;;  %v331_v35 = vmul.f32 0.2, %v161_v27  ;;  %vm315_vm9 = vcmp.ge.f32.partialorder %v241_v28, 0.0  ;;  %v347_v36 = vmul.f32 0.2, %v241_v28  ;;  %v171_v41 = vadd.f32 %v518_v33, %v770_v56 }
 0x105   :  { %vm298_vm10 = vcmp.ge.f32.partialorder %v156_v31, 0.0  ;;  %v330_v37 = vmul.f32 0.2, %v156_v31  ;;  %vm314_vm11 = vcmp.ge.f32.partialorder %v236_v32, 0.0  ;;  %v346_v38 = vmul.f32 0.2, %v236_v32 }
 0x106   :  { %v363_v39 = vsel %vm299_vm8, %v161_v27, %v331_v35  ;;  %v379_v40 = vsel %vm315_vm9, %v241_v28, %v347_v36  ;;  %v251_v42 = vadd.f32 %v542_v34, %v770_v56  ;;  %v165_v43 = vpop.f32.mrb[7].mxu0  ;;  %v245_v44 = vpop.f32.mrb[7].mxu1  ;;  %vm301_vm12 = vcmp.ge.f32.partialorder %v171_v41, 0.0 }
 0x107   :  { %395 = vst [vmem:[%s903_s3 + $0x28] sm:$0xff] %v363_v39  ;;  %411 = vst [vmem:[%s903_s3 + $0xa8] sm:$0xff] %v379_v40  ;;  %v362_v45 = vsel %vm298_vm10, %v156_v31, %v330_v37  ;;  %v378_v46 = vsel %vm314_vm11, %v236_v32, %v346_v38  ;;  %v166_v47 = vadd.f32 %v770_v56, %v165_v43  ;;  %v521_v49 = vpop.f32.mrb[8].mxu0  ;;  %v545_v50 = vpop.f32.mrb[8].mxu1  ;;  %v333_v51 = vmul.f32 0.2, %v171_v41 }
 0x108   :  { %v246_v48 = vadd.f32 %v770_v56, %v245_v44  ;;  %394 = vst [vmem:[%s903_s3 + $0x20] sm:$0xff] %v362_v45  ;;  %410 = vst [vmem:[%s903_s3 + $0xa0] sm:$0xff] %v378_v46  ;;  %vm317_vm13 = vcmp.ge.f32.partialorder %v251_v42, 0.0  ;;  %v349_v52 = vmul.f32 0.2, %v251_v42  ;;  %v181_v58 = vadd.f32 %v521_v49, %v770_v56  ;;  %v175_v60 = vpop.f32.mrb[9].mxu0 }
 0x109   :  { %vm300_vm14 = vcmp.ge.f32.partialorder %v166_v47, 0.0  ;;  %v332_v53 = vmul.f32 0.2, %v166_v47  ;;  %v365_v55 = vsel %vm301_vm12, %v171_v41, %v333_v51  ;;  %v261_v59 = vadd.f32 %v545_v50, %v770_v56  ;;  %v255_v61 = vpop.f32.mrb[9].mxu1 }
 0x10a   :  { %vm316_vm15 = vcmp.ge.f32.partialorder %v246_v48, 0.0  ;;  %v348_v54 = vmul.f32 0.2, %v246_v48  ;;  %v381_v57 = vsel %vm317_vm13, %v251_v42, %v349_v52  ;;  %397 = vst [vmem:[%s903_s3 + $0x38] sm:$0xff] %v365_v55  ;;  %v176_v0 = vadd.f32 %v770_v56, %v175_v60 }
 0x10b   :  { %413 = vst [vmem:[%s903_s3 + $0xb8] sm:$0xff] %v381_v57  ;;  %v364_v62 = vsel %vm300_vm14, %v166_v47, %v332_v53  ;;  %v256_v1 = vadd.f32 %v770_v56, %v255_v61  ;;  %v524_v2 = vpop.f32.mrb[10].mxu0  ;;  %v548_v3 = vpop.f32.mrb[10].mxu1  ;;  %vm303_vm0 = vcmp.ge.f32.partialorder %v181_v58, 0.0  ;;  %v335_v4 = vmul.f32 0.2, %v181_v58 }
 0x10c   :  { %v380_v63 = vsel %vm316_vm15, %v246_v48, %v348_v54  ;;  %396 = vst [vmem:[%s903_s3 + $0x30] sm:$0xff] %v364_v62  ;;  %vm319_vm1 = vcmp.ge.f32.partialorder %v261_v59, 0.0  ;;  %v351_v5 = vmul.f32 0.2, %v261_v59  ;;  %vm302_vm2 = vcmp.ge.f32.partialorder %v176_v0, 0.0  ;;  %v185_v12 = vpop.f32.mrb[11].mxu0 }
 0x10d   :  { %412 = vst [vmem:[%s903_s3 + $0xb0] sm:$0xff] %v380_v63  ;;  %v334_v6 = vmul.f32 0.2, %v176_v0  ;;  %vm318_vm3 = vcmp.ge.f32.partialorder %v256_v1, 0.0  ;;  %v350_v7 = vmul.f32 0.2, %v256_v1  ;;  %v367_v8 = vsel %vm303_vm0, %v181_v58, %v335_v4 }
 0x10e   :  { %v383_v9 = vsel %vm319_vm1, %v261_v59, %v351_v5  ;;  %v191_v10 = vadd.f32 %v524_v2, %v770_v56  ;;  %v271_v11 = vadd.f32 %v548_v3, %v770_v56  ;;  %v265_v13 = vpop.f32.mrb[11].mxu1  ;;  %399 = vst [vmem:[%s903_s3 + $0x48] sm:$0xff] %v367_v8  ;;  %v186_v16 = vadd.f32 %v770_v56, %v185_v12 }
 0x10f   :  { %415 = vst [vmem:[%s903_s3 + $0xc8] sm:$0xff] %v383_v9  ;;  %v366_v14 = vsel %vm302_vm2, %v176_v0, %v334_v6  ;;  %v382_v15 = vsel %vm318_vm3, %v256_v1, %v350_v7  ;;  %v266_v17 = vadd.f32 %v770_v56, %v265_v13  ;;  %v527_v18 = vpop.f32.mrb[12].mxu0  ;;  %v551_v19 = vpop.f32.mrb[12].mxu1 }
 0x110   :  { %398 = vst [vmem:[%s903_s3 + $0x40] sm:$0xff] %v366_v14  ;;  %414 = vst [vmem:[%s903_s3 + $0xc0] sm:$0xff] %v382_v15  ;;  %vm305_vm4 = vcmp.ge.f32.partialorder %v191_v10, 0.0  ;;  %v337_v20 = vmul.f32 0.2, %v191_v10  ;;  %vm321_vm5 = vcmp.ge.f32.partialorder %v271_v11, 0.0  ;;  %v201_v26 = vadd.f32 %v527_v18, %v770_v56 }
 0x111   :  { %v353_v21 = vmul.f32 0.2, %v271_v11  ;;  %vm304_vm6 = vcmp.ge.f32.partialorder %v186_v16, 0.0  ;;  %v336_v22 = vmul.f32 0.2, %v186_v16  ;;  %vm320_vm7 = vcmp.ge.f32.partialorder %v266_v17, 0.0 }
 0x112   :  { %v352_v23 = vmul.f32 0.2, %v266_v17  ;;  %v369_v24 = vsel %vm305_vm4, %v191_v10, %v337_v20  ;;  %v281_v27 = vadd.f32 %v551_v19, %v770_v56  ;;  %v195_v28 = vpop.f32.mrb[13].mxu0  ;;  %v275_v29 = vpop.f32.mrb[13].mxu1  ;;  %vm307_vm8 = vcmp.ge.f32.partialorder %v201_v26, 0.0 }
 0x113   :  { %v385_v25 = vsel %vm321_vm5, %v271_v11, %v353_v21  ;;  %401 = vst [vmem:[%s903_s3 + $0x58] sm:$0xff] %v369_v24  ;;  %v368_v30 = vsel %vm304_vm6, %v186_v16, %v336_v22  ;;  %v196_v32 = vadd.f32 %v770_v56, %v195_v28  ;;  %v276_v33 = vadd.f32 %v770_v56, %v275_v29  ;;  %v530_v34 = vpop.f32.mrb[14].mxu0  ;;  %v554_v35 = vpop.f32.mrb[14].mxu1 }
 0x114   :  { %417 = vst [vmem:[%s903_s3 + $0xd8] sm:$0xff] %v385_v25  ;;  %v384_v31 = vsel %vm320_vm7, %v266_v17, %v352_v23  ;;  %400 = vst [vmem:[%s903_s3 + $0x50] sm:$0xff] %v368_v30  ;;  %v339_v36 = vmul.f32 0.2, %v201_v26  ;;  %vm323_vm9 = vcmp.ge.f32.partialorder %v281_v27, 0.0  ;;  %v211_v42 = vadd.f32 %v530_v34, %v770_v56  ;;  %v205_v44 = vpop.f32.mrb[15].mxu0 }
 0x115   :  { %416 = vst [vmem:[%s903_s3 + $0xd0] sm:$0xff] %v384_v31  ;;  %v355_v37 = vmul.f32 0.2, %v281_v27  ;;  %vm306_vm10 = vcmp.ge.f32.partialorder %v196_v32, 0.0  ;;  %v338_v38 = vmul.f32 0.2, %v196_v32  ;;  %v291_v43 = vadd.f32 %v554_v35, %v770_v56 }
 0x116   :  { %vm322_vm11 = vcmp.ge.f32.partialorder %v276_v33, 0.0  ;;  %v354_v39 = vmul.f32 0.2, %v276_v33  ;;  %v371_v40 = vsel %vm307_vm8, %v201_v26, %v339_v36  ;;  %v285_v45 = vpop.f32.mrb[15].mxu1  ;;  %v206_v48 = vadd.f32 %v770_v56, %v205_v44 }
 0x117   :  { %v387_v41 = vsel %vm323_vm9, %v281_v27, %v355_v37  ;;  %403 = vst [vmem:[%s903_s3 + $0x68] sm:$0xff] %v371_v40  ;;  %v370_v46 = vsel %vm306_vm10, %v196_v32, %v338_v38  ;;  %v286_v49 = vadd.f32 %v770_v56, %v285_v45  ;;  %vm309_vm12 = vcmp.ge.f32.partialorder %v211_v42, 0.0 }
 0x118   :  { %419 = vst [vmem:[%s903_s3 + $0xe8] sm:$0xff] %v387_v41  ;;  %v386_v47 = vsel %vm322_vm11, %v276_v33, %v354_v39  ;;  %402 = vst [vmem:[%s903_s3 + $0x60] sm:$0xff] %v370_v46  ;;  %v341_v50 = vmul.f32 0.2, %v211_v42  ;;  %vm325_vm13 = vcmp.ge.f32.partialorder %v291_v43, 0.0  ;;  %vm308_vm14 = vcmp.ge.f32.partialorder %v206_v48, 0.0 }
 0x119   :  { %418 = vst [vmem:[%s903_s3 + $0xe0] sm:$0xff] %v386_v47  ;;  %v357_v51 = vmul.f32 0.2, %v291_v43  ;;  %v340_v52 = vmul.f32 0.2, %v206_v48  ;;  %vm324_vm15 = vcmp.ge.f32.partialorder %v286_v49, 0.0 }
 0x11a   :  { %v356_v53 = vmul.f32 0.2, %v286_v49  ;;  %v373_v54 = vsel %vm309_vm12, %v211_v42, %v341_v50 }
 0x11b   :  { %v389_v55 = vsel %vm325_vm13, %v291_v43, %v357_v51  ;;  %405 = vst [vmem:[%s903_s3 + $0x78] sm:$0xff] %v373_v54  ;;  %v372_v56 = vsel %vm308_vm14, %v206_v48, %v340_v52 }
 0x11c   :  { %421 = vst [vmem:[%s903_s3 + $0xf8] sm:$0xff] %v389_v55  ;;  %v388_v57 = vsel %vm324_vm15, %v286_v49, %v356_v53  ;;  %404 = vst [vmem:[%s903_s3 + $0x70] sm:$0xff] %v372_v56 }
 0x11d   :  { %420 = vst [vmem:[%s903_s3 + $0xf0] sm:$0xff] %v388_v57 }

// kernel: _lambda_.6
= control target key start
LH: loop header
LB: loop body
LE: loop exit
PB: predicated region body
PF: predicated region fallthrough
CT: control target
= control target key end

     0   :  { %s422_s1 = inlined_call_operand.vmem [shape: f32[128,128], index: 1, kind: input, shape index: {}]   ;;  %s423_s0 = inlined_call_operand.vmem [shape: f32[64,128], index: 0, kind: input, shape index: {}]   ;;  %s424_s2 = inlined_call_operand.vmem [shape: f32[1,128], index: 2, kind: input, shape index: {}]   ;;  %s425_s3 = inlined_call_operand.vmem [shape: f32[64,128], index: 3, kind: output, shape index: {}]  }
   0x1   :  { %v22_v0 = vld [vmem:[%s422_s1] sm:$0xff]  ;;  %v23_v1 = vld [vmem:[%s422_s1 + $0x8] sm:$0xff]  ;;  %v24_v2 = vld [vmem:[%s422_s1 + $0x10] sm:$0xff] }
   0x2   :  { %v255_v3 = vpack.c.bf16 %v23_v1, %v22_v0  ;;  %v25_v4 = vld [vmem:[%s422_s1 + $0x18] sm:$0xff]  ;;  %v26_v6 = vld [vmem:[%s422_s1 + $0x20] sm:$0xff]  ;;  %v27_v7 = vld [vmem:[%s422_s1 + $0x28] sm:$0xff] }
   0x3   :  { %v259_v5 = vpack.c.bf16 %v25_v4, %v24_v2  ;;  %v263_v8 = vpack.c.bf16 %v27_v7, %v26_v6  ;;  %v14_v9 = vld [vmem:[%s423_s0] sm:$0xff]  ;;  %v28_v11 = vld [vmem:[%s422_s1 + $0x30] sm:$0xff]  ;;  %v29_v12 = vld [vmem:[%s422_s1 + $0x38] sm:$0xff] }
   0x4   :  { %256 = vmatprep.subr.bf16.mxu0 %v255_v3  ;;  %287 = vmatprep.subr.bf16.mxu1 %v255_v3  ;;  %v18_v10 = vld [vmem:[%s423_s0 + $0x20] sm:$0xff]  ;;  %v267_v13 = vpack.c.bf16 %v29_v12, %v28_v11  ;;  %v31_v15 = vld [vmem:[%s422_s1 + $0x48] sm:$0xff]  ;;  %v32_v17 = vld [vmem:[%s422_s1 + $0x50] sm:$0xff] }
   0x5   :  { %258 = vmatpush3.bf16.msra.mxu0 %v255_v3  ;;  %295 = vmatpush3.bf16.msra.mxu1 %v255_v3  ;;  %v30_v14 = vld [vmem:[%s422_s1 + $0x40] sm:$0xff]  ;;  %v33_v18 = vld [vmem:[%s422_s1 + $0x58] sm:$0xff]  ;;  %v35_v21 = vld [vmem:[%s422_s1 + $0x68] sm:$0xff] }
   0x6   :  { %260 = vmatprep.subr.bf16.mxu0 %v259_v5  ;;  %288 = vmatprep.subr.bf16.mxu1 %v259_v5  ;;  %v271_v16 = vpack.c.bf16 %v31_v15, %v30_v14  ;;  %v275_v19 = vpack.c.bf16 %v33_v18, %v32_v17  ;;  %v34_v20 = vld [vmem:[%s422_s1 + $0x60] sm:$0xff]  ;;  %v36_v23 = vld [vmem:[%s422_s1 + $0x70] sm:$0xff]  ;;  %v37_v24 = vld [vmem:[%s422_s1 + $0x78] sm:$0xff] }
   0x7   :  { %243 = vmatprep.mubr.f32.mxu0 %v14_v9  ;;  %249 = vmatprep.mubr.f32.mxu1 %v18_v10  ;;  %v279_v22 = vpack.c.bf16 %v35_v21, %v34_v20  ;;  %v283_v25 = vpack.c.bf16 %v37_v24, %v36_v23  ;;  %v15_v26 = vld [vmem:[%s423_s0 + $0x8] sm:$0xff]  ;;  %v16_v28 = vld [vmem:[%s423_s0 + $0x10] sm:$0xff]  ;;  %v17_v30 = vld [vmem:[%s423_s0 + $0x18] sm:$0xff] }
   0x8   :  { %v19_v27 = vld [vmem:[%s423_s0 + $0x28] sm:$0xff]  ;;  %v20_v29 = vld [vmem:[%s423_s0 + $0x30] sm:$0xff]  ;;  %v21_v31 = vld [vmem:[%s423_s0 + $0x38] sm:$0xff] }
   0x9   :  { %262 = vmatpush3.bf16.msra.mxu0 %v259_v5  ;;  %296 = vmatpush3.bf16.msra.mxu1 %v259_v5  ;;  %v186_v32 = vld [vmem:[%s424_s2] ss:$0 sm:$0xff] }
   0xa   :  { %264 = vmatprep.subr.bf16.mxu0 %v263_v8  ;;  %289 = vmatprep.subr.bf16.mxu1 %v263_v8 }
   0xd   :  { %266 = vmatpush3.bf16.msra.mxu0 %v263_v8  ;;  %297 = vmatpush3.bf16.msra.mxu1 %v263_v8 }
   0xe   :  { %268 = vmatprep.subr.bf16.mxu0 %v267_v13  ;;  %290 = vmatprep.subr.bf16.mxu1 %v267_v13 }
  0x11   :  { %270 = vmatpush3.bf16.msra.mxu0 %v267_v13  ;;  %298 = vmatpush3.bf16.msra.mxu1 %v267_v13 }
  0x12   :  { %272 = vmatprep.subr.bf16.mxu0 %v271_v16  ;;  %291 = vmatprep.subr.bf16.mxu1 %v271_v16 }
  0x15   :  { %274 = vmatpush3.bf16.msra.mxu0 %v271_v16  ;;  %299 = vmatpush3.bf16.msra.mxu1 %v271_v16 }
  0x16   :  { %276 = vmatprep.subr.bf16.mxu0 %v275_v19  ;;  %292 = vmatprep.subr.bf16.mxu1 %v275_v19 }
  0x19   :  { %278 = vmatpush3.bf16.msra.mxu0 %v275_v19  ;;  %300 = vmatpush3.bf16.msra.mxu1 %v275_v19 }
  0x1a   :  { %280 = vmatprep.subr.bf16.mxu0 %v279_v22  ;;  %293 = vmatprep.subr.bf16.mxu1 %v279_v22 }
  0x1d   :  { %282 = vmatpush3.bf16.msra.mxu0 %v279_v22  ;;  %301 = vmatpush3.bf16.msra.mxu1 %v279_v22 }
  0x1e   :  { %284 = vmatprep.subr.bf16.mxu0 %v283_v25  ;;  %294 = vmatprep.subr.bf16.mxu1 %v283_v25 }
  0x21   :  { %286 = vmatpush3.bf16.msra.mxu0 %v283_v25  ;;  %302 = vmatpush3.bf16.msra.mxu1 %v283_v25 }
  0x24   :  { %244 = vmatmul.mubr.f32.vlgmr.msra.gmra.mrb[0].mxu0 %v15_v26  ;;  %250 = vmatmul.mubr.f32.vlgmr.msra.gmra.mrb[0].mxu1 %v19_v27 }
  0x25   :  { %246 = vmatprep.mubr.f32.mxu0 %v16_v28  ;;  %252 = vmatprep.mubr.f32.mxu1 %v20_v29 }
  0x28   :  { %247 = vmatmul.mubr.f32.gmra.mrb[2].mxu0 %v17_v30  ;;  %253 = vmatmul.mubr.f32.gmra.mrb[2].mxu1 %v21_v31 }
  0xf7   :  { %v245_v33 = vpop.f32.mrb[0].mxu0  ;;  %v251_v34 = vpop.f32.mrb[0].mxu1 }
  0xf8   :  { %v117_v35 = vadd.f32 %v245_v33, %v186_v32  ;;  %v137_v36 = vadd.f32 %v251_v34, %v186_v32  ;;  %v111_v37 = vpop.f32.mrb[1].mxu0  ;;  %v131_v38 = vpop.f32.mrb[1].mxu1 }
  0xf9   :  { %v112_v39 = vadd.f32 %v186_v32, %v111_v37  ;;  %v132_v40 = vadd.f32 %v186_v32, %v131_v38 }
  0xfa   :  { %vm151_vm0 = vcmp.ge.f32.partialorder %v117_v35, 0.0  ;;  %v159_v41 = vmul.f32 0.2, %v117_v35  ;;  %vm155_vm1 = vcmp.ge.f32.partialorder %v137_v36, 0.0  ;;  %v163_v42 = vmul.f32 0.2, %v137_v36 }
  0xfb   :  { %vm150_vm2 = vcmp.ge.f32.partialorder %v112_v39, 0.0  ;;  %v158_v43 = vmul.f32 0.2, %v112_v39  ;;  %vm154_vm3 = vcmp.ge.f32.partialorder %v132_v40, 0.0  ;;  %v162_v44 = vmul.f32 0.2, %v132_v40 }
  0xfc   :  { %v167_v45 = vsel %vm151_vm0, %v117_v35, %v159_v41  ;;  %v171_v46 = vsel %vm155_vm1, %v137_v36, %v163_v42  ;;  %v248_v47 = vpop.f32.mrb[2].mxu0  ;;  %v254_v48 = vpop.f32.mrb[2].mxu1 }
  0xfd   :  { %175 = vst [vmem:[%s425_s3 + $0x8] sm:$0xff] %v167_v45  ;;  %179 = vst [vmem:[%s425_s3 + $0x28] sm:$0xff] %v171_v46  ;;  %v166_v49 = vsel %vm150_vm2, %v112_v39, %v158_v43  ;;  %v170_v50 = vsel %vm154_vm3, %v132_v40, %v162_v44  ;;  %v127_v51 = vadd.f32 %v248_v47, %v186_v32  ;;  %v121_v53 = vpop.f32.mrb[3].mxu0  ;;  %v141_v54 = vpop.f32.mrb[3].mxu1 }
  0xfe   :  { %v147_v52 = vadd.f32 %v254_v48, %v186_v32  ;;  %174 = vst [vmem:[%s425_s3] sm:$0xff] %v166_v49  ;;  %178 = vst [vmem:[%s425_s3 + $0x20] sm:$0xff] %v170_v50  ;;  %v122_v55 = vadd.f32 %v186_v32, %v121_v53  ;;  %v142_v56 = vadd.f32 %v186_v32, %v141_v54 }
  0xff   :  { %vm153_vm4 = vcmp.ge.f32.partialorder %v127_v51, 0.0  ;;  %v161_v57 = vmul.f32 0.2, %v127_v51 }
 0x100   :  { %vm157_vm5 = vcmp.ge.f32.partialorder %v147_v52, 0.0  ;;  %v165_v58 = vmul.f32 0.2, %v147_v52  ;;  %vm152_vm6 = vcmp.ge.f32.partialorder %v122_v55, 0.0  ;;  %v160_v59 = vmul.f32 0.2, %v122_v55 }
 0x101   :  { %vm156_vm7 = vcmp.ge.f32.partialorder %v142_v56, 0.0  ;;  %v164_v60 = vmul.f32 0.2, %v142_v56  ;;  %v169_v61 = vsel %vm153_vm4, %v127_v51, %v161_v57 }
 0x102   :  { %v173_v62 = vsel %vm157_vm5, %v147_v52, %v165_v58  ;;  %177 = vst [vmem:[%s425_s3 + $0x18] sm:$0xff] %v169_v61  ;;  %v168_v63 = vsel %vm152_vm6, %v122_v55, %v160_v59 }
 0x103   :  { %181 = vst [vmem:[%s425_s3 + $0x38] sm:$0xff] %v173_v62  ;;  %v172_v0 = vsel %vm156_vm7, %v142_v56, %v164_v60  ;;  %176 = vst [vmem:[%s425_s3 + $0x10] sm:$0xff] %v168_v63 }
 0x104   :  { %180 = vst [vmem:[%s425_s3 + $0x30] sm:$0xff] %v172_v0 }

// kernel: _lambda_.7
= control target key start
LH: loop header
LB: loop body
LE: loop exit
PB: predicated region body
PF: predicated region fallthrough
CT: control target
= control target key end

     0   :  { %s362_s1 = inlined_call_operand.vmem [shape: f32[256,128], index: 1, kind: input, shape index: {}]   ;;  %s363_s0 = inlined_call_operand.vmem [shape: f32[16,256], index: 0, kind: input, shape index: {}]   ;;  %s364_s2 = inlined_call_operand.vmem [shape: f32[1,128], index: 2, kind: input, shape index: {}]   ;;  %s365_s3 = inlined_call_operand.vmem [shape: f32[16,128], index: 3, kind: output, shape index: {}]  }
   0x1   :  { %v34_v0 = vld [vmem:[%s362_s1 + $0x80] sm:$0xff]  ;;  %v35_v1 = vld [vmem:[%s362_s1 + $0x88] sm:$0xff]  ;;  %v36_v5 = vld [vmem:[%s362_s1 + $0x90] sm:$0xff] }
   0x2   :  { %v18_v2 = vld [vmem:[%s362_s1] sm:$0xff]  ;;  %v177_v3 = vpack.c.bf16 %v35_v1, %v34_v0  ;;  %v19_v4 = vld [vmem:[%s362_s1 + $0x8] sm:$0xff]  ;;  %v37_v6 = vld [vmem:[%s362_s1 + $0x98] sm:$0xff] }
   0x3   :  { %v179_v7 = vpack.c.bf16 %v19_v4, %v18_v2  ;;  %v181_v8 = vpack.c.bf16 %v37_v6, %v36_v5  ;;  %v20_v9 = vld [vmem:[%s362_s1 + $0x10] sm:$0xff]  ;;  %v21_v10 = vld [vmem:[%s362_s1 + $0x18] sm:$0xff]  ;;  %v38_v11 = vld [vmem:[%s362_s1 + $0xa0] sm:$0xff] }
   0x4   :  { %178 = vmatprep.subr.bf16.mxu0 %v177_v3  ;;  %209 = vmatprep.subr.bf16.mxu1 %v177_v3  ;;  %v39_v12 = vld [vmem:[%s362_s1 + $0xa8] sm:$0xff]  ;;  %v183_v13 = vpack.c.bf16 %v21_v10, %v20_v9  ;;  %v22_v15 = vld [vmem:[%s362_s1 + $0x20] sm:$0xff]  ;;  %v40_v17 = vld [vmem:[%s362_s1 + $0xb0] sm:$0xff] }
   0x5   :  { %180 = vmatpush3.bf16.msra.mxu0 %v179_v7  ;;  %217 = vmatpush3.bf16.msra.mxu1 %v179_v7  ;;  %v185_v14 = vpack.c.bf16 %v39_v12, %v38_v11  ;;  %v23_v16 = vld [vmem:[%s362_s1 + $0x28] sm:$0xff]  ;;  %v41_v18 = vld [vmem:[%s362_s1 + $0xb8] sm:$0xff]  ;;  %v24_v21 = vld [vmem:[%s362_s1 + $0x30] sm:$0xff] }
   0x6   :  { %182 = vmatprep.subr.bf16.mxu0 %v181_v8  ;;  %210 = vmatprep.subr.bf16.mxu1 %v181_v8  ;;  %v187_v19 = vpack.c.bf16 %v23_v16, %v22_v15  ;;  %v189_v20 = vpack.c.bf16 %v41_v18, %v40_v17  ;;  %v25_v22 = vld [vmem:[%s362_s1 + $0x38] sm:$0xff]  ;;  %v42_v23 = vld [vmem:[%s362_s1 + $0xc0] sm:$0xff]  ;;  %v43_v24 = vld [vmem:[%s362_s1 + $0xc8] sm:$0xff] }
   0x7   :  { %v15_v25 = vld [vmem:[%s363_s0 + $0x8] sm:$0xff]  ;;  %v17_v26 = vld [vmem:[%s363_s0 + $0x18] sm:$0xff]  ;;  %v191_v27 = vpack.c.bf16 %v25_v22, %v24_v21  ;;  %v193_v28 = vpack.c.bf16 %v43_v24, %v42_v23  ;;  %v26_v29 = vld [vmem:[%s362_s1 + $0x40] sm:$0xff] }
   0x8   :  { %121 = vmatprep.mubr.f32.mxu0 %v15_v25  ;;  %v27_v30 = vld [vmem:[%s362_s1 + $0x48] sm:$0xff]  ;;  %v44_v31 = vld [vmem:[%s362_s1 + $0xd0] sm:$0xff]  ;;  %v45_v32 = vld [vmem:[%s362_s1 + $0xd8] sm:$0xff]  ;;  %126 = vmatprep.mubr.f32.mxu1 %v17_v26 }
   0x9   :  { %184 = vmatpush3.bf16.msra.mxu0 %v183_v13  ;;  %218 = vmatpush3.bf16.msra.mxu1 %v183_v13  ;;  %v195_v33 = vpack.c.bf16 %v27_v30, %v26_v29  ;;  %v197_v34 = vpack.c.bf16 %v45_v32, %v44_v31  ;;  %v28_v35 = vld [vmem:[%s362_s1 + $0x50] sm:$0xff]  ;;  %v29_v36 = vld [vmem:[%s362_s1 + $0x58] sm:$0xff]  ;;  %v46_v37 = vld [vmem:[%s362_s1 + $0xe0] sm:$0xff] }
   0xa   :  { %186 = vmatprep.subr.bf16.mxu0 %v185_v14  ;;  %211 = vmatprep.subr.bf16.mxu1 %v185_v14  ;;  %v47_v38 = vld [vmem:[%s362_s1 + $0xe8] sm:$0xff]  ;;  %v199_v39 = vpack.c.bf16 %v29_v36, %v28_v35  ;;  %v30_v41 = vld [vmem:[%s362_s1 + $0x60] sm:$0xff]  ;;  %v48_v43 = vld [vmem:[%s362_s1 + $0xf0] sm:$0xff] }
   0xb   :  { %v201_v40 = vpack.c.bf16 %v47_v38, %v46_v37  ;;  %v31_v42 = vld [vmem:[%s362_s1 + $0x68] sm:$0xff]  ;;  %v49_v44 = vld [vmem:[%s362_s1 + $0xf8] sm:$0xff]  ;;  %v32_v47 = vld [vmem:[%s362_s1 + $0x70] sm:$0xff] }
   0xc   :  { %v203_v45 = vpack.c.bf16 %v31_v42, %v30_v41  ;;  %v205_v46 = vpack.c.bf16 %v49_v44, %v48_v43  ;;  %v33_v48 = vld [vmem:[%s362_s1 + $0x78] sm:$0xff]  ;;  %v14_v50 = vld [vmem:[%s363_s0] sm:$0xff]  ;;  %v16_v51 = vld [vmem:[%s363_s0 + $0x10] sm:$0xff] }
   0xd   :  { %188 = vmatpush3.bf16.msra.mxu0 %v187_v19  ;;  %219 = vmatpush3.bf16.msra.mxu1 %v187_v19  ;;  %v207_v49 = vpack.c.bf16 %v33_v48, %v32_v47  ;;  %v138_v54 = vld [vmem:[%s364_s2] ss:$0 sm:$0xff] }
   0xe   :  { %190 = vmatprep.subr.bf16.mxu0 %v189_v20  ;;  %212 = vmatprep.subr.bf16.mxu1 %v189_v20 }
  0x11   :  { %192 = vmatpush3.bf16.msra.mxu0 %v191_v27  ;;  %220 = vmatpush3.bf16.msra.mxu1 %v191_v27 }
  0x12   :  { %194 = vmatprep.subr.bf16.mxu0 %v193_v28  ;;  %213 = vmatprep.subr.bf16.mxu1 %v193_v28 }
  0x15   :  { %196 = vmatpush3.bf16.msra.mxu0 %v195_v33  ;;  %221 = vmatpush3.bf16.msra.mxu1 %v195_v33 }
  0x16   :  { %198 = vmatprep.subr.bf16.mxu0 %v197_v34  ;;  %214 = vmatprep.subr.bf16.mxu1 %v197_v34 }
  0x19   :  { %200 = vmatpush3.bf16.msra.mxu0 %v199_v39  ;;  %222 = vmatpush3.bf16.msra.mxu1 %v199_v39 }
  0x1a   :  { %202 = vmatprep.subr.bf16.mxu0 %v201_v40  ;;  %215 = vmatprep.subr.bf16.mxu1 %v201_v40 }
  0x1d   :  { %204 = vmatpush3.bf16.msra.mxu0 %v203_v45  ;;  %223 = vmatpush3.bf16.msra.mxu1 %v203_v45 }
  0x1e   :  { %206 = vmatprep.subr.bf16.mxu0 %v205_v46  ;;  %216 = vmatprep.subr.bf16.mxu1 %v205_v46 }
  0x21   :  { %208 = vmatpush3.bf16.msra.mxu0 %v207_v49  ;;  %224 = vmatpush3.bf16.msra.mxu1 %v207_v49 }
  0x24   :  { %122 = vmatmul.mubr.f32.vlgmr.msra.gmra.mrb[0].mxu0 %v14_v50  ;;  %127 = vmatmul.mubr.f32.vlgmr.msra.gmra.mrb[0].mxu1 %v16_v51 }
  0xf7   :  { %v171_v52 = vpop.f32.mrb[0].mxu0  ;;  %v174_v53 = vpop.f32.mrb[0].mxu1 }
  0xf8   :  { %v172_v55 = vpop.f32.mrb[1].mxu0  ;;  %v175_v56 = vpop.f32.mrb[1].mxu1 }
  0xf9   :  { %v173_v57 = vadd.f32 %v172_v55, %v171_v52  ;;  %v176_v58 = vadd.f32 %v175_v56, %v174_v53 }
  0xfb   :  { %v124_v59 = vadd.f32 %v173_v57, %v138_v54  ;;  %v129_v60 = vadd.f32 %v176_v58, %v138_v54 }
  0xfd   :  { %132 = vst [vmem:[%s365_s3] sm:$0xff] %v124_v59  ;;  %133 = vst [vmem:[%s365_s3 + $0x8] sm:$0xff] %v129_v60 }

// kernel: _lambda_.8
= control target key start
LH: loop header
LB: loop body
LE: loop exit
PB: predicated region body
PF: predicated region fallthrough
CT: control target
= control target key end

     0   :  { %v551_v0 = vmov 0.0|0.0   ;;  %vm552_vm0 = vmmov 0   ;;  %v553_v4 = vmov 0.0   ;;  %s783_s1 = inlined_call_operand.vmem [shape: f32[128,128], index: 1, kind: input, shape index: {}]   ;;  %s784_s3 = inlined_call_operand.vmem [shape: f32[128,128], index: 3, kind: input, shape index: {}]   ;;  %s785_s0 = inlined_call_operand.vmem [shape: f32[8,128], index: 0, kind: input, shape index: {}]   ;;  %s786_s5 = inlined_call_operand.vmem [shape: f32[128,128], index: 5, kind: input, shape index: {}]   ;;  %s787_s2 = inlined_call_operand.vmem [shape: f32[1,128], index: 2, kind: input, shape index: {}]   ;;  %s788_s4 = inlined_call_operand.vmem [shape: f32[1,128], index: 4, kind: input, shape index: {}]   ;;  %s789_s6 = inlined_call_operand.vmem [shape: f32[1,128], index: 6, kind: input, shape index: {}]   ;;  %s790_s7 = inlined_call_operand.vmem [shape: f32[8,128], index: 7, kind: output, shape index: {}]  }
   0x1   :  { %476 = vmatprep.subr.bf16.mxu0 %v551_v0  ;;  %v27_v1 = vld [vmem:[%s783_s1] sm:$0xff]  ;;  %v28_v2 = vld [vmem:[%s783_s1 + $0x8] sm:$0xff]  ;;  %v29_v3 = vld [vmem:[%s783_s1 + $0x10] sm:$0xff]  ;;  %403 = vmatprep.mubr.msk.f32.mxu0 %vm552_vm0, %v553_v4 }
   0x2   :  { %v477_v5 = vpack.c.bf16 %v28_v2, %v27_v1  ;;  %v30_v6 = vld [vmem:[%s783_s1 + $0x18] sm:$0xff]  ;;  %500 = vmatprep.subr.bf16.mxu1 %v551_v0  ;;  %438 = vmatprep.mubr.msk.f32.mxu1 %vm552_vm0, %v553_v4  ;;  %v31_v8 = vld [vmem:[%s783_s1 + $0x20] sm:$0xff]  ;;  %v32_v9 = vld [vmem:[%s783_s1 + $0x28] sm:$0xff] }
   0x3   :  { %v480_v7 = vpack.c.bf16 %v30_v6, %v29_v3  ;;  %v123_v10 = vld [vmem:[%s784_s3] sm:$0xff]  ;;  %v124_v11 = vld [vmem:[%s784_s3 + $0x8] sm:$0xff]  ;;  %v125_v12 = vld [vmem:[%s784_s3 + $0x10] sm:$0xff]  ;;  %v483_v14 = vpack.c.bf16 %v32_v9, %v31_v8 }
   0x4   :  { %478 = vmatpush3.bf16.msra.mxu0 %v477_v5  ;;  %v126_v13 = vld [vmem:[%s784_s3 + $0x18] sm:$0xff]  ;;  %v501_v15 = vpack.c.bf16 %v124_v11, %v123_v10  ;;  %v33_v16 = vld [vmem:[%s783_s1 + $0x30] sm:$0xff]  ;;  %v127_v19 = vld [vmem:[%s784_s3 + $0x20] sm:$0xff] }
   0x5   :  { %479 = vmatprep.subr.bf16.mxu0 %v551_v0  ;;  %v34_v17 = vld [vmem:[%s783_s1 + $0x38] sm:$0xff]  ;;  %v504_v18 = vpack.c.bf16 %v126_v13, %v125_v12  ;;  %v128_v20 = vld [vmem:[%s784_s3 + $0x28] sm:$0xff]  ;;  %v35_v22 = vld [vmem:[%s783_s1 + $0x40] sm:$0xff] }
   0x6   :  { %502 = vmatpush3.bf16.msra.mxu1 %v501_v15  ;;  %v486_v21 = vpack.c.bf16 %v34_v17, %v33_v16  ;;  %v36_v23 = vld [vmem:[%s783_s1 + $0x48] sm:$0xff]  ;;  %v507_v24 = vpack.c.bf16 %v128_v20, %v127_v19  ;;  %v129_v25 = vld [vmem:[%s784_s3 + $0x30] sm:$0xff]  ;;  %v130_v26 = vld [vmem:[%s784_s3 + $0x38] sm:$0xff] }
   0x7   :  { %503 = vmatprep.subr.bf16.mxu1 %v551_v0  ;;  %v489_v27 = vpack.c.bf16 %v36_v23, %v35_v22  ;;  %v37_v28 = vld [vmem:[%s783_s1 + $0x50] sm:$0xff]  ;;  %v38_v29 = vld [vmem:[%s783_s1 + $0x58] sm:$0xff]  ;;  %v510_v30 = vpack.c.bf16 %v130_v26, %v129_v25  ;;  %v131_v31 = vld [vmem:[%s784_s3 + $0x40] sm:$0xff] }
   0x8   :  { %481 = vmatpush3.bf16.msra.mxu0 %v480_v7  ;;  %v132_v32 = vld [vmem:[%s784_s3 + $0x48] sm:$0xff]  ;;  %v492_v33 = vpack.c.bf16 %v38_v29, %v37_v28  ;;  %v39_v34 = vld [vmem:[%s783_s1 + $0x60] sm:$0xff]  ;;  %v133_v37 = vld [vmem:[%s784_s3 + $0x50] sm:$0xff] }
   0x9   :  { %482 = vmatprep.subr.bf16.mxu0 %v551_v0  ;;  %v40_v35 = vld [vmem:[%s783_s1 + $0x68] sm:$0xff]  ;;  %v513_v36 = vpack.c.bf16 %v132_v32, %v131_v31  ;;  %v134_v38 = vld [vmem:[%s784_s3 + $0x58] sm:$0xff]  ;;  %v41_v40 = vld [vmem:[%s783_s1 + $0x70] sm:$0xff] }
   0xa   :  { %505 = vmatpush3.bf16.msra.mxu1 %v504_v18  ;;  %v495_v39 = vpack.c.bf16 %v40_v35, %v39_v34  ;;  %v42_v41 = vld [vmem:[%s783_s1 + $0x78] sm:$0xff]  ;;  %v516_v42 = vpack.c.bf16 %v134_v38, %v133_v37  ;;  %v135_v43 = vld [vmem:[%s784_s3 + $0x60] sm:$0xff]  ;;  %v136_v44 = vld [vmem:[%s784_s3 + $0x68] sm:$0xff] }
   0xb   :  { %506 = vmatprep.subr.bf16.mxu1 %v551_v0  ;;  %v498_v45 = vpack.c.bf16 %v42_v41, %v41_v40  ;;  %v519_v46 = vpack.c.bf16 %v136_v44, %v135_v43  ;;  %v26_v47 = vld [vmem:[%s785_s0] sm:$0xff]  ;;  %v137_v48 = vld [vmem:[%s784_s3 + $0x70] sm:$0xff]  ;;  %v138_v49 = vld [vmem:[%s784_s3 + $0x78] sm:$0xff] }
   0xc   :  { %484 = vmatpush3.bf16.msra.mxu0 %v483_v14  ;;  %v522_v50 = vpack.c.bf16 %v138_v49, %v137_v48  ;;  %v219_v51 = vld [vmem:[%s786_s5] sm:$0xff]  ;;  %v220_v52 = vld [vmem:[%s786_s5 + $0x8] sm:$0xff]  ;;  %v221_v53 = vld [vmem:[%s786_s5 + $0x10] sm:$0xff] }
   0xd   :  { %485 = vmatprep.subr.bf16.mxu0 %v551_v0  ;;  %v525_v54 = vpack.c.bf16 %v220_v52, %v219_v51  ;;  %v222_v55 = vld [vmem:[%s786_s5 + $0x18] sm:$0xff]  ;;  %v223_v57 = vld [vmem:[%s786_s5 + $0x20] sm:$0xff]  ;;  %v224_v58 = vld [vmem:[%s786_s5 + $0x28] sm:$0xff] }
   0xe   :  { %508 = vmatpush3.bf16.msra.mxu1 %v507_v24  ;;  %v528_v56 = vpack.c.bf16 %v222_v55, %v221_v53  ;;  %v531_v59 = vpack.c.bf16 %v224_v58, %v223_v57  ;;  %v225_v60 = vld [vmem:[%s786_s5 + $0x30] sm:$0xff]  ;;  %v226_v61 = vld [vmem:[%s786_s5 + $0x38] sm:$0xff]  ;;  %v227_v63 = vld [vmem:[%s786_s5 + $0x40] sm:$0xff] }
   0xf   :  { %509 = vmatprep.subr.bf16.mxu1 %v551_v0  ;;  %v534_v62 = vpack.c.bf16 %v226_v61, %v225_v60  ;;  %v228_v1 = vld [vmem:[%s786_s5 + $0x48] sm:$0xff]  ;;  %v229_v3 = vld [vmem:[%s786_s5 + $0x50] sm:$0xff]  ;;  %v231_v6 = vld [vmem:[%s786_s5 + $0x60] sm:$0xff] }
  0x10   :  { %487 = vmatpush3.bf16.msra.mxu0 %v486_v21  ;;  %v537_v2 = vpack.c.bf16 %v228_v1, %v227_v63  ;;  %v232_v7 = vld [vmem:[%s786_s5 + $0x68] sm:$0xff]  ;;  %v317_v9 = vld [vmem:[%s787_s2] ss:$0 sm:$0xff]  ;;  %v233_v15 = vld [vmem:[%s786_s5 + $0x70] sm:$0xff] }
  0x11   :  { %488 = vmatprep.subr.bf16.mxu0 %v551_v0  ;;  %v543_v8 = vpack.c.bf16 %v232_v7, %v231_v6  ;;  %v234_v16 = vld [vmem:[%s786_s5 + $0x78] sm:$0xff]  ;;  %v318_v17 = vld [vmem:[%s788_s4] ss:$0 sm:$0xff] }
  0x12   :  { %511 = vmatpush3.bf16.msra.mxu1 %v510_v30  ;;  %v319_v23 = vld [vmem:[%s789_s6] ss:$0 sm:$0xff] }
  0x13   :  { %512 = vmatprep.subr.bf16.mxu1 %v551_v0 }
  0x14   :  { %490 = vmatpush3.bf16.msra.mxu0 %v489_v27 }
  0x15   :  { %491 = vmatprep.subr.bf16.mxu0 %v551_v0 }
  0x16   :  { %514 = vmatpush3.bf16.msra.mxu1 %v513_v36 }
  0x17   :  { %515 = vmatprep.subr.bf16.mxu1 %v551_v0 }
  0x18   :  { %493 = vmatpush3.bf16.msra.mxu0 %v492_v33 }
  0x19   :  { %494 = vmatprep.subr.bf16.mxu0 %v551_v0 }
  0x1a   :  { %517 = vmatpush3.bf16.msra.mxu1 %v516_v42 }
  0x1b   :  { %518 = vmatprep.subr.bf16.mxu1 %v551_v0 }
  0x1c   :  { %496 = vmatpush3.bf16.msra.mxu0 %v495_v39 }
  0x1d   :  { %497 = vmatprep.subr.bf16.mxu0 %v551_v0 }
  0x1e   :  { %520 = vmatpush3.bf16.msra.mxu1 %v519_v46 }
  0x1f   :  { %521 = vmatprep.subr.bf16.mxu1 %v551_v0 }
  0x20   :  { %499 = vmatpush3.bf16.msra.mxu0 %v498_v45 }
  0x21   :  { %524 = vmatprep.subr.bf16.mxu0 %v551_v0 }
  0x22   :  { %523 = vmatpush3.bf16.msra.mxu1 %v522_v50 }
  0x23   :  { %404 = vmatmul.mubr.f32.vlgmr.msra.gmra.mrb[0].mxu0 %v26_v47 }
  0x24   :  { %473 = vmatprep.mubr.msk.f32.mxu0 %vm552_vm0, %v553_v4  ;;  %526 = vmatpush3.bf16.msra.mxu0 %v525_v54  ;;  %v230_v4 = vld [vmem:[%s786_s5 + $0x58] sm:$0xff] }
  0x25   :  { %527 = vmatprep.subr.bf16.mxu0 %v551_v0  ;;  %v540_v5 = vpack.c.bf16 %v230_v4, %v229_v3 }
  0x28   :  { %529 = vmatpush3.bf16.msra.mxu0 %v528_v56 }
  0x29   :  { %530 = vmatprep.subr.bf16.mxu0 %v551_v0 }
  0x2c   :  { %532 = vmatpush3.bf16.msra.mxu0 %v531_v59 }
  0x2d   :  { %533 = vmatprep.subr.bf16.mxu0 %v551_v0 }
  0x30   :  { %535 = vmatpush3.bf16.msra.mxu0 %v534_v62 }
  0x31   :  { %536 = vmatprep.subr.bf16.mxu0 %v551_v0 }
  0x34   :  { %538 = vmatpush3.bf16.msra.mxu0 %v537_v2 }
  0x35   :  { %539 = vmatprep.subr.bf16.mxu0 %v551_v0 }
  0x38   :  { %541 = vmatpush3.bf16.msra.mxu0 %v540_v5 }
  0x39   :  { %542 = vmatprep.subr.bf16.mxu0 %v551_v0 }
  0x3c   :  { %544 = vmatpush3.bf16.msra.mxu0 %v543_v8 }
  0x3d   :  { %545 = vmatprep.subr.bf16.mxu0 %v551_v0  ;;  %v546_v0 = vpack.c.bf16 %v234_v16, %v233_v15 }
  0x40   :  { %547 = vmatpush3.bf16.msra.mxu0 %v546_v0 }
  0xf6   :  { %v116_v10 = vpop.f32.mrb[0].mxu0 }
  0xf7   :  { %v117_v11 = vadd.f32 %v317_v9, %v116_v10  ;;  %v405_v12 = vpop.f32.mrb[1].mxu0 }
  0xf9   :  { %v121_v13 = vmul.f32 0.2, %v117_v11  ;;  %vm120_vm1 = vcmp.ge.f32.partialorder %v117_v11, 0.0 }
  0xfb   :  { %v122_v14 = vsel %vm120_vm1, %v117_v11, %v121_v13 }
  0xfc   :  { %439 = vmatmul.mubr.f32.vlgmr.msra.gmra.mrb[0].mxu1 %v122_v14 }
 0x1cf   :  { %v212_v18 = vpop.f32.mrb[0].mxu1 }
 0x1d0   :  { %v213_v19 = vadd.f32 %v318_v17, %v212_v18  ;;  %v440_v20 = vpop.f32.mrb[1].mxu1 }
 0x1d2   :  { %vm216_vm2 = vcmp.ge.f32.partialorder %v213_v19, 0.0  ;;  %v217_v21 = vmul.f32 0.2, %v213_v19 }
 0x1d4   :  { %v218_v22 = vsel %vm216_vm2, %v213_v19, %v217_v21 }
 0x1d5   :  { %474 = vmatmul.mubr.f32.vlgmr.msra.gmra.mrb[2].mxu0 %v218_v22 }
 0x2a8   :  { %v308_v24 = vpop.f32.mrb[2].mxu0 }
 0x2a9   :  { %v309_v25 = vadd.f32 %v319_v23, %v308_v24  ;;  %v475_v26 = vpop.f32.mrb[3].mxu0 }
 0x2ab   :  { %312 = vst [vmem:[%s790_s7] sm:$0xff] %v309_v25 }

// kernel: _lambda_.9
= control target key start
LH: loop header
LB: loop body
LE: loop exit
PB: predicated region body
PF: predicated region fallthrough
CT: control target
= control target key end

     0   :  { %v1417_v3 = vmov 0.0   ;;  %s2515_s1 = inlined_call_operand.vmem [shape: f32[128,256], index: 1, kind: input, shape index: {}]   ;;  %s2516_s3 = inlined_call_operand.vmem [shape: f32[256,256], index: 3, kind: input, shape index: {}]   ;;  %s2517_s0 = inlined_call_operand.vmem [shape: f32[8,128], index: 0, kind: input, shape index: {}]   ;;  %s2518_s5 = inlined_call_operand.vmem [shape: f32[256,256], index: 5, kind: input, shape index: {}]   ;;  %s2519_s2 = inlined_call_operand.vmem [shape: f32[1,256], index: 2, kind: input, shape index: {}]   ;;  %s2520_s7 = inlined_call_operand.vmem [shape: f32[256,256], index: 7, kind: input, shape index: {}]   ;;  %s2521_s4 = inlined_call_operand.vmem [shape: f32[1,256], index: 4, kind: input, shape index: {}]   ;;  %s2522_s9 = inlined_call_operand.vmem [shape: f32[256,128], index: 9, kind: input, shape index: {}]   ;;  %s2523_s13 = inlined_call_operand.vmem [shape: f32[256,128], index: 13, kind: input, shape index: {}]   ;;  %s2524_s6 = inlined_call_operand.vmem [shape: f32[1,256], index: 6, kind: input, shape index: {}]   ;;  %s2525_s11 = inlined_call_operand.vmem [shape: f32[256,128], index: 11, kind: input, shape index: {}]   ;;  %s2526_s8 = inlined_call_operand.vmem [shape: f32[1,256], index: 8, kind: input, shape index: {}]   ;;  %s2527_s14 = inlined_call_operand.vmem [shape: f32[1,128], index: 14, kind: input, shape index: {}]   ;;  %s2528_s10 = inlined_call_operand.vmem [shape: f32[1,128], index: 10, kind: input, shape index: {}]   ;;  %s2529_s12 = inlined_call_operand.vmem [shape: f32[1,128], index: 12, kind: input, shape index: {}]   ;;  %s2530_s16 = inlined_call_operand.vmem [shape: f32[8,128], index: 16, kind: output, shape index: {1}]   ;;  %s2531_s17 = inlined_call_operand.vmem [shape: f32[8,128], index: 17, kind: output, shape index: {2}]   ;;  %s2532_s15 = inlined_call_operand.vmem [shape: f32[8,128], index: 15, kind: output, shape index: {0}]  }
   0x1   :  { %2535 = sst [smem:[#allocation2_spill]] %s2515_s1  ;;  %162 = vmatprep.mubr.f32.mxu0 %v1417_v3 }
   0x2   :  { %2536 = sst [smem:[#allocation3_spill]] %s2516_s3  ;;  %s2537_s26 = sld [smem:[#allocation2_spill]] }
   0x3   :  { %s2538_s24 = sld [smem:[#allocation3_spill]] }
   0x8   :  { %v55_v0 = vld [vmem:[%s2537_s26 + $0x8] sm:$0xff]  ;;  %v57_v1 = vld [vmem:[%s2537_s26 + $0x18] sm:$0xff]  ;;  %v54_v2 = vld [vmem:[%s2537_s26] sm:$0xff] }
   0x9   :  { %v1088_v4 = vpack.c.bf16 %v57_v1, %v55_v0  ;;  %v56_v5 = vld [vmem:[%s2537_s26 + $0x10] sm:$0xff]  ;;  %v59_v6 = vld [vmem:[%s2537_s26 + $0x28] sm:$0xff]  ;;  %v61_v7 = vld [vmem:[%s2537_s26 + $0x38] sm:$0xff] }
   0xa   :  { %v1090_v8 = vpack.c.bf16 %v56_v5, %v54_v2  ;;  %v1092_v9 = vpack.c.bf16 %v61_v7, %v59_v6  ;;  %v58_v10 = vld [vmem:[%s2537_s26 + $0x20] sm:$0xff]  ;;  %v60_v11 = vld [vmem:[%s2537_s26 + $0x30] sm:$0xff]  ;;  %v63_v12 = vld [vmem:[%s2537_s26 + $0x48] sm:$0xff] }
   0xb   :  { %1089 = vmatprep.subr.bf16.mxu0 %v1088_v4  ;;  %v65_v13 = vld [vmem:[%s2537_s26 + $0x58] sm:$0xff]  ;;  %v1094_v14 = vpack.c.bf16 %v60_v11, %v58_v10  ;;  %v62_v16 = vld [vmem:[%s2537_s26 + $0x40] sm:$0xff]  ;;  %v64_v17 = vld [vmem:[%s2537_s26 + $0x50] sm:$0xff] }
   0xc   :  { %1091 = vmatpush1.bf16.msra.mxu0 %v1090_v8  ;;  %v1096_v15 = vpack.c.bf16 %v65_v13, %v63_v12  ;;  %v67_v18 = vld [vmem:[%s2537_s26 + $0x68] sm:$0xff]  ;;  %v69_v19 = vld [vmem:[%s2537_s26 + $0x78] sm:$0xff]  ;;  %v1098_v20 = vpack.c.bf16 %v64_v17, %v62_v16  ;;  %v66_v22 = vld [vmem:[%s2537_s26 + $0x60] sm:$0xff] }
   0xd   :  { %1093 = vmatprep.subr.bf16.mxu0 %v1092_v9  ;;  %v1100_v21 = vpack.c.bf16 %v69_v19, %v67_v18  ;;  %v68_v23 = vld [vmem:[%s2537_s26 + $0x70] sm:$0xff]  ;;  %v71_v24 = vld [vmem:[%s2537_s26 + $0x88] sm:$0xff]  ;;  %v73_v25 = vld [vmem:[%s2537_s26 + $0x98] sm:$0xff] }
   0xe   :  { %v70_v26 = vld [vmem:[%s2537_s26 + $0x80] sm:$0xff]  ;;  %v72_v27 = vld [vmem:[%s2537_s26 + $0x90] sm:$0xff]  ;;  %v172_v28 = vld [vmem:[%s2538_s24 + $0x8] sm:$0xff]  ;;  %v1102_v31 = vpack.c.bf16 %v68_v23, %v66_v22  ;;  %v1104_v36 = vpack.c.bf16 %v73_v25, %v71_v24 }
   0xf   :  { %v174_v29 = vld [vmem:[%s2538_s24 + $0x18] sm:$0xff]  ;;  %v171_v30 = vld [vmem:[%s2538_s24] sm:$0xff]  ;;  %v173_v33 = vld [vmem:[%s2538_s24 + $0x10] sm:$0xff]  ;;  %v1106_v46 = vpack.c.bf16 %v72_v27, %v70_v26 }
  0x10   :  { %1095 = vmatpush1.bf16.msra.mxu0 %v1094_v14  ;;  %v1120_v32 = vpack.c.bf16 %v174_v29, %v172_v28  ;;  %v176_v34 = vld [vmem:[%s2538_s24 + $0x28] sm:$0xff]  ;;  %v178_v35 = vld [vmem:[%s2538_s24 + $0x38] sm:$0xff]  ;;  %v1122_v37 = vpack.c.bf16 %v173_v33, %v171_v30  ;;  %v175_v39 = vld [vmem:[%s2538_s24 + $0x20] sm:$0xff] }
  0x11   :  { %1097 = vmatprep.subr.bf16.mxu0 %v1096_v15  ;;  %v1124_v38 = vpack.c.bf16 %v178_v35, %v176_v34  ;;  %v177_v40 = vld [vmem:[%s2538_s24 + $0x30] sm:$0xff]  ;;  %v180_v41 = vld [vmem:[%s2538_s24 + $0x48] sm:$0xff]  ;;  %v77_v43 = vld [vmem:[%s2537_s26 + $0xb8] sm:$0xff] }
  0x12   :  { %v75_v42 = vld [vmem:[%s2537_s26 + $0xa8] sm:$0xff]  ;;  %1121 = vmatprep.subr.bf16.mxu1 %v1120_v32  ;;  %v182_v44 = vld [vmem:[%s2538_s24 + $0x58] sm:$0xff]  ;;  %v1126_v45 = vpack.c.bf16 %v177_v40, %v175_v39  ;;  %v74_v47 = vld [vmem:[%s2537_s26 + $0xa0] sm:$0xff] }
  0x13   :  { %1123 = vmatpush1.bf16.msra.mxu1 %v1122_v37  ;;  %v1128_v48 = vpack.c.bf16 %v182_v44, %v180_v41  ;;  %v179_v49 = vld [vmem:[%s2538_s24 + $0x40] sm:$0xff]  ;;  %v181_v50 = vld [vmem:[%s2538_s24 + $0x50] sm:$0xff]  ;;  %v1108_v51 = vpack.c.bf16 %v77_v43, %v75_v42  ;;  %v184_v53 = vld [vmem:[%s2538_s24 + $0x68] sm:$0xff] }
  0x14   :  { %1099 = vmatpush1.bf16.msra.mxu0 %v1098_v20  ;;  %1125 = vmatprep.subr.bf16.mxu1 %v1124_v38  ;;  %v76_v52 = vld [vmem:[%s2537_s26 + $0xb0] sm:$0xff]  ;;  %v186_v54 = vld [vmem:[%s2538_s24 + $0x78] sm:$0xff]  ;;  %v79_v55 = vld [vmem:[%s2537_s26 + $0xc8] sm:$0xff]  ;;  %v1130_v57 = vpack.c.bf16 %v181_v50, %v179_v49 }
  0x15   :  { %1101 = vmatprep.subr.bf16.mxu0 %v1100_v21  ;;  %v81_v56 = vld [vmem:[%s2537_s26 + $0xd8] sm:$0xff]  ;;  %v1110_v58 = vpack.c.bf16 %v76_v52, %v74_v47  ;;  %v78_v59 = vld [vmem:[%s2537_s26 + $0xc0] sm:$0xff]  ;;  %v1132_v60 = vpack.c.bf16 %v186_v54, %v184_v53  ;;  %v185_v62 = vld [vmem:[%s2538_s24 + $0x70] sm:$0xff] }
  0x16   :  { %v183_v61 = vld [vmem:[%s2538_s24 + $0x60] sm:$0xff]  ;;  %v1112_v63 = vpack.c.bf16 %v81_v56, %v79_v55  ;;  %v80_v0 = vld [vmem:[%s2537_s26 + $0xd0] sm:$0xff]  ;;  %v188_v1 = vld [vmem:[%s2538_s24 + $0x88] sm:$0xff] }
  0x17   :  { %1127 = vmatpush1.bf16.msra.mxu1 %v1126_v45  ;;  %v190_v2 = vld [vmem:[%s2538_s24 + $0x98] sm:$0xff]  ;;  %v83_v3 = vld [vmem:[%s2537_s26 + $0xe8] sm:$0xff]  ;;  %v1134_v5 = vpack.c.bf16 %v185_v62, %v183_v61  ;;  %v1114_v6 = vpack.c.bf16 %v80_v0, %v78_v59  ;;  %v82_v7 = vld [vmem:[%s2537_s26 + $0xe0] sm:$0xff] }
  0x18   :  { %1103 = vmatpush1.bf16.msra.mxu0 %v1102_v31  ;;  %1129 = vmatprep.subr.bf16.mxu1 %v1128_v48  ;;  %v85_v4 = vld [vmem:[%s2537_s26 + $0xf8] sm:$0xff]  ;;  %v1136_v8 = vpack.c.bf16 %v190_v2, %v188_v1  ;;  %v187_v9 = vld [vmem:[%s2538_s24 + $0x80] sm:$0xff]  ;;  %v189_v10 = vld [vmem:[%s2538_s24 + $0x90] sm:$0xff] }
  0x19   :  { %1105 = vmatprep.subr.bf16.mxu0 %v1104_v36  ;;  %v1116_v11 = vpack.c.bf16 %v85_v4, %v83_v3  ;;  %v84_v12 = vld [vmem:[%s2537_s26 + $0xf0] sm:$0xff]  ;;  %v192_v13 = vld [vmem:[%s2538_s24 + $0xa8] sm:$0xff]  ;;  %v194_v14 = vld [vmem:[%s2538_s24 + $0xb8] sm:$0xff]  ;;  %v1138_v15 = vpack.c.bf16 %v189_v10, %v187_v9 }
  0x1a   :  { %v1118_v16 = vpack.c.bf16 %v84_v12, %v82_v7  ;;  %v1140_v17 = vpack.c.bf16 %v194_v14, %v192_v13  ;;  %v191_v18 = vld [vmem:[%s2538_s24 + $0xa0] sm:$0xff]  ;;  %v193_v19 = vld [vmem:[%s2538_s24 + $0xb0] sm:$0xff]  ;;  %v196_v20 = vld [vmem:[%s2538_s24 + $0xc8] sm:$0xff] }
  0x1b   :  { %1131 = vmatpush1.bf16.msra.mxu1 %v1130_v57  ;;  %v198_v21 = vld [vmem:[%s2538_s24 + $0xd8] sm:$0xff]  ;;  %v1142_v22 = vpack.c.bf16 %v193_v19, %v191_v18  ;;  %v53_v23 = vld [vmem:[%s2517_s0] sm:$0xff]  ;;  %v197_v26 = vld [vmem:[%s2538_s24 + $0xd0] sm:$0xff] }
  0x1c   :  { %1107 = vmatpush1.bf16.msra.mxu0 %v1106_v46  ;;  %1133 = vmatprep.subr.bf16.mxu1 %v1132_v60  ;;  %v1144_v24 = vpack.c.bf16 %v198_v21, %v196_v20  ;;  %v195_v25 = vld [vmem:[%s2538_s24 + $0xc0] sm:$0xff]  ;;  %v200_v27 = vld [vmem:[%s2538_s24 + $0xe8] sm:$0xff]  ;;  %v202_v28 = vld [vmem:[%s2538_s24 + $0xf8] sm:$0xff] }
  0x1d   :  { %1109 = vmatprep.subr.bf16.mxu0 %v1108_v51  ;;  %v1146_v29 = vpack.c.bf16 %v197_v26, %v195_v25  ;;  %v1148_v30 = vpack.c.bf16 %v202_v28, %v200_v27  ;;  %v199_v31 = vld [vmem:[%s2538_s24 + $0xe0] sm:$0xff]  ;;  %v201_v32 = vld [vmem:[%s2538_s24 + $0xf0] sm:$0xff]  ;;  %v204_v33 = vld [vmem:[%s2538_s24 + $0x108] sm:$0xff] }
  0x1e   :  { %v206_v34 = vld [vmem:[%s2538_s24 + $0x118] sm:$0xff]  ;;  %v1150_v35 = vpack.c.bf16 %v201_v32, %v199_v31  ;;  %v203_v37 = vld [vmem:[%s2538_s24 + $0x100] sm:$0xff]  ;;  %v205_v38 = vld [vmem:[%s2538_s24 + $0x110] sm:$0xff] }
  0x1f   :  { %1135 = vmatpush1.bf16.msra.mxu1 %v1134_v5  ;;  %v1152_v36 = vpack.c.bf16 %v206_v34, %v204_v33  ;;  %v208_v39 = vld [vmem:[%s2538_s24 + $0x128] sm:$0xff]  ;;  %v210_v40 = vld [vmem:[%s2538_s24 + $0x138] sm:$0xff]  ;;  %v1154_v41 = vpack.c.bf16 %v205_v38, %v203_v37  ;;  %v207_v43 = vld [vmem:[%s2538_s24 + $0x120] sm:$0xff] }
  0x20   :  { %1111 = vmatpush1.bf16.msra.mxu0 %v1110_v58  ;;  %1137 = vmatprep.subr.bf16.mxu1 %v1136_v8  ;;  %v1156_v42 = vpack.c.bf16 %v210_v40, %v208_v39  ;;  %v209_v44 = vld [vmem:[%s2538_s24 + $0x130] sm:$0xff]  ;;  %v212_v45 = vld [vmem:[%s2538_s24 + $0x148] sm:$0xff]  ;;  %v214_v46 = vld [vmem:[%s2538_s24 + $0x158] sm:$0xff] }
  0x21   :  { %1113 = vmatprep.subr.bf16.mxu0 %v1112_v63  ;;  %v1158_v47 = vpack.c.bf16 %v209_v44, %v207_v43  ;;  %v1160_v48 = vpack.c.bf16 %v214_v46, %v212_v45  ;;  %v211_v49 = vld [vmem:[%s2538_s24 + $0x140] sm:$0xff]  ;;  %v213_v50 = vld [vmem:[%s2538_s24 + $0x150] sm:$0xff]  ;;  %v216_v51 = vld [vmem:[%s2538_s24 + $0x168] sm:$0xff] }
  0x22   :  { %v218_v52 = vld [vmem:[%s2538_s24 + $0x178] sm:$0xff]  ;;  %v1162_v53 = vpack.c.bf16 %v213_v50, %v211_v49  ;;  %v215_v55 = vld [vmem:[%s2538_s24 + $0x160] sm:$0xff]  ;;  %v217_v56 = vld [vmem:[%s2538_s24 + $0x170] sm:$0xff] }
  0x23   :  { %1139 = vmatpush1.bf16.msra.mxu1 %v1138_v15  ;;  %v1164_v54 = vpack.c.bf16 %v218_v52, %v216_v51  ;;  %v220_v57 = vld [vmem:[%s2538_s24 + $0x188] sm:$0xff]  ;;  %v222_v58 = vld [vmem:[%s2538_s24 + $0x198] sm:$0xff]  ;;  %v1166_v59 = vpack.c.bf16 %v217_v56, %v215_v55  ;;  %v219_v61 = vld [vmem:[%s2538_s24 + $0x180] sm:$0xff] }
  0x24   :  { %1115 = vmatpush1.bf16.msra.mxu0 %v1114_v6  ;;  %1141 = vmatprep.subr.bf16.mxu1 %v1140_v17  ;;  %v1168_v60 = vpack.c.bf16 %v222_v58, %v220_v57  ;;  %v221_v62 = vld [vmem:[%s2538_s24 + $0x190] sm:$0xff]  ;;  %v224_v63 = vld [vmem:[%s2538_s24 + $0x1a8] sm:$0xff]  ;;  %v226_v0 = vld [vmem:[%s2538_s24 + $0x1b8] sm:$0xff] }
  0x25   :  { %1117 = vmatprep.subr.bf16.mxu0 %v1116_v11  ;;  %v1170_v1 = vpack.c.bf16 %v221_v62, %v219_v61  ;;  %v1172_v2 = vpack.c.bf16 %v226_v0, %v224_v63  ;;  %v223_v3 = vld [vmem:[%s2538_s24 + $0x1a0] sm:$0xff]  ;;  %v225_v4 = vld [vmem:[%s2538_s24 + $0x1b0] sm:$0xff]  ;;  %v228_v5 = vld [vmem:[%s2538_s24 + $0x1c8] sm:$0xff] }
  0x26   :  { %v230_v6 = vld [vmem:[%s2538_s24 + $0x1d8] sm:$0xff]  ;;  %v1174_v7 = vpack.c.bf16 %v225_v4, %v223_v3  ;;  %v227_v9 = vld [vmem:[%s2538_s24 + $0x1c0] sm:$0xff]  ;;  %v229_v10 = vld [vmem:[%s2538_s24 + $0x1d0] sm:$0xff] }
  0x27   :  { %1143 = vmatpush1.bf16.msra.mxu1 %v1142_v22  ;;  %v1176_v8 = vpack.c.bf16 %v230_v6, %v228_v5  ;;  %v1178_v11 = vpack.c.bf16 %v229_v10, %v227_v9  ;;  %v232_v12 = vld [vmem:[%s2538_s24 + $0x1e8] sm:$0xff]  ;;  %v234_v13 = vld [vmem:[%s2538_s24 + $0x1f8] sm:$0xff]  ;;  %v231_v15 = vld [vmem:[%s2538_s24 + $0x1e0] sm:$0xff] }
  0x28   :  { %1119 = vmatpush1.bf16.msra.mxu0 %v1118_v16  ;;  %1145 = vmatprep.subr.bf16.mxu1 %v1144_v24  ;;  %v1180_v14 = vpack.c.bf16 %v234_v13, %v232_v12  ;;  %v233_v16 = vld [vmem:[%s2538_s24 + $0x1f0] sm:$0xff]  ;;  %v321_v18 = vld [vmem:[%s2518_s5 + $0x8] sm:$0xff]  ;;  %v323_v19 = vld [vmem:[%s2518_s5 + $0x18] sm:$0xff] }
  0x29   :  { %v1182_v17 = vpack.c.bf16 %v233_v16, %v231_v15  ;;  %v320_v20 = vld [vmem:[%s2518_s5] sm:$0xff]  ;;  %v1184_v21 = vpack.c.bf16 %v323_v19, %v321_v18  ;;  %v322_v22 = vld [vmem:[%s2518_s5 + $0x10] sm:$0xff]  ;;  %v327_v24 = vld [vmem:[%s2518_s5 + $0x38] sm:$0xff] }
  0x2a   :  { %v1186_v25 = vpack.c.bf16 %v322_v22, %v320_v20  ;;  %v324_v27 = vld [vmem:[%s2518_s5 + $0x20] sm:$0xff]  ;;  %v326_v28 = vld [vmem:[%s2518_s5 + $0x30] sm:$0xff]  ;;  %v361_v13 = vld [vmem:[%s2518_s5 + $0x148] sm:$0xff] }
  0x2b   :  { %163 = vmatmul.mubr.f32.vlgmr.msra.gmra.mrb[0].mxu0 %v53_v23  ;;  %1147 = vmatpush1.bf16.msra.mxu1 %v1146_v29  ;;  %v325_v23 = vld [vmem:[%s2518_s5 + $0x28] sm:$0xff]  ;;  %v1190_v31 = vpack.c.bf16 %v326_v28, %v324_v27  ;;  %v328_v33 = vld [vmem:[%s2518_s5 + $0x40] sm:$0xff]  ;;  %v330_v34 = vld [vmem:[%s2518_s5 + $0x50] sm:$0xff] }
  0x2c   :  { %1149 = vmatprep.subr.bf16.mxu1 %v1148_v30  ;;  %v1188_v26 = vpack.c.bf16 %v327_v24, %v325_v23  ;;  %v329_v29 = vld [vmem:[%s2518_s5 + $0x48] sm:$0xff]  ;;  %1185 = vmatprep.subr.bf16.mxu0 %v1184_v21  ;;  %v331_v30 = vld [vmem:[%s2518_s5 + $0x58] sm:$0xff]  ;;  %v1194_v37 = vpack.c.bf16 %v330_v34, %v328_v33  ;;  %v332_v39 = vld [vmem:[%s2518_s5 + $0x60] sm:$0xff] }
  0x2d   :  { %1187 = vmatpush1.bf16.msra.mxu0 %v1186_v25  ;;  %v1192_v32 = vpack.c.bf16 %v331_v30, %v329_v29  ;;  %v334_v40 = vld [vmem:[%s2518_s5 + $0x70] sm:$0xff]  ;;  %v336_v45 = vld [vmem:[%s2518_s5 + $0x80] sm:$0xff]  ;;  %v365_v19 = vld [vmem:[%s2518_s5 + $0x168] sm:$0xff] }
  0x2e   :  { %1189 = vmatprep.subr.bf16.mxu0 %v1188_v26  ;;  %v1198_v43 = vpack.c.bf16 %v334_v40, %v332_v39  ;;  %v338_v46 = vld [vmem:[%s2518_s5 + $0x90] sm:$0xff]  ;;  %v340_v51 = vld [vmem:[%s2518_s5 + $0xa0] sm:$0xff]  ;;  %v367_v20 = vld [vmem:[%s2518_s5 + $0x178] sm:$0xff] }
  0x2f   :  { %1151 = vmatpush1.bf16.msra.mxu1 %v1150_v35  ;;  %v333_v35 = vld [vmem:[%s2518_s5 + $0x68] sm:$0xff]  ;;  %v1202_v49 = vpack.c.bf16 %v338_v46, %v336_v45  ;;  %v342_v52 = vld [vmem:[%s2518_s5 + $0xb0] sm:$0xff]  ;;  %v344_v57 = vld [vmem:[%s2518_s5 + $0xc0] sm:$0xff]  ;;  %v1228_v22 = vpack.c.bf16 %v367_v20, %v365_v19 }
  0x30   :  { %1153 = vmatprep.subr.bf16.mxu1 %v1152_v36  ;;  %v335_v36 = vld [vmem:[%s2518_s5 + $0x78] sm:$0xff]  ;;  %v1206_v55 = vpack.c.bf16 %v342_v52, %v340_v51  ;;  %v346_v58 = vld [vmem:[%s2518_s5 + $0xd0] sm:$0xff]  ;;  %v348_v63 = vld [vmem:[%s2518_s5 + $0xe0] sm:$0xff] }
  0x31   :  { %1191 = vmatpush1.bf16.msra.mxu0 %v1190_v31  ;;  %v1196_v38 = vpack.c.bf16 %v335_v36, %v333_v35  ;;  %v1210_v61 = vpack.c.bf16 %v346_v58, %v344_v57  ;;  %v350_v0 = vld [vmem:[%s2518_s5 + $0xf0] sm:$0xff]  ;;  %v352_v5 = vld [vmem:[%s2518_s5 + $0x100] sm:$0xff]  ;;  %v369_v25 = vld [vmem:[%s2518_s5 + $0x188] sm:$0xff] }
  0x32   :  { %1193 = vmatprep.subr.bf16.mxu0 %v1192_v32  ;;  %v1214_v3 = vpack.c.bf16 %v350_v0, %v348_v63  ;;  %v354_v6 = vld [vmem:[%s2518_s5 + $0x110] sm:$0xff]  ;;  %v364_v23 = vld [vmem:[%s2518_s5 + $0x160] sm:$0xff]  ;;  %v371_v26 = vld [vmem:[%s2518_s5 + $0x198] sm:$0xff] }
  0x33   :  { %1155 = vmatpush1.bf16.msra.mxu1 %v1154_v41  ;;  %v337_v41 = vld [vmem:[%s2518_s5 + $0x88] sm:$0xff]  ;;  %v1218_v9 = vpack.c.bf16 %v354_v6, %v352_v5  ;;  %v358_v12 = vld [vmem:[%s2518_s5 + $0x130] sm:$0xff]  ;;  %v1232_v28 = vpack.c.bf16 %v371_v26, %v369_v25  ;;  %v368_v29 = vld [vmem:[%s2518_s5 + $0x180] sm:$0xff] }
  0x34   :  { %1157 = vmatprep.subr.bf16.mxu1 %v1156_v42  ;;  %v339_v42 = vld [vmem:[%s2518_s5 + $0x98] sm:$0xff]  ;;  %v362_v18 = vld [vmem:[%s2518_s5 + $0x150] sm:$0xff]  ;;  %v373_v31 = vld [vmem:[%s2518_s5 + $0x1a8] sm:$0xff] }
  0x35   :  { %1195 = vmatpush1.bf16.msra.mxu0 %v1194_v37  ;;  %v1200_v44 = vpack.c.bf16 %v339_v42, %v337_v41  ;;  %v366_v24 = vld [vmem:[%s2518_s5 + $0x170] sm:$0xff]  ;;  %v375_v32 = vld [vmem:[%s2518_s5 + $0x1b8] sm:$0xff]  ;;  %v372_v35 = vld [vmem:[%s2518_s5 + $0x1a0] sm:$0xff]  ;;  %v88_v41 = vlaneseq }
  0x36   :  { %1197 = vmatprep.subr.bf16.mxu0 %v1196_v38  ;;  %v1230_v27 = vpack.c.bf16 %v366_v24, %v364_v23  ;;  %v370_v30 = vld [vmem:[%s2518_s5 + $0x190] sm:$0xff]  ;;  %v1236_v34 = vpack.c.bf16 %v375_v32, %v373_v31  ;;  %v377_v37 = vld [vmem:[%s2518_s5 + $0x1c8] sm:$0xff]  ;;  %v379_v38 = vld [vmem:[%s2518_s5 + $0x1d8] sm:$0xff] }
  0x37   :  { %1159 = vmatpush1.bf16.msra.mxu1 %v1158_v47  ;;  %v341_v47 = vld [vmem:[%s2518_s5 + $0xa8] sm:$0xff]  ;;  %v1234_v33 = vpack.c.bf16 %v370_v30, %v368_v29  ;;  %v374_v36 = vld [vmem:[%s2518_s5 + $0x1b0] sm:$0xff]  ;;  %v1240_v40 = vpack.c.bf16 %v379_v38, %v377_v37  ;;  %v89_v42 = vshrl.u32 %v88_v41, 7  ;;  %v383_v58 = vld [vmem:[%s2518_s5 + $0x1f8] sm:$0xff] }
  0x38   :  { %1161 = vmatprep.subr.bf16.mxu1 %v1160_v48  ;;  %v343_v48 = vld [vmem:[%s2518_s5 + $0xb8] sm:$0xff]  ;;  %v1238_v39 = vpack.c.bf16 %v374_v36, %v372_v35  ;;  %v381_v57 = vld [vmem:[%s2518_s5 + $0x1e8] sm:$0xff]  ;;  %v481_v20 = vld [vmem:[%s2520_s7 + $0x60] sm:$0xff] }
  0x39   :  { %1199 = vmatpush1.bf16.msra.mxu0 %v1198_v43  ;;  %v1204_v50 = vpack.c.bf16 %v343_v48, %v341_v47  ;;  %v1974_v43 = vsub.s32 0, %v89_v42  ;;  %v1979_v45 = vsub.s32 1, %v89_v42  ;;  %v470_v63 = vld [vmem:[%s2520_s7 + $0x8] sm:$0xff]  ;;  %v472_v0 = vld [vmem:[%s2520_s7 + $0x18] sm:$0xff]  ;;  %v485_v26 = vld [vmem:[%s2520_s7 + $0x80] sm:$0xff] }
  0x3a   :  { %1201 = vmatprep.subr.bf16.mxu0 %v1200_v44  ;;  %v86_v44 = vld [vmem:[%s2519_s2] sm:$0x3]  ;;  %v476_v5 = vld [vmem:[%s2520_s7 + $0x38] sm:$0xff] }
  0x3b   :  { %1163 = vmatpush1.bf16.msra.mxu1 %v1162_v53  ;;  %v345_v53 = vld [vmem:[%s2518_s5 + $0xc8] sm:$0xff]  ;;  %v91_v46 = vrot.slane %v86_v44, %v1974_v43  ;;  %v95_v47 = vrot.slane %v86_v44, %v1979_v45  ;;  %v488_v23 = vld [vmem:[%s2520_s7 + $0x98] sm:$0xff]  ;;  %v489_v32 = vld [vmem:[%s2520_s7 + $0xa0] sm:$0xff] }
  0x3c   :  { %1165 = vmatprep.subr.bf16.mxu1 %v1164_v54  ;;  %v347_v54 = vld [vmem:[%s2518_s5 + $0xd8] sm:$0xff]  ;;  %v493_v38 = vld [vmem:[%s2520_s7 + $0xc0] sm:$0xff] }
  0x3d   :  { %1203 = vmatpush1.bf16.msra.mxu0 %v1202_v49  ;;  %v1208_v56 = vpack.c.bf16 %v347_v54, %v345_v53  ;;  %v376_v54 = vld [vmem:[%s2518_s5 + $0x1c0] sm:$0xff]  ;;  %v492_v29 = vld [vmem:[%s2520_s7 + $0xb8] sm:$0xff] }
  0x3e   :  { %1205 = vmatprep.subr.bf16.mxu0 %v1204_v50  ;;  %v496_v35 = vld [vmem:[%s2520_s7 + $0xd8] sm:$0xff] }
  0x3f   :  { %1167 = vmatpush1.bf16.msra.mxu1 %v1166_v59  ;;  %v349_v59 = vld [vmem:[%s2518_s5 + $0xe8] sm:$0xff]  ;;  %v500_v42 = vld [vmem:[%s2520_s7 + $0xf8] sm:$0xff] }
  0x40   :  { %1169 = vmatprep.subr.bf16.mxu1 %v1168_v60  ;;  %v351_v60 = vld [vmem:[%s2518_s5 + $0xf8] sm:$0xff] }
  0x41   :  { %1207 = vmatpush1.bf16.msra.mxu0 %v1206_v55  ;;  %v1212_v62 = vpack.c.bf16 %v351_v60, %v349_v59  ;;  %v378_v55 = vld [vmem:[%s2518_s5 + $0x1d0] sm:$0xff]  ;;  %v1244_v59 = vpack.c.bf16 %v383_v58, %v381_v57  ;;  %v380_v60 = vld [vmem:[%s2518_s5 + $0x1e0] sm:$0xff] }
  0x42   :  { %1209 = vmatprep.subr.bf16.mxu0 %v1208_v56  ;;  %v1242_v56 = vpack.c.bf16 %v378_v55, %v376_v54  ;;  %v503_v54 = vld [vmem:[%s2520_s7 + $0x110] sm:$0xff]  ;;  %v506_v55 = vld [vmem:[%s2520_s7 + $0x128] sm:$0xff] }
  0x43   :  { %1171 = vmatpush1.bf16.msra.mxu1 %v1170_v1  ;;  %v353_v1 = vld [vmem:[%s2518_s5 + $0x108] sm:$0xff] }
  0x44   :  { %1173 = vmatprep.subr.bf16.mxu1 %v1172_v2  ;;  %v355_v2 = vld [vmem:[%s2518_s5 + $0x118] sm:$0xff] }
  0x45   :  { %1211 = vmatpush1.bf16.msra.mxu0 %v1210_v61  ;;  %v1216_v4 = vpack.c.bf16 %v355_v2, %v353_v1  ;;  %v382_v61 = vld [vmem:[%s2518_s5 + $0x1f0] sm:$0xff]  ;;  %v469_v1 = vld [vmem:[%s2520_s7] sm:$0xff]  ;;  %v1248_v2 = vpack.c.bf16 %v472_v0, %v470_v63 }
  0x46   :  { %1213 = vmatprep.subr.bf16.mxu0 %v1212_v62  ;;  %v1246_v62 = vpack.c.bf16 %v382_v61, %v380_v60  ;;  %v507_v60 = vld [vmem:[%s2520_s7 + $0x130] sm:$0xff]  ;;  %v510_v61 = vld [vmem:[%s2520_s7 + $0x148] sm:$0xff] }
  0x47   :  { %1175 = vmatpush1.bf16.msra.mxu1 %v1174_v7  ;;  %v357_v7 = vld [vmem:[%s2518_s5 + $0x128] sm:$0xff] }
  0x48   :  { %1177 = vmatprep.subr.bf16.mxu1 %v1176_v8  ;;  %v359_v8 = vld [vmem:[%s2518_s5 + $0x138] sm:$0xff] }
  0x49   :  { %1215 = vmatpush1.bf16.msra.mxu0 %v1214_v3  ;;  %v1220_v10 = vpack.c.bf16 %v359_v8, %v357_v7  ;;  %v471_v3 = vld [vmem:[%s2520_s7 + $0x10] sm:$0xff]  ;;  %v473_v8 = vld [vmem:[%s2520_s7 + $0x20] sm:$0xff] }
  0x4a   :  { %1217 = vmatprep.subr.bf16.mxu0 %v1216_v4  ;;  %v474_v4 = vld [vmem:[%s2520_s7 + $0x28] sm:$0xff]  ;;  %v1250_v6 = vpack.c.bf16 %v471_v3, %v469_v1  ;;  %v509_v1 = vld [vmem:[%s2520_s7 + $0x140] sm:$0xff] }
  0x4b   :  { %1179 = vmatpush1.bf16.msra.mxu1 %v1178_v11  ;;  %v356_v11 = vld [vmem:[%s2518_s5 + $0x120] sm:$0xff]  ;;  %v1252_v7 = vpack.c.bf16 %v476_v5, %v474_v4  ;;  %v514_v3 = vld [vmem:[%s2520_s7 + $0x168] sm:$0xff]  ;;  %v516_v4 = vld [vmem:[%s2520_s7 + $0x178] sm:$0xff] }
  0x4c   :  { %1181 = vmatprep.subr.bf16.mxu1 %v1180_v14  ;;  %v363_v14 = vld [vmem:[%s2518_s5 + $0x158] sm:$0xff]  ;;  %v1222_v15 = vpack.c.bf16 %v358_v12, %v356_v11 }
  0x4d   :  { %1219 = vmatpush1.bf16.msra.mxu0 %v1218_v9  ;;  %v1224_v16 = vpack.c.bf16 %v363_v14, %v361_v13  ;;  %v475_v9 = vld [vmem:[%s2520_s7 + $0x30] sm:$0xff]  ;;  %v480_v11 = vld [vmem:[%s2520_s7 + $0x58] sm:$0xff]  ;;  %v477_v14 = vld [vmem:[%s2520_s7 + $0x40] sm:$0xff] }
  0x4e   :  { %1221 = vmatprep.subr.bf16.mxu0 %v1220_v10  ;;  %v478_v10 = vld [vmem:[%s2520_s7 + $0x48] sm:$0xff]  ;;  %v1254_v12 = vpack.c.bf16 %v475_v9, %v473_v8  ;;  %v515_v8 = vld [vmem:[%s2520_s7 + $0x170] sm:$0xff] }
  0x4f   :  { %1183 = vmatpush1.bf16.msra.mxu1 %v1182_v17  ;;  %v360_v17 = vld [vmem:[%s2518_s5 + $0x140] sm:$0xff]  ;;  %v1256_v13 = vpack.c.bf16 %v480_v11, %v478_v10  ;;  %v518_v9 = vld [vmem:[%s2520_s7 + $0x188] sm:$0xff]  ;;  %v520_v10 = vld [vmem:[%s2520_s7 + $0x198] sm:$0xff] }
  0x50   :  { %v1226_v21 = vpack.c.bf16 %v362_v18, %v360_v17  ;;  %1249 = vmatprep.subr.bf16.mxu1 %v1248_v2  ;;  %v484_v17 = vld [vmem:[%s2520_s7 + $0x78] sm:$0xff]  ;;  %v511_v2 = vld [vmem:[%s2520_s7 + $0x150] sm:$0xff] }
  0x51   :  { %1223 = vmatpush1.bf16.msra.mxu0 %v1222_v15  ;;  %v479_v15 = vld [vmem:[%s2520_s7 + $0x50] sm:$0xff]  ;;  %v1290_v5 = vpack.c.bf16 %v511_v2, %v509_v1  ;;  %v621_v1 = vld [vmem:[%s2522_s9 + $0x28] sm:$0xff] }
  0x52   :  { %1225 = vmatprep.subr.bf16.mxu0 %v1224_v16  ;;  %v482_v16 = vld [vmem:[%s2520_s7 + $0x68] sm:$0xff]  ;;  %v1258_v18 = vpack.c.bf16 %v479_v15, %v477_v14  ;;  %v519_v14 = vld [vmem:[%s2520_s7 + $0x190] sm:$0xff] }
  0x53   :  { %v1260_v19 = vpack.c.bf16 %v484_v17, %v482_v16  ;;  %v522_v15 = vld [vmem:[%s2520_s7 + $0x1a8] sm:$0xff]  ;;  %v524_v16 = vld [vmem:[%s2520_s7 + $0x1b8] sm:$0xff] }
  0x55   :  { %1227 = vmatpush1.bf16.msra.mxu0 %v1226_v21  ;;  %v483_v21 = vld [vmem:[%s2520_s7 + $0x70] sm:$0xff] }
  0x56   :  { %1229 = vmatprep.subr.bf16.mxu0 %v1228_v22  ;;  %v486_v22 = vld [vmem:[%s2520_s7 + $0x88] sm:$0xff]  ;;  %v1262_v24 = vpack.c.bf16 %v483_v21, %v481_v20  ;;  %v523_v20 = vld [vmem:[%s2520_s7 + $0x1b0] sm:$0xff] }
  0x57   :  { %v1264_v25 = vpack.c.bf16 %v488_v23, %v486_v22  ;;  %v526_v21 = vld [vmem:[%s2520_s7 + $0x1c8] sm:$0xff]  ;;  %v528_v22 = vld [vmem:[%s2520_s7 + $0x1d8] sm:$0xff] }
  0x59   :  { %1231 = vmatpush1.bf16.msra.mxu0 %v1230_v27  ;;  %v487_v27 = vld [vmem:[%s2520_s7 + $0x90] sm:$0xff] }
  0x5a   :  { %1233 = vmatprep.subr.bf16.mxu0 %v1232_v28  ;;  %v490_v28 = vld [vmem:[%s2520_s7 + $0xa8] sm:$0xff]  ;;  %v1266_v30 = vpack.c.bf16 %v487_v27, %v485_v26 }
  0x5b   :  { %v1268_v31 = vpack.c.bf16 %v492_v29, %v490_v28 }
  0x5d   :  { %1235 = vmatpush1.bf16.msra.mxu0 %v1234_v33  ;;  %v491_v33 = vld [vmem:[%s2520_s7 + $0xb0] sm:$0xff] }
  0x5e   :  { %1237 = vmatprep.subr.bf16.mxu0 %v1236_v34  ;;  %v494_v34 = vld [vmem:[%s2520_s7 + $0xc8] sm:$0xff]  ;;  %v1270_v36 = vpack.c.bf16 %v491_v33, %v489_v32 }
  0x5f   :  { %v1272_v37 = vpack.c.bf16 %v496_v35, %v494_v34  ;;  %v525_v34 = vld [vmem:[%s2520_s7 + $0x1c0] sm:$0xff]  ;;  %v527_v35 = vld [vmem:[%s2520_s7 + $0x1d0] sm:$0xff] }
  0x61   :  { %1239 = vmatpush1.bf16.msra.mxu0 %v1238_v39  ;;  %v495_v39 = vld [vmem:[%s2520_s7 + $0xd0] sm:$0xff] }
  0x62   :  { %1241 = vmatprep.subr.bf16.mxu0 %v1240_v40  ;;  %v498_v40 = vld [vmem:[%s2520_s7 + $0xe8] sm:$0xff]  ;;  %v1274_v44 = vpack.c.bf16 %v495_v39, %v493_v38  ;;  %v532_v38 = vld [vmem:[%s2520_s7 + $0x1f8] sm:$0xff] }
  0x65   :  { %1243 = vmatpush1.bf16.msra.mxu0 %v1242_v56  ;;  %v508_v56 = vld [vmem:[%s2520_s7 + $0x138] sm:$0xff] }
  0x66   :  { %1245 = vmatprep.subr.bf16.mxu0 %v1244_v59  ;;  %v1284_v58 = vpack.c.bf16 %v508_v56, %v506_v55  ;;  %v505_v59 = vld [vmem:[%s2520_s7 + $0x120] sm:$0xff]  ;;  %v634_v55 = vld [vmem:[%s2522_s9 + $0x90] sm:$0xff]  ;;  %v635_v56 = vld [vmem:[%s2522_s9 + $0x98] sm:$0xff] }
  0x67   :  { %v1286_v63 = vpack.c.bf16 %v507_v60, %v505_v59  ;;  %v1316_v59 = vpack.c.bf16 %v635_v56, %v634_v55 }
  0x69   :  { %1247 = vmatpush1.bf16.msra.mxu0 %v1246_v62  ;;  %v512_v62 = vld [vmem:[%s2520_s7 + $0x158] sm:$0xff] }
  0x6a   :  { %v1288_v0 = vpack.c.bf16 %v512_v62, %v510_v61  ;;  %v636_v61 = vld [vmem:[%s2522_s9 + $0xa0] sm:$0xff]  ;;  %v637_v62 = vld [vmem:[%s2522_s9 + $0xa8] sm:$0xff] }
  0xfe   :  { %v164_v48 = vpop.f32.mrb[0].mxu0 }
  0xff   :  { %v165_v49 = vadd.f32 %v164_v48, %v91_v46  ;;  %v166_v50 = vpop.f32.mrb[1].mxu0  ;;  %v1276_v46 = vpack.c.bf16 %v500_v42, %v498_v40  ;;  %v499_v48 = vld [vmem:[%s2520_s7 + $0xf0] sm:$0xff]  ;;  %v529_v40 = vld [vmem:[%s2520_s7 + $0x1e0] sm:$0xff] }
 0x100   :  { %v167_v51 = vadd.f32 %v166_v50, %v95_v47  ;;  %v497_v47 = vld [vmem:[%s2520_s7 + $0xe0] sm:$0xff]  ;;  %v504_v50 = vld [vmem:[%s2520_s7 + $0x118] sm:$0xff]  ;;  %v531_v42 = vld [vmem:[%s2520_s7 + $0x1f0] sm:$0xff] }
 0x101   :  { %v169_v53 = vmax.f32 %v165_v49, 0.0  ;;  %v502_v49 = vld [vmem:[%s2520_s7 + $0x108] sm:$0xff] }
 0x102   :  { %v170_v52 = vmax.f32 %v167_v51, 0.0  ;;  %v1278_v51 = vpack.c.bf16 %v499_v48, %v497_v47  ;;  %v633_v47 = vld [vmem:[%s2522_s9 + $0x88] sm:$0xff]  ;;  %v616_v48 = vld [vmem:[%s2522_s9] sm:$0xff] }
 0x104   :  { %311 = vmatprep.mubr.f32.mxu1 %v170_v52  ;;  %v1280_v52 = vpack.c.bf16 %v504_v50, %v502_v49  ;;  %v617_v50 = vld [vmem:[%s2522_s9 + $0x8] sm:$0xff] }
 0x105   :  { %312 = vmatmul.mubr.f32.vlgmr.msra.gmra.mrb[0].mxu1 %v169_v53  ;;  %v501_v53 = vld [vmem:[%s2520_s7 + $0x100] sm:$0xff] }
 0x106   :  { %1251 = vmatpush1.bf16.msra.mxu1 %v1250_v6  ;;  %v1282_v57 = vpack.c.bf16 %v503_v54, %v501_v53  ;;  %v1292_v6 = vpack.c.bf16 %v516_v4, %v514_v3  ;;  %v1314_v53 = vpack.c.bf16 %v617_v50, %v616_v48  ;;  %v638_v3 = vld [vmem:[%s2522_s9 + $0xb0] sm:$0xff]  ;;  %v639_v4 = vld [vmem:[%s2522_s9 + $0xb8] sm:$0xff]  ;;  %v870_v48 = vld [vmem:[%s2523_s13 + $0xa8] sm:$0xff] }
 0x107   :  { %1253 = vmatprep.subr.bf16.mxu1 %v1252_v7  ;;  %v513_v7 = vld [vmem:[%s2520_s7 + $0x160] sm:$0xff] }
 0x108   :  { %v1294_v11 = vpack.c.bf16 %v515_v8, %v513_v7  ;;  %v623_v7 = vld [vmem:[%s2522_s9 + $0x38] sm:$0xff] }
 0x10a   :  { %1255 = vmatpush1.bf16.msra.mxu1 %v1254_v12  ;;  %v1296_v12 = vpack.c.bf16 %v520_v10, %v518_v9  ;;  %v640_v9 = vld [vmem:[%s2522_s9 + $0xc0] sm:$0xff]  ;;  %v641_v10 = vld [vmem:[%s2522_s9 + $0xc8] sm:$0xff] }
 0x10b   :  { %1257 = vmatprep.subr.bf16.mxu1 %v1256_v13  ;;  %v517_v13 = vld [vmem:[%s2520_s7 + $0x180] sm:$0xff] }
 0x10c   :  { %v1298_v17 = vpack.c.bf16 %v519_v14, %v517_v13  ;;  %v625_v13 = vld [vmem:[%s2522_s9 + $0x48] sm:$0xff] }
 0x10e   :  { %1259 = vmatpush1.bf16.msra.mxu1 %v1258_v18  ;;  %v1300_v18 = vpack.c.bf16 %v524_v16, %v522_v15  ;;  %v642_v15 = vld [vmem:[%s2522_s9 + $0xd0] sm:$0xff]  ;;  %v643_v16 = vld [vmem:[%s2522_s9 + $0xd8] sm:$0xff] }
 0x10f   :  { %1261 = vmatprep.subr.bf16.mxu1 %v1260_v19  ;;  %v521_v19 = vld [vmem:[%s2520_s7 + $0x1a0] sm:$0xff] }
 0x110   :  { %v1302_v23 = vpack.c.bf16 %v523_v20, %v521_v19  ;;  %v627_v19 = vld [vmem:[%s2522_s9 + $0x58] sm:$0xff] }
 0x112   :  { %1263 = vmatpush1.bf16.msra.mxu1 %v1262_v24  ;;  %v1304_v24 = vpack.c.bf16 %v528_v22, %v526_v21  ;;  %v644_v21 = vld [vmem:[%s2522_s9 + $0xe0] sm:$0xff]  ;;  %v645_v22 = vld [vmem:[%s2522_s9 + $0xe8] sm:$0xff] }
 0x113   :  { %1265 = vmatprep.subr.bf16.mxu1 %v1264_v25  ;;  %v235_v25 = vld [vmem:[%s2521_s4] sm:$0x3] }
 0x114   :  { %v240_v26 = vrot.slane %v235_v25, %v1974_v43  ;;  %v244_v27 = vrot.slane %v235_v25, %v1979_v45  ;;  %v629_v25 = vld [vmem:[%s2522_s9 + $0x68] sm:$0xff] }
 0x116   :  { %1267 = vmatpush1.bf16.msra.mxu1 %v1266_v30 }
 0x117   :  { %1269 = vmatprep.subr.bf16.mxu1 %v1268_v31 }
 0x11a   :  { %1271 = vmatpush1.bf16.msra.mxu1 %v1270_v36  ;;  %v1306_v36 = vpack.c.bf16 %v527_v35, %v525_v34  ;;  %v850_v34 = vld [vmem:[%s2523_s13 + $0x8] sm:$0xff] }
 0x11b   :  { %1273 = vmatprep.subr.bf16.mxu1 %v1272_v37  ;;  %v530_v37 = vld [vmem:[%s2520_s7 + $0x1e8] sm:$0xff] }
 0x11c   :  { %v1308_v39 = vpack.c.bf16 %v532_v38, %v530_v37  ;;  %v868_v37 = vld [vmem:[%s2523_s13 + $0x98] sm:$0xff] }
 0x11e   :  { %1275 = vmatpush1.bf16.msra.mxu1 %v1274_v44  ;;  %v1310_v44 = vpack.c.bf16 %v531_v42, %v529_v40 }
 0x11f   :  { %1277 = vmatprep.subr.bf16.mxu1 %v1276_v46  ;;  %v632_v46 = vld [vmem:[%s2522_s9 + $0x80] sm:$0xff] }
 0x120   :  { %v1312_v49 = vpack.c.bf16 %v633_v47, %v632_v46  ;;  %v852_v46 = vld [vmem:[%s2523_s13 + $0x18] sm:$0xff]  ;;  %v869_v47 = vld [vmem:[%s2523_s13 + $0xa0] sm:$0xff] }
 0x121   :  { %v1384_v50 = vpack.c.bf16 %v870_v48, %v869_v47 }
 0x122   :  { %1279 = vmatpush1.bf16.msra.mxu1 %v1278_v51  ;;  %v865_v51 = vld [vmem:[%s2523_s13 + $0x80] sm:$0xff]  ;;  %1313 = vmatprep.subr.bf16.mxu0 %v1312_v49 }
 0x123   :  { %1281 = vmatprep.subr.bf16.mxu1 %v1280_v52  ;;  %v866_v52 = vld [vmem:[%s2523_s13 + $0x88] sm:$0xff] }
 0x124   :  { %v1376_v54 = vpack.c.bf16 %v866_v52, %v865_v51  ;;  %v853_v51 = vld [vmem:[%s2523_s13 + $0x20] sm:$0xff]  ;;  %v854_v52 = vld [vmem:[%s2523_s13 + $0x28] sm:$0xff] }
 0x125   :  { %v1386_v55 = vpack.c.bf16 %v854_v52, %v853_v51  ;;  %v761_v51 = vld [vmem:[%s2525_s11 + $0xb0] sm:$0xff]  ;;  %v762_v52 = vld [vmem:[%s2525_s11 + $0xb8] sm:$0xff] }
 0x126   :  { %1283 = vmatpush1.bf16.msra.mxu1 %v1282_v57  ;;  %v618_v57 = vld [vmem:[%s2522_s9 + $0x10] sm:$0xff] }
 0x127   :  { %1285 = vmatprep.subr.bf16.mxu1 %v1284_v58  ;;  %v619_v58 = vld [vmem:[%s2522_s9 + $0x18] sm:$0xff] }
 0x128   :  { %v1318_v60 = vpack.c.bf16 %v619_v58, %v618_v57  ;;  %v855_v57 = vld [vmem:[%s2523_s13 + $0x30] sm:$0xff]  ;;  %v856_v58 = vld [vmem:[%s2523_s13 + $0x38] sm:$0xff] }
 0x12a   :  { %1287 = vmatpush1.bf16.msra.mxu1 %v1286_v63  ;;  %v1320_v63 = vpack.c.bf16 %v637_v62, %v636_v61  ;;  %v1390_v61 = vpack.c.bf16 %v856_v58, %v855_v57  ;;  %v763_v57 = vld [vmem:[%s2525_s11 + $0xc0] sm:$0xff]  ;;  %v764_v58 = vld [vmem:[%s2525_s11 + $0xc8] sm:$0xff] }
 0x12b   :  { %1289 = vmatprep.subr.bf16.mxu1 %v1288_v0  ;;  %v620_v0 = vld [vmem:[%s2522_s9 + $0x20] sm:$0xff] }
 0x12c   :  { %v1322_v2 = vpack.c.bf16 %v621_v1, %v620_v0  ;;  %v858_v0 = vld [vmem:[%s2523_s13 + $0x48] sm:$0xff]  ;;  %v875_v1 = vld [vmem:[%s2523_s13 + $0xd0] sm:$0xff] }
 0x12e   :  { %1291 = vmatpush1.bf16.msra.mxu1 %v1290_v5  ;;  %v1324_v5 = vpack.c.bf16 %v639_v4, %v638_v3 }
 0x12f   :  { %1293 = vmatprep.subr.bf16.mxu1 %v1292_v6  ;;  %v622_v6 = vld [vmem:[%s2522_s9 + $0x30] sm:$0xff] }
 0x130   :  { %v1326_v8 = vpack.c.bf16 %v623_v7, %v622_v6  ;;  %v860_v6 = vld [vmem:[%s2523_s13 + $0x58] sm:$0xff]  ;;  %v877_v7 = vld [vmem:[%s2523_s13 + $0xe0] sm:$0xff] }
 0x132   :  { %1295 = vmatpush1.bf16.msra.mxu1 %v1294_v11  ;;  %v1328_v11 = vpack.c.bf16 %v641_v10, %v640_v9 }
 0x133   :  { %1297 = vmatprep.subr.bf16.mxu1 %v1296_v12  ;;  %v624_v12 = vld [vmem:[%s2522_s9 + $0x40] sm:$0xff] }
 0x134   :  { %v1330_v14 = vpack.c.bf16 %v625_v13, %v624_v12  ;;  %v862_v12 = vld [vmem:[%s2523_s13 + $0x68] sm:$0xff] }
 0x136   :  { %1299 = vmatpush1.bf16.msra.mxu1 %v1298_v17  ;;  %v1332_v17 = vpack.c.bf16 %v643_v16, %v642_v15  ;;  %v647_v15 = vld [vmem:[%s2522_s9 + $0xf8] sm:$0xff] }
 0x137   :  { %1301 = vmatprep.subr.bf16.mxu1 %v1300_v18  ;;  %v626_v18 = vld [vmem:[%s2522_s9 + $0x50] sm:$0xff] }
 0x138   :  { %v1334_v20 = vpack.c.bf16 %v627_v19, %v626_v18  ;;  %v631_v18 = vld [vmem:[%s2522_s9 + $0x78] sm:$0xff]  ;;  %v879_v19 = vld [vmem:[%s2523_s13 + $0xf0] sm:$0xff] }
 0x13a   :  { %1303 = vmatpush1.bf16.msra.mxu1 %v1302_v23  ;;  %v1336_v23 = vpack.c.bf16 %v645_v22, %v644_v21  ;;  %v880_v21 = vld [vmem:[%s2523_s13 + $0xf8] sm:$0xff]  ;;  %v863_v22 = vld [vmem:[%s2523_s13 + $0x70] sm:$0xff] }
 0x13b   :  { %1305 = vmatprep.subr.bf16.mxu1 %v1304_v24  ;;  %v628_v24 = vld [vmem:[%s2522_s9 + $0x60] sm:$0xff] }
 0x13e   :  { %1307 = vmatpush1.bf16.msra.mxu1 %v1306_v36  ;;  %v867_v36 = vld [vmem:[%s2523_s13 + $0x90] sm:$0xff] }
 0x13f   :  { %1309 = vmatprep.subr.bf16.mxu1 %v1308_v39  ;;  %v1380_v42 = vpack.c.bf16 %v868_v37, %v867_v36  ;;  %v758_v36 = vld [vmem:[%s2525_s11 + $0x98] sm:$0xff] }
 0x142   :  { %1311 = vmatpush1.bf16.msra.mxu1 %v1310_v44  ;;  %v851_v44 = vld [vmem:[%s2523_s13 + $0x10] sm:$0xff] }
 0x143   :  { %1377 = vmatprep.subr.bf16.mxu1 %v1376_v54  ;;  %v1382_v49 = vpack.c.bf16 %v852_v46, %v851_v44  ;;  %v872_v54 = vld [vmem:[%s2523_s13 + $0xb8] sm:$0xff]  ;;  %v759_v44 = vld [vmem:[%s2525_s11 + $0xa0] sm:$0xff]  ;;  %v760_v46 = vld [vmem:[%s2525_s11 + $0xa8] sm:$0xff] }
 0x144   :  { %v1352_v48 = vpack.c.bf16 %v760_v46, %v759_v44 }
 0x1d8   :  { %v313_v28 = vpop.f32.mrb[0].mxu1 }
 0x1d9   :  { %v314_v29 = vadd.f32 %v313_v28, %v240_v26  ;;  %v315_v30 = vpop.f32.mrb[1].mxu1  ;;  %v1338_v26 = vpack.c.bf16 %v629_v25, %v628_v24  ;;  %v1404_v24 = vpack.c.bf16 %v880_v21, %v879_v19 }
 0x1da   :  { %v316_v31 = vadd.f32 %v315_v30, %v244_v27  ;;  %v384_v27 = vld [vmem:[%s2524_s6] sm:$0x3] }
 0x1db   :  { %v318_v33 = vmax.f32 %v314_v29, 0.0  ;;  %v389_v28 = vrot.slane %v384_v27, %v1974_v43  ;;  %v393_v29 = vrot.slane %v384_v27, %v1979_v45  ;;  %v756_v27 = vld [vmem:[%s2525_s11 + $0x88] sm:$0xff] }
 0x1dc   :  { %v319_v32 = vmax.f32 %v316_v31, 0.0 }
 0x1de   :  { %460 = vmatprep.mubr.f32.mxu0 %v319_v32 }
 0x1df   :  { %461 = vmatmul.mubr.f32.vlgmr.msra.gmra.mrb[2].mxu0 %v318_v33  ;;  %v849_v33 = vld [vmem:[%s2523_s13] sm:$0xff] }
 0x1e0   :  { %1315 = vmatpush3.bf16.msra.mxu0 %v1314_v53  ;;  %v1378_v39 = vpack.c.bf16 %v850_v34, %v849_v33  ;;  %v871_v53 = vld [vmem:[%s2523_s13 + $0xb0] sm:$0xff]  ;;  %v740_v33 = vld [vmem:[%s2525_s11 + $0x8] sm:$0xff] }
 0x1e1   :  { %1317 = vmatprep.subr.bf16.mxu0 %v1316_v59  ;;  %v1388_v56 = vpack.c.bf16 %v872_v54, %v871_v53  ;;  %v873_v59 = vld [vmem:[%s2523_s13 + $0xc0] sm:$0xff]  ;;  %v1356_v54 = vpack.c.bf16 %v762_v52, %v761_v51 }
 0x1e4   :  { %1319 = vmatpush3.bf16.msra.mxu0 %v1318_v60  ;;  %v874_v60 = vld [vmem:[%s2523_s13 + $0xc8] sm:$0xff] }
 0x1e5   :  { %1321 = vmatprep.subr.bf16.mxu0 %v1320_v63  ;;  %v1392_v62 = vpack.c.bf16 %v874_v60, %v873_v59  ;;  %v857_v63 = vld [vmem:[%s2523_s13 + $0x40] sm:$0xff]  ;;  %v1360_v60 = vpack.c.bf16 %v764_v58, %v763_v57 }
 0x1e6   :  { %v1394_v3 = vpack.c.bf16 %v858_v0, %v857_v63  ;;  %v765_v63 = vld [vmem:[%s2525_s11 + $0xd0] sm:$0xff]  ;;  %v766_v0 = vld [vmem:[%s2525_s11 + $0xd8] sm:$0xff] }
 0x1e8   :  { %1323 = vmatpush3.bf16.msra.mxu0 %v1322_v2  ;;  %v876_v2 = vld [vmem:[%s2523_s13 + $0xd8] sm:$0xff] }
 0x1e9   :  { %1325 = vmatprep.subr.bf16.mxu0 %v1324_v5  ;;  %v1396_v4 = vpack.c.bf16 %v876_v2, %v875_v1  ;;  %v859_v5 = vld [vmem:[%s2523_s13 + $0x50] sm:$0xff]  ;;  %v1364_v2 = vpack.c.bf16 %v766_v0, %v765_v63 }
 0x1ea   :  { %v1398_v9 = vpack.c.bf16 %v860_v6, %v859_v5  ;;  %v767_v5 = vld [vmem:[%s2525_s11 + $0xe0] sm:$0xff]  ;;  %v768_v6 = vld [vmem:[%s2525_s11 + $0xe8] sm:$0xff] }
 0x1ec   :  { %1327 = vmatpush3.bf16.msra.mxu0 %v1326_v8  ;;  %v878_v8 = vld [vmem:[%s2523_s13 + $0xe8] sm:$0xff] }
 0x1ed   :  { %1329 = vmatprep.subr.bf16.mxu0 %v1328_v11  ;;  %v1400_v10 = vpack.c.bf16 %v878_v8, %v877_v7  ;;  %v861_v11 = vld [vmem:[%s2523_s13 + $0x60] sm:$0xff]  ;;  %v1368_v8 = vpack.c.bf16 %v768_v6, %v767_v5 }
 0x1ee   :  { %v1402_v13 = vpack.c.bf16 %v862_v12, %v861_v11  ;;  %v769_v11 = vld [vmem:[%s2525_s11 + $0xf0] sm:$0xff]  ;;  %v770_v12 = vld [vmem:[%s2525_s11 + $0xf8] sm:$0xff] }
 0x1f0   :  { %1331 = vmatpush3.bf16.msra.mxu0 %v1330_v14  ;;  %v646_v14 = vld [vmem:[%s2522_s9 + $0xf0] sm:$0xff] }
 0x1f1   :  { %1333 = vmatprep.subr.bf16.mxu0 %v1332_v17  ;;  %v1340_v16 = vpack.c.bf16 %v647_v15, %v646_v14  ;;  %v630_v17 = vld [vmem:[%s2522_s9 + $0x70] sm:$0xff]  ;;  %v1372_v14 = vpack.c.bf16 %v770_v12, %v769_v11 }
 0x1f2   :  { %v753_v15 = vld [vmem:[%s2525_s11 + $0x70] sm:$0xff] }
 0x1f4   :  { %1335 = vmatpush3.bf16.msra.mxu0 %v1334_v20  ;;  %v1342_v20 = vpack.c.bf16 %v631_v18, %v630_v17  ;;  %v726_v18 = vand.u32 127, %v88_v41 }
 0x1f5   :  { %1337 = vmatprep.subr.bf16.mxu0 %v1336_v23  ;;  %v864_v23 = vld [vmem:[%s2523_s13 + $0x78] sm:$0xff] }
 0x1f6   :  { %v1406_v25 = vpack.c.bf16 %v864_v23, %v863_v22  ;;  %v982_v22 = vld [vmem:[%s2527_s14] ss:$0 sm:$0xff]  ;;  %vm727_vm0 = vcmp.lt.s32.totalorder %v726_v18, 10 }
 0x1f8   :  { %1339 = vmatpush3.bf16.msra.mxu0 %v1338_v26  ;;  %v755_v26 = vld [vmem:[%s2525_s11 + $0x80] sm:$0xff] }
 0x1f9   :  { %1341 = vmatprep.subr.bf16.mxu0 %v1340_v16  ;;  %v754_v16 = vld [vmem:[%s2525_s11 + $0x78] sm:$0xff] }
 0x1fa   :  { %v1374_v17 = vpack.c.bf16 %v754_v16, %v753_v15 }
 0x1fc   :  { %1343 = vmatpush3.bf16.msra.mxu0 %v1342_v20 }
 0x2b2   :  { %v462_v30 = vpop.f32.mrb[2].mxu0 }
 0x2b3   :  { %v463_v31 = vadd.f32 %v462_v30, %v389_v28  ;;  %v464_v32 = vpop.f32.mrb[3].mxu0  ;;  %v1344_v28 = vpack.c.bf16 %v756_v27, %v755_v26 }
 0x2b4   :  { %v465_v35 = vadd.f32 %v464_v32, %v393_v29  ;;  %v533_v29 = vld [vmem:[%s2526_s8] sm:$0x3] }
 0x2b5   :  { %v467_v40 = vmax.f32 %v463_v31, 0.0  ;;  %1345 = vmatprep.subr.bf16.mxu0 %v1344_v28  ;;  %v542_v30 = vrot.slane %v533_v29, %v1979_v45  ;;  %v538_v31 = vrot.slane %v533_v29, %v1974_v43  ;;  %v739_v32 = vld [vmem:[%s2525_s11] sm:$0xff] }
 0x2b6   :  { %v468_v38 = vmax.f32 %v465_v35, 0.0  ;;  %v757_v35 = vld [vmem:[%s2525_s11 + $0x90] sm:$0xff]  ;;  %v1346_v43 = vpack.c.bf16 %v740_v33, %v739_v32 }
 0x2b8   :  { %609 = vmatprep.mubr.f32.mxu1 %v468_v38 }
 0x2b9   :  { %610 = vmatmul.mubr.f32.vlgmr.msra.gmra.mrb[2].mxu1 %v467_v40  ;;  %v741_v40 = vld [vmem:[%s2525_s11 + $0x10] sm:$0xff] }
 0x2ba   :  { %1379 = vmatpush3.bf16.msra.mxu1 %v1378_v39  ;;  %v1348_v39 = vpack.c.bf16 %v758_v36, %v757_v35  ;;  %v981_v35 = vld [vmem:[%s2529_s12] ss:$0 sm:$0xff] }
 0x2bb   :  { %1381 = vmatprep.subr.bf16.mxu1 %v1380_v42  ;;  %v742_v42 = vld [vmem:[%s2525_s11 + $0x18] sm:$0xff] }
 0x2bc   :  { %v1350_v47 = vpack.c.bf16 %v742_v42, %v741_v40 }
 0x2be   :  { %1383 = vmatpush3.bf16.msra.mxu1 %v1382_v49  ;;  %v743_v49 = vld [vmem:[%s2525_s11 + $0x20] sm:$0xff] }
 0x2bf   :  { %1385 = vmatprep.subr.bf16.mxu1 %v1384_v50  ;;  %v744_v50 = vld [vmem:[%s2525_s11 + $0x28] sm:$0xff] }
 0x2c0   :  { %v1354_v53 = vpack.c.bf16 %v744_v50, %v743_v49 }
 0x2c2   :  { %1387 = vmatpush3.bf16.msra.mxu1 %v1386_v55  ;;  %v745_v55 = vld [vmem:[%s2525_s11 + $0x30] sm:$0xff] }
 0x2c3   :  { %1389 = vmatprep.subr.bf16.mxu1 %v1388_v56  ;;  %v746_v56 = vld [vmem:[%s2525_s11 + $0x38] sm:$0xff] }
 0x2c4   :  { %v1358_v59 = vpack.c.bf16 %v746_v56, %v745_v55 }
 0x2c6   :  { %1391 = vmatpush3.bf16.msra.mxu1 %v1390_v61  ;;  %v747_v61 = vld [vmem:[%s2525_s11 + $0x40] sm:$0xff] }
 0x2c7   :  { %1393 = vmatprep.subr.bf16.mxu1 %v1392_v62  ;;  %v748_v62 = vld [vmem:[%s2525_s11 + $0x48] sm:$0xff] }
 0x2c8   :  { %v1362_v1 = vpack.c.bf16 %v748_v62, %v747_v61 }
 0x2ca   :  { %1395 = vmatpush3.bf16.msra.mxu1 %v1394_v3  ;;  %v749_v3 = vld [vmem:[%s2525_s11 + $0x50] sm:$0xff] }
 0x2cb   :  { %1397 = vmatprep.subr.bf16.mxu1 %v1396_v4  ;;  %v750_v4 = vld [vmem:[%s2525_s11 + $0x58] sm:$0xff] }
 0x2cc   :  { %v1366_v7 = vpack.c.bf16 %v750_v4, %v749_v3 }
 0x2ce   :  { %1399 = vmatpush3.bf16.msra.mxu1 %v1398_v9  ;;  %v751_v9 = vld [vmem:[%s2525_s11 + $0x60] sm:$0xff] }
 0x2cf   :  { %1401 = vmatprep.subr.bf16.mxu1 %v1400_v10  ;;  %v752_v10 = vld [vmem:[%s2525_s11 + $0x68] sm:$0xff] }
 0x2d2   :  { %1403 = vmatpush3.bf16.msra.mxu1 %v1402_v13  ;;  %v1370_v13 = vpack.c.bf16 %v752_v10, %v751_v9 }
 0x2d3   :  { %1405 = vmatprep.subr.bf16.mxu1 %v1404_v24  ;;  %v980_v24 = vld [vmem:[%s2528_s10] ss:$0 sm:$0xff] }
 0x2d6   :  { %1407 = vmatpush3.bf16.msra.mxu1 %v1406_v25 }
 0x38c   :  { %v611_v34 = vpop.f32.mrb[2].mxu1 }
 0x38d   :  { %v613_v45 = vpop.f32.mrb[3].mxu1  ;;  %v612_v38 = vadd.f32 %v611_v34, %v538_v31 }
 0x38e   :  { %v614_v37 = vadd.f32 %v613_v45, %v542_v30 }
 0x390   :  { %719 = vmatprep.mubr.f32.mxu0 %v614_v37  ;;  %952 = vmatprep.mubr.f32.mxu1 %v614_v37 }
 0x391   :  { %720 = vmatmul.mubr.f32.vlgmr.msra.gmra.mrb[4].mxu0 %v612_v38  ;;  %953 = vmatmul.mubr.f32.vlgmr.msra.gmra.mrb[4].mxu1 %v612_v38 }
 0x392   :  { %1347 = vmatpush3.bf16.msra.mxu0 %v1346_v43  ;;  %842 = vmatprep.mubr.f32.mxu0 %v614_v37 }
 0x393   :  { %1349 = vmatprep.subr.bf16.mxu0 %v1348_v39 }
 0x396   :  { %1351 = vmatpush3.bf16.msra.mxu0 %v1350_v47 }
 0x397   :  { %1353 = vmatprep.subr.bf16.mxu0 %v1352_v48 }
 0x39a   :  { %1355 = vmatpush3.bf16.msra.mxu0 %v1354_v53 }
 0x39b   :  { %1357 = vmatprep.subr.bf16.mxu0 %v1356_v54 }
 0x39e   :  { %1359 = vmatpush3.bf16.msra.mxu0 %v1358_v59 }
 0x39f   :  { %1361 = vmatprep.subr.bf16.mxu0 %v1360_v60 }
 0x3a2   :  { %1363 = vmatpush3.bf16.msra.mxu0 %v1362_v1 }
 0x3a3   :  { %1365 = vmatprep.subr.bf16.mxu0 %v1364_v2 }
 0x3a6   :  { %1367 = vmatpush3.bf16.msra.mxu0 %v1366_v7 }
 0x3a7   :  { %1369 = vmatprep.subr.bf16.mxu0 %v1368_v8 }
 0x3aa   :  { %1371 = vmatpush3.bf16.msra.mxu0 %v1370_v13 }
 0x3ab   :  { %1373 = vmatprep.subr.bf16.mxu0 %v1372_v14 }
 0x3ae   :  { %1375 = vmatpush3.bf16.msra.mxu0 %v1374_v17 }
 0x3b1   :  { %843 = vmatmul.mubr.f32.vlgmr.msra.gmra.mrb[6].mxu0 %v612_v38 }
 0x464   :  { %v1015_v19 = vpop.f32.mrb[4].mxu0  ;;  %v1085_v20 = vpop.f32.mrb[4].mxu1 }
 0x465   :  { %v1016_v21 = vpop.f32.mrb[5].mxu0  ;;  %v1086_v23 = vpop.f32.mrb[5].mxu1 }
 0x466   :  { %v1017_v25 = vadd.f32 %v1016_v21, %v1015_v19  ;;  %v1087_v26 = vadd.f32 %v1086_v23, %v1085_v20 }
 0x468   :  { %v955_v27 = vadd.f32 %v1087_v26, %v982_v22  ;;  %v722_v28 = vadd.f32 %v1017_v25, %v980_v24 }
 0x46a   :  { %v959_v29 = vand.u32 2147483647, %v955_v27  ;;  %v728_v30 = vsel %vm727_vm0, %v722_v28, -1e+30  ;;  %v958_v43 = vmax.f32 %v955_v27, 0.0 }
 0x46b   :  { %729 = vmax.xlane.f32.xlu0 %v728_v30 }
 0x46c   :  { %v960_v41 = vsub.f32 0.0, %v959_v29 }
 0x46e   :  { %v961_v31 = vmul.f32 1.442695, %v960_v41 }
 0x470   :  { %1409 = vpow2.f32 %v961_v31 }
 0x47a   :  { %v1410_v32 = vpop.eup %1409 }
 0x47b   :  { %v963_v33 = vadd.f32 1.0, %v1410_v32 }
 0x47d   :  { %1411 = vlog2.f32 %v963_v33 }
 0x484   :  { %v1050_v34 = vpop.f32.mrb[6].mxu0 }
 0x485   :  { %v1051_v36 = vpop.f32.mrb[7].mxu0 }
 0x486   :  { %v1052_v45 = vadd.f32 %v1051_v36, %v1050_v34 }
 0x487   :  { %v1412_v37 = vpop.eup %1411 }
 0x488   :  { %v965_v38 = vmul.f32 0.6931472, %v1412_v37  ;;  %v845_v39 = vadd.f32 %v1052_v45, %v981_v35 }
 0x48a   :  { %v966_v40 = vadd.f32 %v965_v38, %v958_v43  ;;  %848 = vst [vmem:[%s2530_s16] sm:$0xff] %v845_v39 }
 0x48c   :  { %967 = vst [vmem:[%s2531_s17] sm:$0xff] %v966_v40 }
 0x4f8   :  { %v730_v42 = vpop.xlane.xlu0 %729 }
 0x4f9   :  { %v731_v44 = vsub.f32 %v728_v30, %v730_v42 }
 0x4fb   :  { %v732_v46 = vmul.f32 1.442695, %v731_v44 }
 0x4fd   :  { %1413 = vpow2.f32 %v732_v46 }
 0x507   :  { %v1414_v47 = vpop.eup %1413 }
 0x508   :  { %734 = vadd.xlane.f32.xlu0 %v1414_v47 }
 0x595   :  { %v735_v48 = vpop.xlane.xlu0 %734 }
 0x596   :  { %1415 = vrcp.f32 %v735_v48 }
 0x5a0   :  { %v1416_v49 = vpop.eup %1415 }
 0x5a1   :  { %v737_v50 = vmul.f32 %v1416_v49, %v1414_v47 }
 0x5a3   :  { %738 = vst [vmem:[%s2532_s15] sm:$0xff] %v737_v50 }

</bundles_post_ra>
